<compile_context>
chip_gen: v6e
topology: v6e:2x2x1
jax: 0.10.0
libtpu: 0.0.40
codegen_flags: <defaults>
</compile_context>

<pallas_src>
import jax
import jax.numpy as jnp
from jax.experimental import pallas as pl
from jax.experimental.pallas import tpu as pltpu


# --------------------------------------------------------------------------
# Pallas kernel (fused embedding + 2-layer wavefront LSTM + last-step fc+sigmoid)
# --------------------------------------------------------------------------
def _full_spec(shape):
    zeros = (0,) * len(shape)
    return pl.BlockSpec(shape, lambda: zeros)


def _fused_sentiment_lstm_call(tok, emb, wih0, whh0, b0, w1cat, b1,
                               fcw, fcb, h0, c0, *, T, Bp, V, E, H, O):
    """tok: (T*Bp, 1) int32 time-major token ids (batch padded to Bp, mult of 16).
    emb: (V, E) bf16.  wih0: (E, 4H) bf16, whh0: (H, 4H) bf16, b0: (1, 4H) f32.
    w1cat = [W_ih1; W_hh1]: (2H, 4H) bf16, b1: (1, 4H) f32.  Gate order [i,f,g,o].
    Returns (sig (Bp, O) f32, h_n (2, Bp, H) f32, c_n (2, Bp, H) f32)."""
    TB = T * Bp
    G = 4 * H
    unroll = True if T <= 16 else 8        # cap unroll for long sequences

    def kernel(tok_ref, emb_ref, wih0_ref, whh0_ref, b0_ref, w1_ref, b1_ref,
               fcw_ref, fcb_ref, h0_ref, c0_ref,
               sig_ref, hn_ref, cn_ref, xproj_sc):

        def lstm_gates(pre, c_prev):
            # gate / elementwise math in f32 (native path on v5e/v6e/v7x)
            i_g = jax.nn.sigmoid(pre[:, 0 * H:1 * H])
            f_g = jax.nn.sigmoid(pre[:, 1 * H:2 * H])
            g_g = jnp.tanh(pre[:, 2 * H:3 * H])
            o_g = jax.nn.sigmoid(pre[:, 3 * H:4 * H])
            c_new = f_g * c_prev + i_g * g_g
            h_new = o_g * jnp.tanh(c_new)
            return h_new, c_new

        # ---- in-kernel embedding gather via one-hot MXU matmul (V is tiny) ----
        lane = jax.lax.broadcasted_iota(jnp.int32, (TB, V), 1)
        onehot = (tok_ref[...] == lane).astype(jnp.bfloat16)            # (TB, V)
        x_bf = jnp.dot(onehot, emb_ref[...],
                       preferred_element_type=jnp.float32).astype(jnp.bfloat16)

        # ---- hoisted layer-0 input projection (+ bias): one big MXU matmul ----
        xproj_sc[...] = (
            jnp.dot(x_bf, wih0_ref[...], preferred_element_type=jnp.float32)
            + b0_ref[...])                                              # (TB, 4H)

        # Weights are read at the dot (NOT hoisted) -> no vregs pinned across
        # the unrolled loop; per-step vld hides under MXU latency.
        def cell0(xp, h0p, c0p):          # layer-0 step, K = H recurrent matmul
            pre = xp + jnp.dot(h0p.astype(jnp.bfloat16), whh0_ref[...],
                               preferred_element_type=jnp.float32)
            return lstm_gates(pre, c0p)

        def cell1(h0_in, h1p, c1p):       # layer-1 step, fused K = 2H matmul
            hcat = jnp.concatenate([h0_in.astype(jnp.bfloat16),
                                    h1p.astype(jnp.bfloat16)], axis=1)
            pre = (jnp.dot(hcat, w1_ref[...], preferred_element_type=jnp.float32)
                   + b1_ref[...])
            return lstm_gates(pre, c1p)

        # ---- wavefront recurrence ----
        # prologue: layer-0 step 0
        h0s, c0s = cell0(xproj_sc[0:Bp, :], h0_ref[0], c0_ref[0])
        h1s, c1s = h0_ref[1], c0_ref[1]

        if T > 1:
            # outer step s: layer-0 step s || layer-1 step s-1
            # (both read only the previous carry -> independent chains overlap)
            def step(s, carry):
                h0p, c0p, h1p, c1p = carry
                row = pl.multiple_of(s * Bp, Bp)      # Bp is a multiple of 16
                nh0, nc0 = cell0(xproj_sc[pl.ds(row, Bp), :], h0p, c0p)
                nh1, nc1 = cell1(h0p, h1p, c1p)
                return nh0, nc0, nh1, nc1

            h0s, c0s, h1s, c1s = jax.lax.fori_loop(
                1, T, step, (h0s, c0s, h1s, c1s), unroll=unroll)

        # epilogue: layer-1 step T-1
        h1s, c1s = cell1(h0s, h1s, c1s)

        # ---- final state + fc + sigmoid on the LAST timestep only ----
        hn_ref[0] = h0s
        cn_ref[0] = c0s
        hn_ref[1] = h1s
        cn_ref[1] = c1s
        sig_ref[...] = jax.nn.sigmoid(
            jnp.dot(h1s, fcw_ref[...], preferred_element_type=jnp.float32)
            + fcb_ref[...])

    return pl.pallas_call(
        kernel,
        out_shape=(jax.ShapeDtypeStruct((Bp, O), jnp.float32),
                   jax.ShapeDtypeStruct((2, Bp, H), jnp.float32),
                   jax.ShapeDtypeStruct((2, Bp, H), jnp.float32)),
        in_specs=[_full_spec((TB, 1)),
                  _full_spec((V, E)),
                  _full_spec((E, G)), _full_spec((H, G)), _full_spec((1, G)),
                  _full_spec((2 * H, G)), _full_spec((1, G)),
                  _full_spec((H, O)), _full_spec((1, O)),
                  _full_spec((2, Bp, H)), _full_spec((2, Bp, H))],
        out_specs=(_full_spec((Bp, O)),
                   _full_spec((2, Bp, H)),
                   _full_spec((2, Bp, H))),
        scratch_shapes=[pltpu.VMEM((TB, G), jnp.float32)],   # hoisted projection
        compiler_params=pltpu.CompilerParams(
            vmem_limit_bytes=32 * 1024 * 1024),
    )(tok, emb, wih0, whh0, b0, w1cat, b1, fcw, fcb, h0, c0)


# --------------------------------------------------------------------------
# Model wrapper
# --------------------------------------------------------------------------
def init_params(key, vocab_size, embedding_dim, hidden_dim, n_layers, output_size):
    keys = jax.random.split(key, 3 + 3 * n_layers)
    scale = 0.1
    params = {
        "embedding": scale * jax.random.normal(
            keys[0], (vocab_size, embedding_dim), jnp.float32),
        "fc_w": scale * jax.random.normal(
            keys[1], (hidden_dim, output_size), jnp.float32),
        "fc_b": scale * jax.random.normal(keys[2], (1, output_size), jnp.float32),
        "lstm": [],
    }
    k = 3
    for layer in range(n_layers):
        in_dim = embedding_dim if layer == 0 else hidden_dim
        w_ih = scale * jax.random.normal(keys[k], (in_dim, 4 * hidden_dim), jnp.float32)
        w_hh = scale * jax.random.normal(keys[k + 1], (hidden_dim, 4 * hidden_dim), jnp.float32)
        b = scale * jax.random.normal(keys[k + 2], (1, 4 * hidden_dim), jnp.float32)
        params["lstm"].append({"w_ih": w_ih, "w_hh": w_hh, "b": b})
        k += 3
    return params


@jax.jit
def sentiment_lstm_forward(params, x_tokens, hidden):
    """x_tokens: (B, T) int32, hidden: (h0, c0) each (n_layers, B, H).
    Returns (sig_out (B,), (h_n, c_n))."""
    h0_all, c0_all = hidden
    B, T = x_tokens.shape
    n_layers, _, H = h0_all.shape
    assert n_layers == 2, "kernel is specialized for the module's n_layers=2"
    V, E = params["embedding"].shape
    O = params["fc_w"].shape[-1]
    Bp = max(16, ((B + 15) // 16) * 16)   # pad batch to a full bf16 sublane pack

    # Only tiny glue remains in the wrapper: time-major padded int32 token ids
    # (the embedding gather / cast of large float arrays happens in-kernel).
    tok = jnp.transpose(x_tokens, (1, 0)).astype(jnp.int32)       # (T, B)
    tok = jnp.pad(tok, ((0, 0), (0, Bp - B))).reshape(T * Bp, 1)

    h0p = jnp.pad(h0_all, ((0, 0), (0, Bp - B), (0, 0)))
    c0p = jnp.pad(c0_all, ((0, 0), (0, Bp - B), (0, 0)))

    lp0, lp1 = params["lstm"]
    # fused layer-1 weight: [W_ih1; W_hh1] -> single K=2H matmul per step
    w1cat = jnp.concatenate([lp1["w_ih"], lp1["w_hh"]], axis=0).astype(jnp.bfloat16)

    sig, hn, cn = _fused_sentiment_lstm_call(
        tok,
        params["embedding"].astype(jnp.bfloat16),
        lp0["w_ih"].astype(jnp.bfloat16), lp0["w_hh"].astype(jnp.bfloat16), lp0["b"],
        w1cat, lp1["b"],
        params["fc_w"], params["fc_b"], h0p, c0p,
        T=T, Bp=Bp, V=V, E=E, H=H, O=O)

    # dropout(0.4) and LSTM inter-layer dropout are identity in eval mode.
    sig_out = sig[:B, 0]                      # == sigmoid(fc(h_T)) == sig[:, -1]
    return sig_out, (hn[:, :B, :], cn[:, :B, :])


# --------------------------------------------------------------------------
# Pure-JAX reference (for correctness check)
# --------------------------------------------------------------------------
def reference_forward(params, x_tokens, hidden):
    h0_all, c0_all = hidden
    B, T = x_tokens.shape
    H = h0_all.shape[-1]
    embedded = jnp.take(params["embedding"], x_tokens, axis=0)
    layer_in = jnp.transpose(embedded, (1, 0, 2))  # (T, B, E)
    h_finals, c_finals = [], []
    for layer_idx, lp in enumerate(params["lstm"]):
        def step(carry, x_t, lp=lp):
            h, c = carry
            gates = x_t @ lp["w_ih"] + h @ lp["w_hh"] + lp["b"]
            i_g = jax.nn.sigmoid(gates[:, 0 * H:1 * H])
            f_g = jax.nn.sigmoid(gates[:, 1 * H:2 * H])
            g_g = jnp.tanh(gates[:, 2 * H:3 * H])
            o_g = jax.nn.sigmoid(gates[:, 3 * H:4 * H])
            c_new = f_g * c + i_g * g_g
            h_new = o_g * jnp.tanh(c_new)
            return (h_new, c_new), h_new
        (h_n, c_n), h_seq = jax.lax.scan(
            step, (h0_all[layer_idx], c0_all[layer_idx]), layer_in)
        h_finals.append(h_n)
        c_finals.append(c_n)
        layer_in = h_seq
    rnn_out = jnp.transpose(layer_in, (1, 0, 2)).reshape(B * T, H)
    sig = jax.nn.sigmoid(rnn_out @ params["fc_w"] + params["fc_b"])
    return sig.reshape(B, -1)[:, -1], (jnp.stack(h_finals), jnp.stack(c_finals))


# --------------------------------------------------------------------------
# Main
# --------------------------------------------------------------------------
if __name__ == "__main__":
    # Small, TPU-friendly shapes consistent with the module's forward pass.
    vocab_size = 50
    embedding_dim = 128
    hidden_dim = 128
    n_layers = 2
    output_size = 1
    batch = 2
    seq_len = 8

    key = jax.random.PRNGKey(0)
    pkey, xkey = jax.random.split(key)
    params = init_params(pkey, vocab_size, embedding_dim, hidden_dim,
                         n_layers, output_size)

    x_tokens = jax.random.randint(xkey, (batch, seq_len), 0, vocab_size, jnp.int32)
    # init_hidden(): zeros
    h0 = jnp.zeros((n_layers, batch, hidden_dim), jnp.float32)
    c0 = jnp.zeros((n_layers, batch, hidden_dim), jnp.float32)

    sig_out, (h_n, c_n) = sentiment_lstm_forward(params, x_tokens, (h0, c0))
    jax.block_until_ready((sig_out, h_n, c_n))

    # correctness check against pure-JAX f32 reference
    # (tolerance loosened because MXU operands are bf16 with f32 accumulation)
    ref_sig, (ref_h, ref_c) = reference_forward(params, x_tokens, (h0, c0))
    assert sig_out.shape == (batch,)
    assert h_n.shape == (n_layers, batch, hidden_dim)
    assert c_n.shape == (n_layers, batch, hidden_dim)
    assert jnp.allclose(sig_out, ref_sig, atol=2e-2, rtol=2e-2)
    assert jnp.allclose(h_n, ref_h, atol=2e-2, rtol=2e-2)
    assert jnp.allclose(c_n, ref_c, atol=2e-2, rtol=2e-2)

    print("KERNEL_OK")
</pallas_src>

<mosaic_0001>
module attributes {stable_mosaic.version = 11 : i64} {
  func.func @kernel(%arg0: memref<128x1xi32, #tpu.memory_space<vmem>>, %arg1: memref<50x128xbf16, #tpu.memory_space<vmem>>, %arg2: memref<128x512xbf16, #tpu.memory_space<vmem>>, %arg3: memref<128x512xbf16, #tpu.memory_space<vmem>>, %arg4: memref<1x512xf32, #tpu.memory_space<vmem>>, %arg5: memref<256x512xbf16, #tpu.memory_space<vmem>>, %arg6: memref<1x512xf32, #tpu.memory_space<vmem>>, %arg7: memref<128x1xf32, #tpu.memory_space<vmem>>, %arg8: memref<1x1xf32, #tpu.memory_space<vmem>>, %arg9: memref<2x16x128xf32, #tpu.memory_space<vmem>>, %arg10: memref<2x16x128xf32, #tpu.memory_space<vmem>>, %arg11: memref<16x1xf32, #tpu.memory_space<vmem>>, %arg12: memref<2x16x128xf32, #tpu.memory_space<vmem>>, %arg13: memref<2x16x128xf32, #tpu.memory_space<vmem>>, %arg14: memref<128x512xf32, #tpu.memory_space<vmem>>) attributes {dimension_semantics = [], scalar_prefetch = 0 : i64, scratch_operands = 1 : i64, tpu.core_type = #tpu.core_type<tc>} {
    %0 = tpu.iota {dimensions = array<i32: 1>} : vector<128x50xi32>
    %c0 = arith.constant 0 : index
    %c0_0 = arith.constant 0 : index
    %1 = vector.load %arg0[%c0, %c0_0] : memref<128x1xi32, #tpu.memory_space<vmem>>, vector<128x1xi32>
    %2 = vector.broadcast %1 : vector<128x1xi32> to vector<128x50xi32>
    %3 = arith.cmpi eq, %2, %0 : vector<128x50xi32>
    %4 = arith.extui %3 : vector<128x50xi1> to vector<128x50xi32>
    %5 = arith.sitofp %4 : vector<128x50xi32> to vector<128x50xf32>
    %6 = arith.truncf %5 : vector<128x50xf32> to vector<128x50xbf16>
    %c0_1 = arith.constant 0 : index
    %c0_2 = arith.constant 0 : index
    %7 = vector.load %arg1[%c0_1, %c0_2] : memref<50x128xbf16, #tpu.memory_space<vmem>>, vector<50x128xbf16>
    %cst = arith.constant dense<0.000000e+00> : vector<128x128xf32>
    %8 = tpu.matmul %6, %7, %cst {dimension_numbers = #tpu.dot_dimension_numbers<[1], [0], [0], [1], [0, 0, 1, 1], [], []>} : vector<128x50xbf16>, vector<50x128xbf16>, vector<128x128xf32> -> vector<128x128xf32>
    %9 = arith.truncf %8 : vector<128x128xf32> to vector<128x128xbf16>
    %c0_3 = arith.constant 0 : index
    %c0_4 = arith.constant 0 : index
    %10 = vector.load %arg2[%c0_3, %c0_4] : memref<128x512xbf16, #tpu.memory_space<vmem>>, vector<128x512xbf16>
    %cst_5 = arith.constant dense<0.000000e+00> : vector<128x512xf32>
    %11 = tpu.matmul %9, %10, %cst_5 {dimension_numbers = #tpu.dot_dimension_numbers<[1], [0], [0], [1], [0, 0, 1, 1], [], []>} : vector<128x128xbf16>, vector<128x512xbf16>, vector<128x512xf32> -> vector<128x512xf32>
    %c0_6 = arith.constant 0 : index
    %c0_7 = arith.constant 0 : index
    %12 = vector.load %arg4[%c0_6, %c0_7] : memref<1x512xf32, #tpu.memory_space<vmem>>, vector<1x512xf32>
    %13 = vector.broadcast %12 : vector<1x512xf32> to vector<128x512xf32>
    %14 = arith.addf %11, %13 : vector<128x512xf32>
    %c0_8 = arith.constant 0 : index
    %c0_9 = arith.constant 0 : index
    %15 = vector.load %arg14[%c0_8, %c0_9] : memref<128x512xf32, #tpu.memory_space<vmem>>, vector<128x512xf32>
    tpu.vector_store %arg14[%c0_8, %c0_9], %14 {strides = array<i32>} : memref<128x512xf32, #tpu.memory_space<vmem>>, vector<128x512xf32>,
    %c0_10 = arith.constant 0 : index
    %c0_11 = arith.constant 0 : index
    %16 = vector.load %arg14[%c0_10, %c0_11] : memref<128x512xf32, #tpu.memory_space<vmem>>, vector<16x512xf32>
    %c0_12 = arith.constant 0 : index
    %c0_13 = arith.constant 0 : index
    %c0_14 = arith.constant 0 : index
    %17 = vector.load %arg9[%c0_12, %c0_13, %c0_14] : memref<2x16x128xf32, #tpu.memory_space<vmem>>, vector<1x16x128xf32>
    %18 = vector.shape_cast %17 : vector<1x16x128xf32> to vector<16x128xf32>
    %c0_15 = arith.constant 0 : index
    %c0_16 = arith.constant 0 : index
    %c0_17 = arith.constant 0 : index
    %19 = vector.load %arg10[%c0_15, %c0_16, %c0_17] : memref<2x16x128xf32, #tpu.memory_space<vmem>>, vector<1x16x128xf32>
    %20 = vector.shape_cast %19 : vector<1x16x128xf32> to vector<16x128xf32>
    %21 = arith.truncf %18 : vector<16x128xf32> to vector<16x128xbf16>
    %c0_18 = arith.constant 0 : index
    %c0_19 = arith.constant 0 : index
    %22 = vector.load %arg3[%c0_18, %c0_19] : memref<128x512xbf16, #tpu.memory_space<vmem>>, vector<128x512xbf16>
    %cst_20 = arith.constant dense<0.000000e+00> : vector<16x512xf32>
    %23 = tpu.matmul %21, %22, %cst_20 {dimension_numbers = #tpu.dot_dimension_numbers<[1], [0], [0], [1], [0, 0, 1, 1], [], []>} : vector<16x128xbf16>, vector<128x512xbf16>, vector<16x512xf32> -> vector<16x512xf32>
    %24 = arith.addf %16, %23 : vector<16x512xf32>
    %25 = vector.extract_strided_slice %24 {offsets = [0, 0], sizes = [16, 128], strides = [1, 1]} : vector<16x512xf32> to vector<16x128xf32>
    %26 = arith.negf %25 : vector<16x128xf32>
    %27 = math.exp %26 : vector<16x128xf32>
    %cst_21 = arith.constant 1.000000e+00 : f32
    %28 = vector.broadcast %cst_21 : f32 to vector<16x128xf32>
    %29 = arith.addf %28, %27 : vector<16x128xf32>
    %30 = arith.divf %28, %29 : vector<16x128xf32>
    %31 = vector.extract_strided_slice %24 {offsets = [0, 128], sizes = [16, 128], strides = [1, 1]} : vector<16x512xf32> to vector<16x128xf32>
    %32 = arith.negf %31 : vector<16x128xf32>
    %33 = math.exp %32 : vector<16x128xf32>
    %cst_22 = arith.constant 1.000000e+00 : f32
    %34 = vector.broadcast %cst_22 : f32 to vector<16x128xf32>
    %35 = arith.addf %34, %33 : vector<16x128xf32>
    %36 = arith.divf %34, %35 : vector<16x128xf32>
    %37 = vector.extract_strided_slice %24 {offsets = [0, 256], sizes = [16, 128], strides = [1, 1]} : vector<16x512xf32> to vector<16x128xf32>
    %38 = math.tanh %37 : vector<16x128xf32>
    %39 = vector.extract_strided_slice %24 {offsets = [0, 384], sizes = [16, 128], strides = [1, 1]} : vector<16x512xf32> to vector<16x128xf32>
    %40 = arith.negf %39 : vector<16x128xf32>
    %41 = math.exp %40 : vector<16x128xf32>
    %cst_23 = arith.constant 1.000000e+00 : f32
    %42 = vector.broadcast %cst_23 : f32 to vector<16x128xf32>
    %43 = arith.addf %42, %41 : vector<16x128xf32>
    %44 = arith.divf %42, %43 : vector<16x128xf32>
    %45 = arith.mulf %36, %20 : vector<16x128xf32>
    %46 = arith.mulf %30, %38 : vector<16x128xf32>
    %47 = arith.addf %45, %46 : vector<16x128xf32>
    %48 = math.tanh %47 : vector<16x128xf32>
    %49 = arith.mulf %44, %48 : vector<16x128xf32>
    %c1 = arith.constant 1 : index
    %c0_24 = arith.constant 0 : index
    %c0_25 = arith.constant 0 : index
    %50 = vector.load %arg9[%c1, %c0_24, %c0_25] : memref<2x16x128xf32, #tpu.memory_space<vmem>>, vector<1x16x128xf32>
    %51 = vector.shape_cast %50 : vector<1x16x128xf32> to vector<16x128xf32>
    %c1_26 = arith.constant 1 : index
    %c0_27 = arith.constant 0 : index
    %c0_28 = arith.constant 0 : index
    %52 = vector.load %arg10[%c1_26, %c0_27, %c0_28] : memref<2x16x128xf32, #tpu.memory_space<vmem>>, vector<1x16x128xf32>
    %53 = vector.shape_cast %52 : vector<1x16x128xf32> to vector<16x128xf32>
    %c1_i32 = arith.constant 1 : i32
    %c16_i32 = arith.constant 16 : i32
    %54 = arith.muli %c1_i32, %c16_i32 : i32
    %55 = tpu.assume_multiple %54, 16 : i32
    %56 = arith.index_cast %55 : i32 to index
    %c0_29 = arith.constant 0 : index
    %57 = vector.load %arg14[%56, %c0_29] : memref<128x512xf32, #tpu.memory_space<vmem>>, vector<16x512xf32>
    %58 = arith.truncf %49 : vector<16x128xf32> to vector<16x128xbf16>
    %c0_30 = arith.constant 0 : index
    %c0_31 = arith.constant 0 : index
    %59 = vector.load %arg3[%c0_30, %c0_31] : memref<128x512xbf16, #tpu.memory_space<vmem>>, vector<128x512xbf16>
    %cst_32 = arith.constant dense<0.000000e+00> : vector<16x512xf32>
    %60 = tpu.matmul %58, %59, %cst_32 {dimension_numbers = #tpu.dot_dimension_numbers<[1], [0], [0], [1], [0, 0, 1, 1], [], []>} : vector<16x128xbf16>, vector<128x512xbf16>, vector<16x512xf32> -> vector<16x512xf32>
    %61 = arith.addf %57, %60 : vector<16x512xf32>
    %62 = vector.extract_strided_slice %61 {offsets = [0, 0], sizes = [16, 128], strides = [1, 1]} : vector<16x512xf32> to vector<16x128xf32>
    %63 = arith.negf %62 : vector<16x128xf32>
    %64 = math.exp %63 : vector<16x128xf32>
    %cst_33 = arith.constant 1.000000e+00 : f32
    %65 = vector.broadcast %cst_33 : f32 to vector<16x128xf32>
    %66 = arith.addf %65, %64 : vector<16x128xf32>
    %67 = arith.divf %65, %66 : vector<16x128xf32>
    %68 = vector.extract_strided_slice %61 {offsets = [0, 128], sizes = [16, 128], strides = [1, 1]} : vector<16x512xf32> to vector<16x128xf32>
    %69 = arith.negf %68 : vector<16x128xf32>
    %70 = math.exp %69 : vector<16x128xf32>
    %cst_34 = arith.constant 1.000000e+00 : f32
    %71 = vector.broadcast %cst_34 : f32 to vector<16x128xf32>
    %72 = arith.addf %71, %70 : vector<16x128xf32>
    %73 = arith.divf %71, %72 : vector<16x128xf32>
    %74 = vector.extract_strided_slice %61 {offsets = [0, 256], sizes = [16, 128], strides = [1, 1]} : vector<16x512xf32> to vector<16x128xf32>
    %75 = math.tanh %74 : vector<16x128xf32>
    %76 = vector.extract_strided_slice %61 {offsets = [0, 384], sizes = [16, 128], strides = [1, 1]} : vector<16x512xf32> to vector<16x128xf32>
    %77 = arith.negf %76 : vector<16x128xf32>
    %78 = math.exp %77 : vector<16x128xf32>
    %cst_35 = arith.constant 1.000000e+00 : f32
    %79 = vector.broadcast %cst_35 : f32 to vector<16x128xf32>
    %80 = arith.addf %79, %78 : vector<16x128xf32>
    %81 = arith.divf %79, %80 : vector<16x128xf32>
    %82 = arith.mulf %73, %47 : vector<16x128xf32>
    %83 = arith.mulf %67, %75 : vector<16x128xf32>
    %84 = arith.addf %82, %83 : vector<16x128xf32>
    %85 = math.tanh %84 : vector<16x128xf32>
    %86 = arith.mulf %81, %85 : vector<16x128xf32>
    %87 = arith.truncf %49 : vector<16x128xf32> to vector<16x128xbf16>
    %88 = arith.truncf %51 : vector<16x128xf32> to vector<16x128xbf16>
    %89 = tpu.concatenate %87, %88 in 1 : vector<16x128xbf16>, vector<16x128xbf16> -> vector<16x256xbf16>
    %c0_36 = arith.constant 0 : index
    %c0_37 = arith.constant 0 : index
    %90 = vector.load %arg5[%c0_36, %c0_37] : memref<256x512xbf16, #tpu.memory_space<vmem>>, vector<256x512xbf16>
    %cst_38 = arith.constant dense<0.000000e+00> : vector<16x512xf32>
    %91 = tpu.matmul %89, %90, %cst_38 {dimension_numbers = #tpu.dot_dimension_numbers<[1], [0], [0], [1], [0, 0, 1, 1], [], []>} : vector<16x256xbf16>, vector<256x512xbf16>, vector<16x512xf32> -> vector<16x512xf32>
    %c0_39 = arith.constant 0 : index
    %c0_40 = arith.constant 0 : index
    %92 = vector.load %arg6[%c0_39, %c0_40] : memref<1x512xf32, #tpu.memory_space<vmem>>, vector<1x512xf32>
    %93 = vector.broadcast %92 : vector<1x512xf32> to vector<16x512xf32>
    %94 = arith.addf %91, %93 : vector<16x512xf32>
    %95 = vector.extract_strided_slice %94 {offsets = [0, 0], sizes = [16, 128], strides = [1, 1]} : vector<16x512xf32> to vector<16x128xf32>
    %96 = arith.negf %95 : vector<16x128xf32>
    %97 = math.exp %96 : vector<16x128xf32>
    %cst_41 = arith.constant 1.000000e+00 : f32
    %98 = vector.broadcast %cst_41 : f32 to vector<16x128xf32>
    %99 = arith.addf %98, %97 : vector<16x128xf32>
    %100 = arith.divf %98, %99 : vector<16x128xf32>
    %101 = vector.extract_strided_slice %94 {offsets = [0, 128], sizes = [16, 128], strides = [1, 1]} : vector<16x512xf32> to vector<16x128xf32>
    %102 = arith.negf %101 : vector<16x128xf32>
    %103 = math.exp %102 : vector<16x128xf32>
    %cst_42 = arith.constant 1.000000e+00 : f32
    %104 = vector.broadcast %cst_42 : f32 to vector<16x128xf32>
    %105 = arith.addf %104, %103 : vector<16x128xf32>
    %106 = arith.divf %104, %105 : vector<16x128xf32>
    %107 = vector.extract_strided_slice %94 {offsets = [0, 256], sizes = [16, 128], strides = [1, 1]} : vector<16x512xf32> to vector<16x128xf32>
    %108 = math.tanh %107 : vector<16x128xf32>
    %109 = vector.extract_strided_slice %94 {offsets = [0, 384], sizes = [16, 128], strides = [1, 1]} : vector<16x512xf32> to vector<16x128xf32>
    %110 = arith.negf %109 : vector<16x128xf32>
    %111 = math.exp %110 : vector<16x128xf32>
    %cst_43 = arith.constant 1.000000e+00 : f32
    %112 = vector.broadcast %cst_43 : f32 to vector<16x128xf32>
    %113 = arith.addf %112, %111 : vector<16x128xf32>
    %114 = arith.divf %112, %113 : vector<16x128xf32>
    %115 = arith.mulf %106, %53 : vector<16x128xf32>
    %116 = arith.mulf %100, %108 : vector<16x128xf32>
    %117 = arith.addf %115, %116 : vector<16x128xf32>
    %118 = math.tanh %117 : vector<16x128xf32>
    %119 = arith.mulf %114, %118 : vector<16x128xf32>
    %c2_i32 = arith.constant 2 : i32
    %c16_i32_44 = arith.constant 16 : i32
    %120 = arith.muli %c2_i32, %c16_i32_44 : i32
    %121 = tpu.assume_multiple %120, 16 : i32
    %122 = arith.index_cast %121 : i32 to index
    %c0_45 = arith.constant 0 : index
    %123 = vector.load %arg14[%122, %c0_45] : memref<128x512xf32, #tpu.memory_space<vmem>>, vector<16x512xf32>
    %124 = arith.truncf %86 : vector<16x128xf32> to vector<16x128xbf16>
    %c0_46 = arith.constant 0 : index
    %c0_47 = arith.constant 0 : index
    %125 = vector.load %arg3[%c0_46, %c0_47] : memref<128x512xbf16, #tpu.memory_space<vmem>>, vector<128x512xbf16>
    %cst_48 = arith.constant dense<0.000000e+00> : vector<16x512xf32>
    %126 = tpu.matmul %124, %125, %cst_48 {dimension_numbers = #tpu.dot_dimension_numbers<[1], [0], [0], [1], [0, 0, 1, 1], [], []>} : vector<16x128xbf16>, vector<128x512xbf16>, vector<16x512xf32> -> vector<16x512xf32>
    %127 = arith.addf %123, %126 : vector<16x512xf32>
    %128 = vector.extract_strided_slice %127 {offsets = [0, 0], sizes = [16, 128], strides = [1, 1]} : vector<16x512xf32> to vector<16x128xf32>
    %129 = arith.negf %128 : vector<16x128xf32>
    %130 = math.exp %129 : vector<16x128xf32>
    %cst_49 = arith.constant 1.000000e+00 : f32
    %131 = vector.broadcast %cst_49 : f32 to vector<16x128xf32>
    %132 = arith.addf %131, %130 : vector<16x128xf32>
    %133 = arith.divf %131, %132 : vector<16x128xf32>
    %134 = vector.extract_strided_slice %127 {offsets = [0, 128], sizes = [16, 128], strides = [1, 1]} : vector<16x512xf32> to vector<16x128xf32>
    %135 = arith.negf %134 : vector<16x128xf32>
    %136 = math.exp %135 : vector<16x128xf32>
    %cst_50 = arith.constant 1.000000e+00 : f32
    %137 = vector.broadcast %cst_50 : f32 to vector<16x128xf32>
    %138 = arith.addf %137, %136 : vector<16x128xf32>
    %139 = arith.divf %137, %138 : vector<16x128xf32>
    %140 = vector.extract_strided_slice %127 {offsets = [0, 256], sizes = [16, 128], strides = [1, 1]} : vector<16x512xf32> to vector<16x128xf32>
    %141 = math.tanh %140 : vector<16x128xf32>
    %142 = vector.extract_strided_slice %127 {offsets = [0, 384], sizes = [16, 128], strides = [1, 1]} : vector<16x512xf32> to vector<16x128xf32>
    %143 = arith.negf %142 : vector<16x128xf32>
    %144 = math.exp %143 : vector<16x128xf32>
    %cst_51 = arith.constant 1.000000e+00 : f32
    %145 = vector.broadcast %cst_51 : f32 to vector<16x128xf32>
    %146 = arith.addf %145, %144 : vector<16x128xf32>
    %147 = arith.divf %145, %146 : vector<16x128xf32>
    %148 = arith.mulf %139, %84 : vector<16x128xf32>
    %149 = arith.mulf %133, %141 : vector<16x128xf32>
    %150 = arith.addf %148, %149 : vector<16x128xf32>
    %151 = math.tanh %150 : vector<16x128xf32>
    %152 = arith.mulf %147, %151 : vector<16x128xf32>
    %153 = arith.truncf %86 : vector<16x128xf32> to vector<16x128xbf16>
    %154 = arith.truncf %119 : vector<16x128xf32> to vector<16x128xbf16>
    %155 = tpu.concatenate %153, %154 in 1 : vector<16x128xbf16>, vector<16x128xbf16> -> vector<16x256xbf16>
    %c0_52 = arith.constant 0 : index
    %c0_53 = arith.constant 0 : index
    %156 = vector.load %arg5[%c0_52, %c0_53] : memref<256x512xbf16, #tpu.memory_space<vmem>>, vector<256x512xbf16>
    %cst_54 = arith.constant dense<0.000000e+00> : vector<16x512xf32>
    %157 = tpu.matmul %155, %156, %cst_54 {dimension_numbers = #tpu.dot_dimension_numbers<[1], [0], [0], [1], [0, 0, 1, 1], [], []>} : vector<16x256xbf16>, vector<256x512xbf16>, vector<16x512xf32> -> vector<16x512xf32>
    %c0_55 = arith.constant 0 : index
    %c0_56 = arith.constant 0 : index
    %158 = vector.load %arg6[%c0_55, %c0_56] : memref<1x512xf32, #tpu.memory_space<vmem>>, vector<1x512xf32>
    %159 = vector.broadcast %158 : vector<1x512xf32> to vector<16x512xf32>
    %160 = arith.addf %157, %159 : vector<16x512xf32>
    %161 = vector.extract_strided_slice %160 {offsets = [0, 0], sizes = [16, 128], strides = [1, 1]} : vector<16x512xf32> to vector<16x128xf32>
    %162 = arith.negf %161 : vector<16x128xf32>
    %163 = math.exp %162 : vector<16x128xf32>
    %cst_57 = arith.constant 1.000000e+00 : f32
    %164 = vector.broadcast %cst_57 : f32 to vector<16x128xf32>
    %165 = arith.addf %164, %163 : vector<16x128xf32>
    %166 = arith.divf %164, %165 : vector<16x128xf32>
    %167 = vector.extract_strided_slice %160 {offsets = [0, 128], sizes = [16, 128], strides = [1, 1]} : vector<16x512xf32> to vector<16x128xf32>
    %168 = arith.negf %167 : vector<16x128xf32>
    %169 = math.exp %168 : vector<16x128xf32>
    %cst_58 = arith.constant 1.000000e+00 : f32
    %170 = vector.broadcast %cst_58 : f32 to vector<16x128xf32>
    %171 = arith.addf %170, %169 : vector<16x128xf32>
    %172 = arith.divf %170, %171 : vector<16x128xf32>
    %173 = vector.extract_strided_slice %160 {offsets = [0, 256], sizes = [16, 128], strides = [1, 1]} : vector<16x512xf32> to vector<16x128xf32>
    %174 = math.tanh %173 : vector<16x128xf32>
    %175 = vector.extract_strided_slice %160 {offsets = [0, 384], sizes = [16, 128], strides = [1, 1]} : vector<16x512xf32> to vector<16x128xf32>
    %176 = arith.negf %175 : vector<16x128xf32>
    %177 = math.exp %176 : vector<16x128xf32>
    %cst_59 = arith.constant 1.000000e+00 : f32
    %178 = vector.broadcast %cst_59 : f32 to vector<16x128xf32>
    %179 = arith.addf %178, %177 : vector<16x128xf32>
    %180 = arith.divf %178, %179 : vector<16x128xf32>
    %181 = arith.mulf %172, %117 : vector<16x128xf32>
    %182 = arith.mulf %166, %174 : vector<16x128xf32>
    %183 = arith.addf %181, %182 : vector<16x128xf32>
    %184 = math.tanh %183 : vector<16x128xf32>
    %185 = arith.mulf %180, %184 : vector<16x128xf32>
    %c3_i32 = arith.constant 3 : i32
    %c16_i32_60 = arith.constant 16 : i32
    %186 = arith.muli %c3_i32, %c16_i32_60 : i32
    %187 = tpu.assume_multiple %186, 16 : i32
    %188 = arith.index_cast %187 : i32 to index
    %c0_61 = arith.constant 0 : index
    %189 = vector.load %arg14[%188, %c0_61] : memref<128x512xf32, #tpu.memory_space<vmem>>, vector<16x512xf32>
    %190 = arith.truncf %152 : vector<16x128xf32> to vector<16x128xbf16>
    %c0_62 = arith.constant 0 : index
    %c0_63 = arith.constant 0 : index
    %191 = vector.load %arg3[%c0_62, %c0_63] : memref<128x512xbf16, #tpu.memory_space<vmem>>, vector<128x512xbf16>
    %cst_64 = arith.constant dense<0.000000e+00> : vector<16x512xf32>
    %192 = tpu.matmul %190, %191, %cst_64 {dimension_numbers = #tpu.dot_dimension_numbers<[1], [0], [0], [1], [0, 0, 1, 1], [], []>} : vector<16x128xbf16>, vector<128x512xbf16>, vector<16x512xf32> -> vector<16x512xf32>
    %193 = arith.addf %189, %192 : vector<16x512xf32>
    %194 = vector.extract_strided_slice %193 {offsets = [0, 0], sizes = [16, 128], strides = [1, 1]} : vector<16x512xf32> to vector<16x128xf32>
    %195 = arith.negf %194 : vector<16x128xf32>
    %196 = math.exp %195 : vector<16x128xf32>
    %cst_65 = arith.constant 1.000000e+00 : f32
    %197 = vector.broadcast %cst_65 : f32 to vector<16x128xf32>
    %198 = arith.addf %197, %196 : vector<16x128xf32>
    %199 = arith.divf %197, %198 : vector<16x128xf32>
    %200 = vector.extract_strided_slice %193 {offsets = [0, 128], sizes = [16, 128], strides = [1, 1]} : vector<16x512xf32> to vector<16x128xf32>
    %201 = arith.negf %200 : vector<16x128xf32>
    %202 = math.exp %201 : vector<16x128xf32>
    %cst_66 = arith.constant 1.000000e+00 : f32
    %203 = vector.broadcast %cst_66 : f32 to vector<16x128xf32>
    %204 = arith.addf %203, %202 : vector<16x128xf32>
    %205 = arith.divf %203, %204 : vector<16x128xf32>
    %206 = vector.extract_strided_slice %193 {offsets = [0, 256], sizes = [16, 128], strides = [1, 1]} : vector<16x512xf32> to vector<16x128xf32>
    %207 = math.tanh %206 : vector<16x128xf32>
    %208 = vector.extract_strided_slice %193 {offsets = [0, 384], sizes = [16, 128], strides = [1, 1]} : vector<16x512xf32> to vector<16x128xf32>
    %209 = arith.negf %208 : vector<16x128xf32>
    %210 = math.exp %209 : vector<16x128xf32>
    %cst_67 = arith.constant 1.000000e+00 : f32
    %211 = vector.broadcast %cst_67 : f32 to vector<16x128xf32>
    %212 = arith.addf %211, %210 : vector<16x128xf32>
    %213 = arith.divf %211, %212 : vector<16x128xf32>
    %214 = arith.mulf %205, %150 : vector<16x128xf32>
    %215 = arith.mulf %199, %207 : vector<16x128xf32>
    %216 = arith.addf %214, %215 : vector<16x128xf32>
    %217 = math.tanh %216 : vector<16x128xf32>
    %218 = arith.mulf %213, %217 : vector<16x128xf32>
    %219 = arith.truncf %152 : vector<16x128xf32> to vector<16x128xbf16>
    %220 = arith.truncf %185 : vector<16x128xf32> to vector<16x128xbf16>
    %221 = tpu.concatenate %219, %220 in 1 : vector<16x128xbf16>, vector<16x128xbf16> -> vector<16x256xbf16>
    %c0_68 = arith.constant 0 : index
    %c0_69 = arith.constant 0 : index
    %222 = vector.load %arg5[%c0_68, %c0_69] : memref<256x512xbf16, #tpu.memory_space<vmem>>, vector<256x512xbf16>
    %cst_70 = arith.constant dense<0.000000e+00> : vector<16x512xf32>
    %223 = tpu.matmul %221, %222, %cst_70 {dimension_numbers = #tpu.dot_dimension_numbers<[1], [0], [0], [1], [0, 0, 1, 1], [], []>} : vector<16x256xbf16>, vector<256x512xbf16>, vector<16x512xf32> -> vector<16x512xf32>
    %c0_71 = arith.constant 0 : index
    %c0_72 = arith.constant 0 : index
    %224 = vector.load %arg6[%c0_71, %c0_72] : memref<1x512xf32, #tpu.memory_space<vmem>>, vector<1x512xf32>
    %225 = vector.broadcast %224 : vector<1x512xf32> to vector<16x512xf32>
    %226 = arith.addf %223, %225 : vector<16x512xf32>
    %227 = vector.extract_strided_slice %226 {offsets = [0, 0], sizes = [16, 128], strides = [1, 1]} : vector<16x512xf32> to vector<16x128xf32>
    %228 = arith.negf %227 : vector<16x128xf32>
    %229 = math.exp %228 : vector<16x128xf32>
    %cst_73 = arith.constant 1.000000e+00 : f32
    %230 = vector.broadcast %cst_73 : f32 to vector<16x128xf32>
    %231 = arith.addf %230, %229 : vector<16x128xf32>
    %232 = arith.divf %230, %231 : vector<16x128xf32>
    %233 = vector.extract_strided_slice %226 {offsets = [0, 128], sizes = [16, 128], strides = [1, 1]} : vector<16x512xf32> to vector<16x128xf32>
    %234 = arith.negf %233 : vector<16x128xf32>
    %235 = math.exp %234 : vector<16x128xf32>
    %cst_74 = arith.constant 1.000000e+00 : f32
    %236 = vector.broadcast %cst_74 : f32 to vector<16x128xf32>
    %237 = arith.addf %236, %235 : vector<16x128xf32>
    %238 = arith.divf %236, %237 : vector<16x128xf32>
    %239 = vector.extract_strided_slice %226 {offsets = [0, 256], sizes = [16, 128], strides = [1, 1]} : vector<16x512xf32> to vector<16x128xf32>
    %240 = math.tanh %239 : vector<16x128xf32>
    %241 = vector.extract_strided_slice %226 {offsets = [0, 384], sizes = [16, 128], strides = [1, 1]} : vector<16x512xf32> to vector<16x128xf32>
    %242 = arith.negf %241 : vector<16x128xf32>
    %243 = math.exp %242 : vector<16x128xf32>
    %cst_75 = arith.constant 1.000000e+00 : f32
    %244 = vector.broadcast %cst_75 : f32 to vector<16x128xf32>
    %245 = arith.addf %244, %243 : vector<16x128xf32>
    %246 = arith.divf %244, %245 : vector<16x128xf32>
    %247 = arith.mulf %238, %183 : vector<16x128xf32>
    %248 = arith.mulf %232, %240 : vector<16x128xf32>
    %249 = arith.addf %247, %248 : vector<16x128xf32>
    %250 = math.tanh %249 : vector<16x128xf32>
    %251 = arith.mulf %246, %250 : vector<16x128xf32>
    %c4_i32 = arith.constant 4 : i32
    %c16_i32_76 = arith.constant 16 : i32
    %252 = arith.muli %c4_i32, %c16_i32_76 : i32
    %253 = tpu.assume_multiple %252, 16 : i32
    %254 = arith.index_cast %253 : i32 to index
    %c0_77 = arith.constant 0 : index
    %255 = vector.load %arg14[%254, %c0_77] : memref<128x512xf32, #tpu.memory_space<vmem>>, vector<16x512xf32>
    %256 = arith.truncf %218 : vector<16x128xf32> to vector<16x128xbf16>
    %c0_78 = arith.constant 0 : index
    %c0_79 = arith.constant 0 : index
    %257 = vector.load %arg3[%c0_78, %c0_79] : memref<128x512xbf16, #tpu.memory_space<vmem>>, vector<128x512xbf16>
    %cst_80 = arith.constant dense<0.000000e+00> : vector<16x512xf32>
    %258 = tpu.matmul %256, %257, %cst_80 {dimension_numbers = #tpu.dot_dimension_numbers<[1], [0], [0], [1], [0, 0, 1, 1], [], []>} : vector<16x128xbf16>, vector<128x512xbf16>, vector<16x512xf32> -> vector<16x512xf32>
    %259 = arith.addf %255, %258 : vector<16x512xf32>
    %260 = vector.extract_strided_slice %259 {offsets = [0, 0], sizes = [16, 128], strides = [1, 1]} : vector<16x512xf32> to vector<16x128xf32>
    %261 = arith.negf %260 : vector<16x128xf32>
    %262 = math.exp %261 : vector<16x128xf32>
    %cst_81 = arith.constant 1.000000e+00 : f32
    %263 = vector.broadcast %cst_81 : f32 to vector<16x128xf32>
    %264 = arith.addf %263, %262 : vector<16x128xf32>
    %265 = arith.divf %263, %264 : vector<16x128xf32>
    %266 = vector.extract_strided_slice %259 {offsets = [0, 128], sizes = [16, 128], strides = [1, 1]} : vector<16x512xf32> to vector<16x128xf32>
    %267 = arith.negf %266 : vector<16x128xf32>
    %268 = math.exp %267 : vector<16x128xf32>
    %cst_82 = arith.constant 1.000000e+00 : f32
    %269 = vector.broadcast %cst_82 : f32 to vector<16x128xf32>
    %270 = arith.addf %269, %268 : vector<16x128xf32>
    %271 = arith.divf %269, %270 : vector<16x128xf32>
    %272 = vector.extract_strided_slice %259 {offsets = [0, 256], sizes = [16, 128], strides = [1, 1]} : vector<16x512xf32> to vector<16x128xf32>
    %273 = math.tanh %272 : vector<16x128xf32>
    %274 = vector.extract_strided_slice %259 {offsets = [0, 384], sizes = [16, 128], strides = [1, 1]} : vector<16x512xf32> to vector<16x128xf32>
    %275 = arith.negf %274 : vector<16x128xf32>
    %276 = math.exp %275 : vector<16x128xf32>
    %cst_83 = arith.constant 1.000000e+00 : f32
    %277 = vector.broadcast %cst_83 : f32 to vector<16x128xf32>
    %278 = arith.addf %277, %276 : vector<16x128xf32>
    %279 = arith.divf %277, %278 : vector<16x128xf32>
    %280 = arith.mulf %271, %216 : vector<16x128xf32>
    %281 = arith.mulf %265, %273 : vector<16x128xf32>
    %282 = arith.addf %280, %281 : vector<16x128xf32>
    %283 = math.tanh %282 : vector<16x128xf32>
    %284 = arith.mulf %279, %283 : vector<16x128xf32>
    %285 = arith.truncf %218 : vector<16x128xf32> to vector<16x128xbf16>
    %286 = arith.truncf %251 : vector<16x128xf32> to vector<16x128xbf16>
    %287 = tpu.concatenate %285, %286 in 1 : vector<16x128xbf16>, vector<16x128xbf16> -> vector<16x256xbf16>
    %c0_84 = arith.constant 0 : index
    %c0_85 = arith.constant 0 : index
    %288 = vector.load %arg5[%c0_84, %c0_85] : memref<256x512xbf16, #tpu.memory_space<vmem>>, vector<256x512xbf16>
    %cst_86 = arith.constant dense<0.000000e+00> : vector<16x512xf32>
    %289 = tpu.matmul %287, %288, %cst_86 {dimension_numbers = #tpu.dot_dimension_numbers<[1], [0], [0], [1], [0, 0, 1, 1], [], []>} : vector<16x256xbf16>, vector<256x512xbf16>, vector<16x512xf32> -> vector<16x512xf32>
    %c0_87 = arith.constant 0 : index
    %c0_88 = arith.constant 0 : index
    %290 = vector.load %arg6[%c0_87, %c0_88] : memref<1x512xf32, #tpu.memory_space<vmem>>, vector<1x512xf32>
    %291 = vector.broadcast %290 : vector<1x512xf32> to vector<16x512xf32>
    %292 = arith.addf %289, %291 : vector<16x512xf32>
    %293 = vector.extract_strided_slice %292 {offsets = [0, 0], sizes = [16, 128], strides = [1, 1]} : vector<16x512xf32> to vector<16x128xf32>
    %294 = arith.negf %293 : vector<16x128xf32>
    %295 = math.exp %294 : vector<16x128xf32>
    %cst_89 = arith.constant 1.000000e+00 : f32
    %296 = vector.broadcast %cst_89 : f32 to vector<16x128xf32>
    %297 = arith.addf %296, %295 : vector<16x128xf32>
    %298 = arith.divf %296, %297 : vector<16x128xf32>
    %299 = vector.extract_strided_slice %292 {offsets = [0, 128], sizes = [16, 128], strides = [1, 1]} : vector<16x512xf32> to vector<16x128xf32>
    %300 = arith.negf %299 : vector<16x128xf32>
    %301 = math.exp %300 : vector<16x128xf32>
    %cst_90 = arith.constant 1.000000e+00 : f32
    %302 = vector.broadcast %cst_90 : f32 to vector<16x128xf32>
    %303 = arith.addf %302, %301 : vector<16x128xf32>
    %304 = arith.divf %302, %303 : vector<16x128xf32>
    %305 = vector.extract_strided_slice %292 {offsets = [0, 256], sizes = [16, 128], strides = [1, 1]} : vector<16x512xf32> to vector<16x128xf32>
    %306 = math.tanh %305 : vector<16x128xf32>
    %307 = vector.extract_strided_slice %292 {offsets = [0, 384], sizes = [16, 128], strides = [1, 1]} : vector<16x512xf32> to vector<16x128xf32>
    %308 = arith.negf %307 : vector<16x128xf32>
    %309 = math.exp %308 : vector<16x128xf32>
    %cst_91 = arith.constant 1.000000e+00 : f32
    %310 = vector.broadcast %cst_91 : f32 to vector<16x128xf32>
    %311 = arith.addf %310, %309 : vector<16x128xf32>
    %312 = arith.divf %310, %311 : vector<16x128xf32>
    %313 = arith.mulf %304, %249 : vector<16x128xf32>
    %314 = arith.mulf %298, %306 : vector<16x128xf32>
    %315 = arith.addf %313, %314 : vector<16x128xf32>
    %316 = math.tanh %315 : vector<16x128xf32>
    %317 = arith.mulf %312, %316 : vector<16x128xf32>
    %c5_i32 = arith.constant 5 : i32
    %c16_i32_92 = arith.constant 16 : i32
    %318 = arith.muli %c5_i32, %c16_i32_92 : i32
    %319 = tpu.assume_multiple %318, 16 : i32
    %320 = arith.index_cast %319 : i32 to index
    %c0_93 = arith.constant 0 : index
    %321 = vector.load %arg14[%320, %c0_93] : memref<128x512xf32, #tpu.memory_space<vmem>>, vector<16x512xf32>
    %322 = arith.truncf %284 : vector<16x128xf32> to vector<16x128xbf16>
    %c0_94 = arith.constant 0 : index
    %c0_95 = arith.constant 0 : index
    %323 = vector.load %arg3[%c0_94, %c0_95] : memref<128x512xbf16, #tpu.memory_space<vmem>>, vector<128x512xbf16>
    %cst_96 = arith.constant dense<0.000000e+00> : vector<16x512xf32>
    %324 = tpu.matmul %322, %323, %cst_96 {dimension_numbers = #tpu.dot_dimension_numbers<[1], [0], [0], [1], [0, 0, 1, 1], [], []>} : vector<16x128xbf16>, vector<128x512xbf16>, vector<16x512xf32> -> vector<16x512xf32>
    %325 = arith.addf %321, %324 : vector<16x512xf32>
    %326 = vector.extract_strided_slice %325 {offsets = [0, 0], sizes = [16, 128], strides = [1, 1]} : vector<16x512xf32> to vector<16x128xf32>
    %327 = arith.negf %326 : vector<16x128xf32>
    %328 = math.exp %327 : vector<16x128xf32>
    %cst_97 = arith.constant 1.000000e+00 : f32
    %329 = vector.broadcast %cst_97 : f32 to vector<16x128xf32>
    %330 = arith.addf %329, %328 : vector<16x128xf32>
    %331 = arith.divf %329, %330 : vector<16x128xf32>
    %332 = vector.extract_strided_slice %325 {offsets = [0, 128], sizes = [16, 128], strides = [1, 1]} : vector<16x512xf32> to vector<16x128xf32>
    %333 = arith.negf %332 : vector<16x128xf32>
    %334 = math.exp %333 : vector<16x128xf32>
    %cst_98 = arith.constant 1.000000e+00 : f32
    %335 = vector.broadcast %cst_98 : f32 to vector<16x128xf32>
    %336 = arith.addf %335, %334 : vector<16x128xf32>
    %337 = arith.divf %335, %336 : vector<16x128xf32>
    %338 = vector.extract_strided_slice %325 {offsets = [0, 256], sizes = [16, 128], strides = [1, 1]} : vector<16x512xf32> to vector<16x128xf32>
    %339 = math.tanh %338 : vector<16x128xf32>
    %340 = vector.extract_strided_slice %325 {offsets = [0, 384], sizes = [16, 128], strides = [1, 1]} : vector<16x512xf32> to vector<16x128xf32>
    %341 = arith.negf %340 : vector<16x128xf32>
    %342 = math.exp %341 : vector<16x128xf32>
    %cst_99 = arith.constant 1.000000e+00 : f32
    %343 = vector.broadcast %cst_99 : f32 to vector<16x128xf32>
    %344 = arith.addf %343, %342 : vector<16x128xf32>
    %345 = arith.divf %343, %344 : vector<16x128xf32>
    %346 = arith.mulf %337, %282 : vector<16x128xf32>
    %347 = arith.mulf %331, %339 : vector<16x128xf32>
    %348 = arith.addf %346, %347 : vector<16x128xf32>
    %349 = math.tanh %348 : vector<16x128xf32>
    %350 = arith.mulf %345, %349 : vector<16x128xf32>
    %351 = arith.truncf %284 : vector<16x128xf32> to vector<16x128xbf16>
    %352 = arith.truncf %317 : vector<16x128xf32> to vector<16x128xbf16>
    %353 = tpu.concatenate %351, %352 in 1 : vector<16x128xbf16>, vector<16x128xbf16> -> vector<16x256xbf16>
    %c0_100 = arith.constant 0 : index
    %c0_101 = arith.constant 0 : index
    %354 = vector.load %arg5[%c0_100, %c0_101] : memref<256x512xbf16, #tpu.memory_space<vmem>>, vector<256x512xbf16>
    %cst_102 = arith.constant dense<0.000000e+00> : vector<16x512xf32>
    %355 = tpu.matmul %353, %354, %cst_102 {dimension_numbers = #tpu.dot_dimension_numbers<[1], [0], [0], [1], [0, 0, 1, 1], [], []>} : vector<16x256xbf16>, vector<256x512xbf16>, vector<16x512xf32> -> vector<16x512xf32>
    %c0_103 = arith.constant 0 : index
    %c0_104 = arith.constant 0 : index
    %356 = vector.load %arg6[%c0_103, %c0_104] : memref<1x512xf32, #tpu.memory_space<vmem>>, vector<1x512xf32>
    %357 = vector.broadcast %356 : vector<1x512xf32> to vector<16x512xf32>
    %358 = arith.addf %355, %357 : vector<16x512xf32>
    %359 = vector.extract_strided_slice %358 {offsets = [0, 0], sizes = [16, 128], strides = [1, 1]} : vector<16x512xf32> to vector<16x128xf32>
    %360 = arith.negf %359 : vector<16x128xf32>
    %361 = math.exp %360 : vector<16x128xf32>
    %cst_105 = arith.constant 1.000000e+00 : f32
    %362 = vector.broadcast %cst_105 : f32 to vector<16x128xf32>
    %363 = arith.addf %362, %361 : vector<16x128xf32>
    %364 = arith.divf %362, %363 : vector<16x128xf32>
    %365 = vector.extract_strided_slice %358 {offsets = [0, 128], sizes = [16, 128], strides = [1, 1]} : vector<16x512xf32> to vector<16x128xf32>
    %366 = arith.negf %365 : vector<16x128xf32>
    %367 = math.exp %366 : vector<16x128xf32>
    %cst_106 = arith.constant 1.000000e+00 : f32
    %368 = vector.broadcast %cst_106 : f32 to vector<16x128xf32>
    %369 = arith.addf %368, %367 : vector<16x128xf32>
    %370 = arith.divf %368, %369 : vector<16x128xf32>
    %371 = vector.extract_strided_slice %358 {offsets = [0, 256], sizes = [16, 128], strides = [1, 1]} : vector<16x512xf32> to vector<16x128xf32>
    %372 = math.tanh %371 : vector<16x128xf32>
    %373 = vector.extract_strided_slice %358 {offsets = [0, 384], sizes = [16, 128], strides = [1, 1]} : vector<16x512xf32> to vector<16x128xf32>
    %374 = arith.negf %373 : vector<16x128xf32>
    %375 = math.exp %374 : vector<16x128xf32>
    %cst_107 = arith.constant 1.000000e+00 : f32
    %376 = vector.broadcast %cst_107 : f32 to vector<16x128xf32>
    %377 = arith.addf %376, %375 : vector<16x128xf32>
    %378 = arith.divf %376, %377 : vector<16x128xf32>
    %379 = arith.mulf %370, %315 : vector<16x128xf32>
    %380 = arith.mulf %364, %372 : vector<16x128xf32>
    %381 = arith.addf %379, %380 : vector<16x128xf32>
    %382 = math.tanh %381 : vector<16x128xf32>
    %383 = arith.mulf %378, %382 : vector<16x128xf32>
    %c6_i32 = arith.constant 6 : i32
    %c16_i32_108 = arith.constant 16 : i32
    %384 = arith.muli %c6_i32, %c16_i32_108 : i32
    %385 = tpu.assume_multiple %384, 16 : i32
    %386 = arith.index_cast %385 : i32 to index
    %c0_109 = arith.constant 0 : index
    %387 = vector.load %arg14[%386, %c0_109] : memref<128x512xf32, #tpu.memory_space<vmem>>, vector<16x512xf32>
    %388 = arith.truncf %350 : vector<16x128xf32> to vector<16x128xbf16>
    %c0_110 = arith.constant 0 : index
    %c0_111 = arith.constant 0 : index
    %389 = vector.load %arg3[%c0_110, %c0_111] : memref<128x512xbf16, #tpu.memory_space<vmem>>, vector<128x512xbf16>
    %cst_112 = arith.constant dense<0.000000e+00> : vector<16x512xf32>
    %390 = tpu.matmul %388, %389, %cst_112 {dimension_numbers = #tpu.dot_dimension_numbers<[1], [0], [0], [1], [0, 0, 1, 1], [], []>} : vector<16x128xbf16>, vector<128x512xbf16>, vector<16x512xf32> -> vector<16x512xf32>
    %391 = arith.addf %387, %390 : vector<16x512xf32>
    %392 = vector.extract_strided_slice %391 {offsets = [0, 0], sizes = [16, 128], strides = [1, 1]} : vector<16x512xf32> to vector<16x128xf32>
    %393 = arith.negf %392 : vector<16x128xf32>
    %394 = math.exp %393 : vector<16x128xf32>
    %cst_113 = arith.constant 1.000000e+00 : f32
    %395 = vector.broadcast %cst_113 : f32 to vector<16x128xf32>
    %396 = arith.addf %395, %394 : vector<16x128xf32>
    %397 = arith.divf %395, %396 : vector<16x128xf32>
    %398 = vector.extract_strided_slice %391 {offsets = [0, 128], sizes = [16, 128], strides = [1, 1]} : vector<16x512xf32> to vector<16x128xf32>
    %399 = arith.negf %398 : vector<16x128xf32>
    %400 = math.exp %399 : vector<16x128xf32>
    %cst_114 = arith.constant 1.000000e+00 : f32
    %401 = vector.broadcast %cst_114 : f32 to vector<16x128xf32>
    %402 = arith.addf %401, %400 : vector<16x128xf32>
    %403 = arith.divf %401, %402 : vector<16x128xf32>
    %404 = vector.extract_strided_slice %391 {offsets = [0, 256], sizes = [16, 128], strides = [1, 1]} : vector<16x512xf32> to vector<16x128xf32>
    %405 = math.tanh %404 : vector<16x128xf32>
    %406 = vector.extract_strided_slice %391 {offsets = [0, 384], sizes = [16, 128], strides = [1, 1]} : vector<16x512xf32> to vector<16x128xf32>
    %407 = arith.negf %406 : vector<16x128xf32>
    %408 = math.exp %407 : vector<16x128xf32>
    %cst_115 = arith.constant 1.000000e+00 : f32
    %409 = vector.broadcast %cst_115 : f32 to vector<16x128xf32>
    %410 = arith.addf %409, %408 : vector<16x128xf32>
    %411 = arith.divf %409, %410 : vector<16x128xf32>
    %412 = arith.mulf %403, %348 : vector<16x128xf32>
    %413 = arith.mulf %397, %405 : vector<16x128xf32>
    %414 = arith.addf %412, %413 : vector<16x128xf32>
    %415 = math.tanh %414 : vector<16x128xf32>
    %416 = arith.mulf %411, %415 : vector<16x128xf32>
    %417 = arith.truncf %350 : vector<16x128xf32> to vector<16x128xbf16>
    %418 = arith.truncf %383 : vector<16x128xf32> to vector<16x128xbf16>
    %419 = tpu.concatenate %417, %418 in 1 : vector<16x128xbf16>, vector<16x128xbf16> -> vector<16x256xbf16>
    %c0_116 = arith.constant 0 : index
    %c0_117 = arith.constant 0 : index
    %420 = vector.load %arg5[%c0_116, %c0_117] : memref<256x512xbf16, #tpu.memory_space<vmem>>, vector<256x512xbf16>
    %cst_118 = arith.constant dense<0.000000e+00> : vector<16x512xf32>
    %421 = tpu.matmul %419, %420, %cst_118 {dimension_numbers = #tpu.dot_dimension_numbers<[1], [0], [0], [1], [0, 0, 1, 1], [], []>} : vector<16x256xbf16>, vector<256x512xbf16>, vector<16x512xf32> -> vector<16x512xf32>
    %c0_119 = arith.constant 0 : index
    %c0_120 = arith.constant 0 : index
    %422 = vector.load %arg6[%c0_119, %c0_120] : memref<1x512xf32, #tpu.memory_space<vmem>>, vector<1x512xf32>
    %423 = vector.broadcast %422 : vector<1x512xf32> to vector<16x512xf32>
    %424 = arith.addf %421, %423 : vector<16x512xf32>
    %425 = vector.extract_strided_slice %424 {offsets = [0, 0], sizes = [16, 128], strides = [1, 1]} : vector<16x512xf32> to vector<16x128xf32>
    %426 = arith.negf %425 : vector<16x128xf32>
    %427 = math.exp %426 : vector<16x128xf32>
    %cst_121 = arith.constant 1.000000e+00 : f32
    %428 = vector.broadcast %cst_121 : f32 to vector<16x128xf32>
    %429 = arith.addf %428, %427 : vector<16x128xf32>
    %430 = arith.divf %428, %429 : vector<16x128xf32>
    %431 = vector.extract_strided_slice %424 {offsets = [0, 128], sizes = [16, 128], strides = [1, 1]} : vector<16x512xf32> to vector<16x128xf32>
    %432 = arith.negf %431 : vector<16x128xf32>
    %433 = math.exp %432 : vector<16x128xf32>
    %cst_122 = arith.constant 1.000000e+00 : f32
    %434 = vector.broadcast %cst_122 : f32 to vector<16x128xf32>
    %435 = arith.addf %434, %433 : vector<16x128xf32>
    %436 = arith.divf %434, %435 : vector<16x128xf32>
    %437 = vector.extract_strided_slice %424 {offsets = [0, 256], sizes = [16, 128], strides = [1, 1]} : vector<16x512xf32> to vector<16x128xf32>
    %438 = math.tanh %437 : vector<16x128xf32>
    %439 = vector.extract_strided_slice %424 {offsets = [0, 384], sizes = [16, 128], strides = [1, 1]} : vector<16x512xf32> to vector<16x128xf32>
    %440 = arith.negf %439 : vector<16x128xf32>
    %441 = math.exp %440 : vector<16x128xf32>
    %cst_123 = arith.constant 1.000000e+00 : f32
    %442 = vector.broadcast %cst_123 : f32 to vector<16x128xf32>
    %443 = arith.addf %442, %441 : vector<16x128xf32>
    %444 = arith.divf %442, %443 : vector<16x128xf32>
    %445 = arith.mulf %436, %381 : vector<16x128xf32>
    %446 = arith.mulf %430, %438 : vector<16x128xf32>
    %447 = arith.addf %445, %446 : vector<16x128xf32>
    %448 = math.tanh %447 : vector<16x128xf32>
    %449 = arith.mulf %444, %448 : vector<16x128xf32>
    %c7_i32 = arith.constant 7 : i32
    %c16_i32_124 = arith.constant 16 : i32
    %450 = arith.muli %c7_i32, %c16_i32_124 : i32
    %451 = tpu.assume_multiple %450, 16 : i32
    %452 = arith.index_cast %451 : i32 to index
    %c0_125 = arith.constant 0 : index
    %453 = vector.load %arg14[%452, %c0_125] : memref<128x512xf32, #tpu.memory_space<vmem>>, vector<16x512xf32>
    %454 = arith.truncf %416 : vector<16x128xf32> to vector<16x128xbf16>
    %c0_126 = arith.constant 0 : index
    %c0_127 = arith.constant 0 : index
    %455 = vector.load %arg3[%c0_126, %c0_127] : memref<128x512xbf16, #tpu.memory_space<vmem>>, vector<128x512xbf16>
    %cst_128 = arith.constant dense<0.000000e+00> : vector<16x512xf32>
    %456 = tpu.matmul %454, %455, %cst_128 {dimension_numbers = #tpu.dot_dimension_numbers<[1], [0], [0], [1], [0, 0, 1, 1], [], []>} : vector<16x128xbf16>, vector<128x512xbf16>, vector<16x512xf32> -> vector<16x512xf32>
    %457 = arith.addf %453, %456 : vector<16x512xf32>
    %458 = vector.extract_strided_slice %457 {offsets = [0, 0], sizes = [16, 128], strides = [1, 1]} : vector<16x512xf32> to vector<16x128xf32>
    %459 = arith.negf %458 : vector<16x128xf32>
    %460 = math.exp %459 : vector<16x128xf32>
    %cst_129 = arith.constant 1.000000e+00 : f32
    %461 = vector.broadcast %cst_129 : f32 to vector<16x128xf32>
    %462 = arith.addf %461, %460 : vector<16x128xf32>
    %463 = arith.divf %461, %462 : vector<16x128xf32>
    %464 = vector.extract_strided_slice %457 {offsets = [0, 128], sizes = [16, 128], strides = [1, 1]} : vector<16x512xf32> to vector<16x128xf32>
    %465 = arith.negf %464 : vector<16x128xf32>
    %466 = math.exp %465 : vector<16x128xf32>
    %cst_130 = arith.constant 1.000000e+00 : f32
    %467 = vector.broadcast %cst_130 : f32 to vector<16x128xf32>
    %468 = arith.addf %467, %466 : vector<16x128xf32>
    %469 = arith.divf %467, %468 : vector<16x128xf32>
    %470 = vector.extract_strided_slice %457 {offsets = [0, 256], sizes = [16, 128], strides = [1, 1]} : vector<16x512xf32> to vector<16x128xf32>
    %471 = math.tanh %470 : vector<16x128xf32>
    %472 = vector.extract_strided_slice %457 {offsets = [0, 384], sizes = [16, 128], strides = [1, 1]} : vector<16x512xf32> to vector<16x128xf32>
    %473 = arith.negf %472 : vector<16x128xf32>
    %474 = math.exp %473 : vector<16x128xf32>
    %cst_131 = arith.constant 1.000000e+00 : f32
    %475 = vector.broadcast %cst_131 : f32 to vector<16x128xf32>
    %476 = arith.addf %475, %474 : vector<16x128xf32>
    %477 = arith.divf %475, %476 : vector<16x128xf32>
    %478 = arith.mulf %469, %414 : vector<16x128xf32>
    %479 = arith.mulf %463, %471 : vector<16x128xf32>
    %480 = arith.addf %478, %479 : vector<16x128xf32>
    %481 = math.tanh %480 : vector<16x128xf32>
    %482 = arith.mulf %477, %481 : vector<16x128xf32>
    %483 = arith.truncf %416 : vector<16x128xf32> to vector<16x128xbf16>
    %484 = arith.truncf %449 : vector<16x128xf32> to vector<16x128xbf16>
    %485 = tpu.concatenate %483, %484 in 1 : vector<16x128xbf16>, vector<16x128xbf16> -> vector<16x256xbf16>
    %c0_132 = arith.constant 0 : index
    %c0_133 = arith.constant 0 : index
    %486 = vector.load %arg5[%c0_132, %c0_133] : memref<256x512xbf16, #tpu.memory_space<vmem>>, vector<256x512xbf16>
    %cst_134 = arith.constant dense<0.000000e+00> : vector<16x512xf32>
    %487 = tpu.matmul %485, %486, %cst_134 {dimension_numbers = #tpu.dot_dimension_numbers<[1], [0], [0], [1], [0, 0, 1, 1], [], []>} : vector<16x256xbf16>, vector<256x512xbf16>, vector<16x512xf32> -> vector<16x512xf32>
    %c0_135 = arith.constant 0 : index
    %c0_136 = arith.constant 0 : index
    %488 = vector.load %arg6[%c0_135, %c0_136] : memref<1x512xf32, #tpu.memory_space<vmem>>, vector<1x512xf32>
    %489 = vector.broadcast %488 : vector<1x512xf32> to vector<16x512xf32>
    %490 = arith.addf %487, %489 : vector<16x512xf32>
    %491 = vector.extract_strided_slice %490 {offsets = [0, 0], sizes = [16, 128], strides = [1, 1]} : vector<16x512xf32> to vector<16x128xf32>
    %492 = arith.negf %491 : vector<16x128xf32>
    %493 = math.exp %492 : vector<16x128xf32>
    %cst_137 = arith.constant 1.000000e+00 : f32
    %494 = vector.broadcast %cst_137 : f32 to vector<16x128xf32>
    %495 = arith.addf %494, %493 : vector<16x128xf32>
    %496 = arith.divf %494, %495 : vector<16x128xf32>
    %497 = vector.extract_strided_slice %490 {offsets = [0, 128], sizes = [16, 128], strides = [1, 1]} : vector<16x512xf32> to vector<16x128xf32>
    %498 = arith.negf %497 : vector<16x128xf32>
    %499 = math.exp %498 : vector<16x128xf32>
    %cst_138 = arith.constant 1.000000e+00 : f32
    %500 = vector.broadcast %cst_138 : f32 to vector<16x128xf32>
    %501 = arith.addf %500, %499 : vector<16x128xf32>
    %502 = arith.divf %500, %501 : vector<16x128xf32>
    %503 = vector.extract_strided_slice %490 {offsets = [0, 256], sizes = [16, 128], strides = [1, 1]} : vector<16x512xf32> to vector<16x128xf32>
    %504 = math.tanh %503 : vector<16x128xf32>
    %505 = vector.extract_strided_slice %490 {offsets = [0, 384], sizes = [16, 128], strides = [1, 1]} : vector<16x512xf32> to vector<16x128xf32>
    %506 = arith.negf %505 : vector<16x128xf32>
    %507 = math.exp %506 : vector<16x128xf32>
    %cst_139 = arith.constant 1.000000e+00 : f32
    %508 = vector.broadcast %cst_139 : f32 to vector<16x128xf32>
    %509 = arith.addf %508, %507 : vector<16x128xf32>
    %510 = arith.divf %508, %509 : vector<16x128xf32>
    %511 = arith.mulf %502, %447 : vector<16x128xf32>
    %512 = arith.mulf %496, %504 : vector<16x128xf32>
    %513 = arith.addf %511, %512 : vector<16x128xf32>
    %514 = math.tanh %513 : vector<16x128xf32>
    %515 = arith.mulf %510, %514 : vector<16x128xf32>
    %c7_i32_140 = arith.constant 7 : i32
    %516 = arith.truncf %482 : vector<16x128xf32> to vector<16x128xbf16>
    %517 = arith.truncf %515 : vector<16x128xf32> to vector<16x128xbf16>
    %518 = tpu.concatenate %516, %517 in 1 : vector<16x128xbf16>, vector<16x128xbf16> -> vector<16x256xbf16>
    %c0_141 = arith.constant 0 : index
    %c0_142 = arith.constant 0 : index
    %519 = vector.load %arg5[%c0_141, %c0_142] : memref<256x512xbf16, #tpu.memory_space<vmem>>, vector<256x512xbf16>
    %cst_143 = arith.constant dense<0.000000e+00> : vector<16x512xf32>
    %520 = tpu.matmul %518, %519, %cst_143 {dimension_numbers = #tpu.dot_dimension_numbers<[1], [0], [0], [1], [0, 0, 1, 1], [], []>} : vector<16x256xbf16>, vector<256x512xbf16>, vector<16x512xf32> -> vector<16x512xf32>
    %c0_144 = arith.constant 0 : index
    %c0_145 = arith.constant 0 : index
    %521 = vector.load %arg6[%c0_144, %c0_145] : memref<1x512xf32, #tpu.memory_space<vmem>>, vector<1x512xf32>
    %522 = vector.broadcast %521 : vector<1x512xf32> to vector<16x512xf32>
    %523 = arith.addf %520, %522 : vector<16x512xf32>
    %524 = vector.extract_strided_slice %523 {offsets = [0, 0], sizes = [16, 128], strides = [1, 1]} : vector<16x512xf32> to vector<16x128xf32>
    %525 = arith.negf %524 : vector<16x128xf32>
    %526 = math.exp %525 : vector<16x128xf32>
    %cst_146 = arith.constant 1.000000e+00 : f32
    %527 = vector.broadcast %cst_146 : f32 to vector<16x128xf32>
    %528 = arith.addf %527, %526 : vector<16x128xf32>
    %529 = arith.divf %527, %528 : vector<16x128xf32>
    %530 = vector.extract_strided_slice %523 {offsets = [0, 128], sizes = [16, 128], strides = [1, 1]} : vector<16x512xf32> to vector<16x128xf32>
    %531 = arith.negf %530 : vector<16x128xf32>
    %532 = math.exp %531 : vector<16x128xf32>
    %cst_147 = arith.constant 1.000000e+00 : f32
    %533 = vector.broadcast %cst_147 : f32 to vector<16x128xf32>
    %534 = arith.addf %533, %532 : vector<16x128xf32>
    %535 = arith.divf %533, %534 : vector<16x128xf32>
    %536 = vector.extract_strided_slice %523 {offsets = [0, 256], sizes = [16, 128], strides = [1, 1]} : vector<16x512xf32> to vector<16x128xf32>
    %537 = math.tanh %536 : vector<16x128xf32>
    %538 = vector.extract_strided_slice %523 {offsets = [0, 384], sizes = [16, 128], strides = [1, 1]} : vector<16x512xf32> to vector<16x128xf32>
    %539 = arith.negf %538 : vector<16x128xf32>
    %540 = math.exp %539 : vector<16x128xf32>
    %cst_148 = arith.constant 1.000000e+00 : f32
    %541 = vector.broadcast %cst_148 : f32 to vector<16x128xf32>
    %542 = arith.addf %541, %540 : vector<16x128xf32>
    %543 = arith.divf %541, %542 : vector<16x128xf32>
    %544 = arith.mulf %535, %513 : vector<16x128xf32>
    %545 = arith.mulf %529, %537 : vector<16x128xf32>
    %546 = arith.addf %544, %545 : vector<16x128xf32>
    %547 = math.tanh %546 : vector<16x128xf32>
    %548 = arith.mulf %543, %547 : vector<16x128xf32>
    %c0_149 = arith.constant 0 : index
    %c0_150 = arith.constant 0 : index
    %c0_151 = arith.constant 0 : index
    %549 = vector.load %arg12[%c0_149, %c0_150, %c0_151] : memref<2x16x128xf32, #tpu.memory_space<vmem>>, vector<1x16x128xf32>
    %550 = vector.shape_cast %549 : vector<1x16x128xf32> to vector<16x128xf32>
    %551 = vector.shape_cast %482 : vector<16x128xf32> to vector<1x16x128xf32>
    tpu.vector_store %arg12[%c0_149, %c0_150, %c0_151], %551 {strides = array<i32>} : memref<2x16x128xf32, #tpu.memory_space<vmem>>, vector<1x16x128xf32>,
    %c0_152 = arith.constant 0 : index
    %c0_153 = arith.constant 0 : index
    %c0_154 = arith.constant 0 : index
    %552 = vector.load %arg13[%c0_152, %c0_153, %c0_154] : memref<2x16x128xf32, #tpu.memory_space<vmem>>, vector<1x16x128xf32>
    %553 = vector.shape_cast %552 : vector<1x16x128xf32> to vector<16x128xf32>
    %554 = vector.shape_cast %480 : vector<16x128xf32> to vector<1x16x128xf32>
    tpu.vector_store %arg13[%c0_152, %c0_153, %c0_154], %554 {strides = array<i32>} : memref<2x16x128xf32, #tpu.memory_space<vmem>>, vector<1x16x128xf32>,
    %c1_155 = arith.constant 1 : index
    %c0_156 = arith.constant 0 : index
    %c0_157 = arith.constant 0 : index
    %555 = vector.load %arg12[%c1_155, %c0_156, %c0_157] : memref<2x16x128xf32, #tpu.memory_space<vmem>>, vector<1x16x128xf32>
    %556 = vector.shape_cast %555 : vector<1x16x128xf32> to vector<16x128xf32>
    %557 = vector.shape_cast %548 : vector<16x128xf32> to vector<1x16x128xf32>
    tpu.vector_store %arg12[%c1_155, %c0_156, %c0_157], %557 {strides = array<i32>} : memref<2x16x128xf32, #tpu.memory_space<vmem>>, vector<1x16x128xf32>,
    %c1_158 = arith.constant 1 : index
    %c0_159 = arith.constant 0 : index
    %c0_160 = arith.constant 0 : index
    %558 = vector.load %arg13[%c1_158, %c0_159, %c0_160] : memref<2x16x128xf32, #tpu.memory_space<vmem>>, vector<1x16x128xf32>
    %559 = vector.shape_cast %558 : vector<1x16x128xf32> to vector<16x128xf32>
    %560 = vector.shape_cast %546 : vector<16x128xf32> to vector<1x16x128xf32>
    tpu.vector_store %arg13[%c1_158, %c0_159, %c0_160], %560 {strides = array<i32>} : memref<2x16x128xf32, #tpu.memory_space<vmem>>, vector<1x16x128xf32>,
    %c0_161 = arith.constant 0 : index
    %c0_162 = arith.constant 0 : index
    %561 = vector.load %arg7[%c0_161, %c0_162] : memref<128x1xf32, #tpu.memory_space<vmem>>, vector<128x1xf32>
    %cst_163 = arith.constant dense<0.000000e+00> : vector<16x1xf32>
    %562 = tpu.matmul %548, %561, %cst_163 {dimension_numbers = #tpu.dot_dimension_numbers<[1], [0], [0], [1], [0, 0, 1, 1], [], []>} : vector<16x128xf32>, vector<128x1xf32>, vector<16x1xf32> -> vector<16x1xf32>
    %c0_164 = arith.constant 0 : index
    %c0_165 = arith.constant 0 : index
    %563 = vector.load %arg8[%c0_164, %c0_165] : memref<1x1xf32, #tpu.memory_space<vmem>>, vector<1x1xf32>
    %564 = vector.broadcast %563 : vector<1x1xf32> to vector<16x1xf32>
    %565 = arith.addf %562, %564 : vector<16x1xf32>
    %566 = arith.negf %565 : vector<16x1xf32>
    %567 = math.exp %566 : vector<16x1xf32>
    %cst_166 = arith.constant 1.000000e+00 : f32
    %568 = vector.broadcast %cst_166 : f32 to vector<16x1xf32>
    %569 = arith.addf %568, %567 : vector<16x1xf32>
    %570 = arith.divf %568, %569 : vector<16x1xf32>
    %c0_167 = arith.constant 0 : index
    %c0_168 = arith.constant 0 : index
    %571 = vector.load %arg11[%c0_167, %c0_168] : memref<16x1xf32, #tpu.memory_space<vmem>>, vector<16x1xf32>
    tpu.vector_store %arg11[%c0_167, %c0_168], %570 {strides = array<i32>} : memref<16x1xf32, #tpu.memory_space<vmem>>, vector<16x1xf32>,
    return
  }
}

</mosaic_0001>

<bundles_post_ra>
// kernel: sentiment_lstm_forward.1
= control target key start
LH: loop header
LB: loop body
LE: loop exit
PB: predicated region body
PF: predicated region fallthrough
CT: control target
= control target key end

     0   :  { %v8316_v0 = vmov 0   ;;  %vm219_vm0 = vcmask 1040384   ;;  %v44_v35 = vlaneseq  ;;  %vm194_vm5 = vcmask 408576   ;;  %s8298_s0 = inlined_call_operand.vmem [shape: s32[128,1], index: 0, kind: input, shape index: {}]   ;;  %s8299_s1 = inlined_call_operand.vmem [shape: bf16[50,128], index: 1, kind: input, shape index: {}]   ;;  %s8300_s2 = inlined_call_operand.vmem [shape: bf16[128,512], index: 2, kind: input, shape index: {}]   ;;  %s8301_s3 = inlined_call_operand.vmem [shape: bf16[128,512], index: 3, kind: input, shape index: {}]   ;;  %s8302_s9 = inlined_call_operand.vmem [shape: f32[2,16,128], index: 9, kind: input, shape index: {}]   ;;  %s8303_s5 = inlined_call_operand.vmem [shape: bf16[256,512], index: 5, kind: input, shape index: {}]   ;;  %s8304_s4 = inlined_call_operand.vmem [shape: f32[1,512], index: 4, kind: input, shape index: {}]   ;;  %s8305_s10 = inlined_call_operand.vmem [shape: f32[2,16,128], index: 10, kind: input, shape index: {}]   ;;  %s8306_s6 = inlined_call_operand.vmem [shape: f32[1,512], index: 6, kind: input, shape index: {}]   ;;  %s8307_s13 = inlined_call_operand.vmem [shape: f32[2,16,128], index: 13, kind: output, shape index: {2}]   ;;  %s8308_s12 = inlined_call_operand.vmem [shape: f32[2,16,128], index: 12, kind: output, shape index: {1}]   ;;  %s8309_s7 = inlined_call_operand.vmem [shape: f32[128,1], index: 7, kind: input, shape index: {}]   ;;  %s8310_s8 = inlined_call_operand.<no memory space> [shape: f32[1,1], index: 8, kind: input, shape index: {}]   ;;  %s8311_s11 = inlined_call_operand.vmem [shape: f32[16,1], index: 11, kind: output, shape index: {0}]  }
   0x1   :  { %4248 = vset.pattern.permute.xlu1 %v8316_v0  ;;  %4247 = vset.pattern.permute.xlu0 %v8316_v0  ;;  %v48_v1 = vld [vmem:[%s8298_s0 + $0x10] sm:$0xff]  ;;  %v46_v2 = vld [vmem:[%s8298_s0] sm:$0xff]  ;;  %v49_v3 = vld [vmem:[%s8298_s0 + $0x18] sm:$0xff]  ;;  %v5158_v41 = vmov 0.0  }
   0x2   :  { %69 = vperm.xlu1 %4248, %v48_v1   ;;  %63 = vperm.xlu0 %4247, %v46_v2   ;;  %v47_v4 = vld [vmem:[%s8298_s0 + $0x8] sm:$0xff]  ;;  %v50_v6 = vld [vmem:[%s8298_s0 + $0x20] sm:$0xff]  ;;  %v4249_v7 = vld [vmem:[%s8299_s1 + $0x18] ss:$0 sps:$4 sm:$0x11]   ;;  %v5332_v36 = vand.u32 127, %v44_v35 }
   0x3   :  { %574 = vmatprep.mubr.bf16.mxu1 %v8316_v0  ;;  %v51_v5 = vld [vmem:[%s8298_s0 + $0x28] sm:$0xff]  ;;  %v4250_v8 = vld [vmem:[%s8299_s1 + $0x10] sm:$0xff]   ;;  %4244 = vmatprep.subr.msk.bf16.mxu0 %vm219_vm0, %v4249_v7  ;;  %v221_v9 = vsel %vm219_vm0, %v4249_v7, 0  ;;  %v53_v10 = vld [vmem:[%s8298_s0 + $0x38] sm:$0xff] }
   0x4   :  { %4186 = vmatpush3.bf16.msra.mxu0 %v221_v9  ;;  %v52_v11 = vld [vmem:[%s8298_s0 + $0x30] sm:$0xff]  ;;  %v4251_v12 = vld [vmem:[%s8299_s1 + $0x8] sm:$0xff]   ;;  %v54_v14 = vld [vmem:[%s8298_s0 + $0x40] sm:$0xff] }
   0x5   :  { %4187 = vmatprep.subr.bf16.mxu0 %v4250_v8  ;;  %v55_v13 = vld [vmem:[%s8298_s0 + $0x48] sm:$0xff]  ;;  %v4252_v15 = vld [vmem:[%s8299_s1] sm:$0xff]   ;;  %v57_v16 = vld [vmem:[%s8298_s0 + $0x58] sm:$0xff] }
   0x6   :  { %72 = vperm.xlu1 %4248, %v49_v3   ;;  %66 = vperm.xlu0 %4247, %v47_v4   ;;  %v56_v17 = vld [vmem:[%s8298_s0 + $0x50] sm:$0xff]  ;;  %v59_v18 = vld [vmem:[%s8298_s0 + $0x68] sm:$0xff]  ;;  %v58_v19 = vld [vmem:[%s8298_s0 + $0x60] sm:$0xff] }
   0x7   :  { %v61_v20 = vld [vmem:[%s8298_s0 + $0x78] sm:$0xff]  ;;  %v60_v21 = vld [vmem:[%s8298_s0 + $0x70] sm:$0xff] }
   0x8   :  { %4188 = vmatpush3.bf16.msra.mxu0 %v4250_v8  ;;  %v4253_v22 = vld [vmem:[%s8300_s2 + $0xe4] ss:$16 sps:$4 sm:$0xff]   ;;  %v4255_v23 = vld [vmem:[%s8300_s2 + $0xe0] ss:$16 sps:$4 sm:$0xff]   ;;  %v4258_v24 = vld [vmem:[%s8300_s2 + $0xec] ss:$16 sps:$4 sm:$0xff]  }
   0x9   :  { %4189 = vmatprep.subr.bf16.mxu0 %v4251_v12  ;;  %542 = vmatprep.subr.bf16.mxu1 %v4253_v22  ;;  %v4259_v25 = vld [vmem:[%s8300_s2 + $0xc4] ss:$16 sps:$4 sm:$0xff]   ;;  %v4261_v26 = vld [vmem:[%s8300_s2 + $0xc0] ss:$16 sps:$4 sm:$0xff]   ;;  %v4256_v48 = vld [vmem:[%s8300_s2 + $0xe8] ss:$16 sps:$4 sm:$0xff]  }
   0xa   :  { %78 = vperm.xlu1 %4248, %v51_v5   ;;  %75 = vperm.xlu0 %4247, %v50_v6   ;;  %v4265_v27 = vld [vmem:[%s8300_s2 + $0xa4] ss:$16 sps:$4 sm:$0xff]   ;;  %v4267_v28 = vld [vmem:[%s8300_s2 + $0xa0] ss:$16 sps:$4 sm:$0xff]   ;;  %v4264_v51 = vld [vmem:[%s8300_s2 + $0xcc] ss:$16 sps:$4 sm:$0xff]  }
   0xb   :  { %543 = vmatpush1.bf16.msra.mxu1 %v4255_v23  ;;  %v4271_v29 = vld [vmem:[%s8300_s2 + $0x84] ss:$16 sps:$4 sm:$0xff]   ;;  %v4273_v30 = vld [vmem:[%s8300_s2 + $0x80] ss:$16 sps:$4 sm:$0xff]   ;;  %v4262_v55 = vld [vmem:[%s8300_s2 + $0xc8] ss:$16 sps:$4 sm:$0xff]  }
   0xc   :  { %4190 = vmatpush3.bf16.msra.mxu0 %v4251_v12  ;;  %544 = vmatprep.subr.bf16.mxu1 %v4259_v25  ;;  %v4277_v31 = vld [vmem:[%s8300_s2 + $0x64] ss:$16 sps:$4 sm:$0xff]   ;;  %v4279_v32 = vld [vmem:[%s8300_s2 + $0x60] ss:$16 sps:$4 sm:$0xff]   ;;  %v4270_v58 = vld [vmem:[%s8300_s2 + $0xac] ss:$16 sps:$4 sm:$0xff]  }
   0xd   :  { %4191 = vmatprep.subr.bf16.mxu0 %v4252_v15  ;;  %v4283_v33 = vld [vmem:[%s8300_s2 + $0x44] ss:$16 sps:$4 sm:$0xff]   ;;  %v4285_v34 = vld [vmem:[%s8300_s2 + $0x40] ss:$16 sps:$4 sm:$0xff]   ;;  %v4268_v62 = vld [vmem:[%s8300_s2 + $0xa8] ss:$16 sps:$4 sm:$0xff]  }
   0xe   :  { %84 = vperm.xlu1 %4248, %v53_v10   ;;  %81 = vperm.xlu0 %4247, %v52_v11   ;;  %v4276_v2 = vld [vmem:[%s8300_s2 + $0x8c] ss:$16 sps:$4 sm:$0xff]   ;;  %v4274_v6 = vld [vmem:[%s8300_s2 + $0x88] ss:$16 sps:$4 sm:$0xff]  }
   0xf   :  { %545 = vmatpush1.bf16.msra.mxu1 %v4261_v26  ;;  %v4282_v9 = vld [vmem:[%s8300_s2 + $0x6c] ss:$16 sps:$4 sm:$0xff]   ;;  %v4289_v26 = vld [vmem:[%s8300_s2 + $0x24] ss:$16 sps:$4 sm:$0xff]  }
  0x10   :  { %4192 = vmatpush3.bf16.msra.mxu0 %v4252_v15  ;;  %546 = vmatprep.subr.bf16.mxu1 %v4265_v27  ;;  %v4294_v27 = vld [vmem:[%s8300_s2 + $0x2c] ss:$16 sps:$4 sm:$0xff]  }
  0x11   :  { %655 = vmatprep.subr.bf16.mxu0 %v4258_v24 }
  0x12   :  { %90 = vperm.xlu1 %4248, %v55_v13   ;;  %87 = vperm.xlu0 %4247, %v54_v14   ;;  %v4280_v13 = vld [vmem:[%s8300_s2 + $0x68] ss:$16 sps:$4 sm:$0xff]  }
  0x13   :  { %547 = vmatpush1.bf16.msra.mxu1 %v4267_v28  ;;  %v4291_v28 = vld [vmem:[%s8300_s2 + $0x20] ss:$16 sps:$4 sm:$0xff]  }
  0x14   :  { %548 = vmatprep.subr.bf16.mxu1 %v4271_v29  ;;  %v4292_v29 = vld [vmem:[%s8300_s2 + $0x28] ss:$16 sps:$4 sm:$0xff]  }
  0x16   :  { %96 = vperm.xlu1 %4248, %v57_v16   ;;  %93 = vperm.xlu0 %4247, %v56_v17   ;;  %v4288_v16 = vld [vmem:[%s8300_s2 + $0x4c] ss:$16 sps:$4 sm:$0xff]  }
  0x17   :  { %549 = vmatpush1.bf16.msra.mxu1 %v4273_v30  ;;  %v4295_v30 = vld [vmem:[%s8300_s2 + $0x4] ss:$16 sps:$4 sm:$0xff]  }
  0x18   :  { %550 = vmatprep.subr.bf16.mxu1 %v4277_v31  ;;  %v4300_v31 = vld [vmem:[%s8300_s2 + $0xc] ss:$16 sps:$4 sm:$0xff]  }
  0x1a   :  { %102 = vperm.xlu1 %4248, %v59_v18   ;;  %99 = vperm.xlu0 %4247, %v58_v19  }
  0x1b   :  { %551 = vmatpush1.bf16.msra.mxu1 %v4279_v32  ;;  %v4297_v32 = vld [vmem:[%s8300_s2] ss:$16 sps:$4 sm:$0xff]  }
  0x1c   :  { %552 = vmatprep.subr.bf16.mxu1 %v4283_v33  ;;  %v4298_v33 = vld [vmem:[%s8300_s2 + $0x8] ss:$16 sps:$4 sm:$0xff]  }
  0x1e   :  { %108 = vperm.xlu1 %4248, %v61_v20   ;;  %105 = vperm.xlu0 %4247, %v60_v21   ;;  %v4286_v20 = vld [vmem:[%s8300_s2 + $0x48] ss:$16 sps:$4 sm:$0xff]  }
  0x1f   :  { %553 = vmatpush1.bf16.msra.mxu1 %v4285_v34  ;;  %v5435_v34 = vld [vmem:[%s8301_s3 + $0xe4] ss:$16 sps:$4 sm:$0xff]  }
  0x20   :  { %554 = vmatprep.subr.bf16.mxu1 %v4289_v26 }
  0x23   :  { %555 = vmatpush1.bf16.msra.mxu1 %v4291_v28  ;;  %v840_v28 = vld [vmem:[%s8302_s9] sm:$0xff] }
  0x24   :  { %556 = vmatprep.subr.bf16.mxu1 %v4295_v30 }
  0x27   :  { %557 = vmatpush1.bf16.msra.mxu1 %v4297_v32  ;;  %v5688_v32 = vld [vmem:[%s8303_s5 + $0xec] ss:$16 sps:$4 sm:$0xff]  }
  0x28   :  { %1037 = vmatprep.subr.bf16.mxu1 %v5435_v34 }
  0x7d   :  { %v70_v37 = vpop.permute.xlu1 %69  ;;  %v64_v38 = vpop.permute.xlu0 %63 }
  0x7e   :  { %vm112_vm1 = vcmp.eq.s32.totalorder %v70_v37, %v5332_v36  ;;  %vm110_vm2 = vcmp.eq.s32.totalorder %v64_v38, %v5332_v36 }
  0x7f   :  { %v3894_v42 = vsel %vm112_vm1, 1.0, %v5158_v41  ;;  %v3892_v43 = vsel %vm110_vm2, 1.0, %v5158_v41  ;;  %vm3870_vm2 = vcmask 7168  }
  0x81   :  { %v73_v39 = vpop.permute.xlu1 %72  ;;  %v67_v40 = vpop.permute.xlu0 %66 }
  0x82   :  { %vm113_vm3 = vcmp.eq.s32.totalorder %v73_v39, %v5332_v36  ;;  %vm111_vm4 = vcmp.eq.s32.totalorder %v67_v40, %v5332_v36 }
  0x83   :  { %v3895_v44 = vsel %vm113_vm3, 1.0, %v5158_v41  ;;  %v3893_v45 = vsel %vm111_vm4, 1.0, %v5158_v41 }
  0x84   :  { %v159_v46 = vpack.c.bf16 %v3895_v44, %v3894_v42  ;;  %v158_v47 = vpack.c.bf16 %v3893_v45, %v3892_v43  ;;  %v5452_v43 = vld [vmem:[%s8301_s3 + $0xc4] ss:$16 sps:$4 sm:$0xff]   ;;  %v5457_v45 = vld [vmem:[%s8301_s3 + $0xe8] ss:$16 sps:$4 sm:$0xff]  }
  0x85   :  { %v79_v49 = vpop.permute.xlu1 %78  ;;  %v76_v50 = vpop.permute.xlu0 %75 }
  0x86   :  { %vm115_vm6 = vcmp.eq.s32.totalorder %v79_v49, %v5332_v36  ;;  %vm114_vm7 = vcmp.eq.s32.totalorder %v76_v50, %v5332_v36  ;;  %4193 = vmatprep.mubr.msk.bf16.mxu0 %vm194_vm5, %v158_v47  ;;  %v5469_v47 = vld [vmem:[%s8301_s3 + $0xc0] ss:$16 sps:$4 sm:$0xff]   ;;  %v5482_v50 = vld [vmem:[%s8301_s3 + $0xc8] ss:$16 sps:$4 sm:$0xff]  }
  0x87   :  { %v3897_v52 = vsel %vm115_vm6, 1.0, %v5158_v41  ;;  %v3896_v53 = vsel %vm114_vm7, 1.0, %v5158_v41  ;;  %4194 = vmatmul.mubr.msk.bf16.vlgmr.msra.gmra.mxu0 %vm194_vm5, %v159_v46  ;;  %v5462_v46 = vld [vmem:[%s8301_s3 + $0xcc] ss:$16 sps:$4 sm:$0xff]  }
  0x88   :  { %v160_v54 = vpack.c.bf16 %v3897_v52, %v3896_v53  ;;  %656 = vmatpush1.bf16.msra.mxu0 %v4256_v48  ;;  %v5476_v48 = vld [vmem:[%s8301_s3 + $0xa4] ss:$16 sps:$4 sm:$0xff]   ;;  %v5490_v52 = vld [vmem:[%s8301_s3 + $0xa0] ss:$16 sps:$4 sm:$0xff]   ;;  %v5495_v53 = vld [vmem:[%s8301_s3 + $0xac] ss:$16 sps:$4 sm:$0xff]  }
  0x89   :  { %v85_v56 = vpop.permute.xlu1 %84  ;;  %v82_v57 = vpop.permute.xlu0 %81  ;;  %657 = vmatprep.subr.bf16.mxu0 %v4264_v51 }
  0x8a   :  { %vm117_vm8 = vcmp.eq.s32.totalorder %v85_v56, %v5332_v36  ;;  %vm116_vm9 = vcmp.eq.s32.totalorder %v82_v57, %v5332_v36  ;;  %4197 = vmatprep.mubr.msk.bf16.mxu0 %vm194_vm5, %v160_v54  ;;  %v5506_v56 = vld [vmem:[%s8301_s3 + $0xa8] ss:$16 sps:$4 sm:$0xff]   ;;  %v5511_v57 = vld [vmem:[%s8301_s3 + $0x8c] ss:$16 sps:$4 sm:$0xff]  }
  0x8b   :  { %v3899_v59 = vsel %vm117_vm8, 1.0, %v5158_v41  ;;  %v3898_v60 = vsel %vm116_vm9, 1.0, %v5158_v41 }
  0x8c   :  { %v161_v61 = vpack.c.bf16 %v3899_v59, %v3898_v60  ;;  %658 = vmatpush1.bf16.msra.mxu0 %v4262_v55  ;;  %v5500_v55 = vld [vmem:[%s8301_s3 + $0x84] ss:$16 sps:$4 sm:$0xff]  }
  0x8d   :  { %v91_v63 = vpop.permute.xlu1 %90  ;;  %v88_v1 = vpop.permute.xlu0 %87  ;;  %659 = vmatprep.subr.bf16.mxu0 %v4270_v58  ;;  %v5519_v58 = vld [vmem:[%s8301_s3 + $0x80] ss:$16 sps:$4 sm:$0xff]   ;;  %v5526_v60 = vld [vmem:[%s8301_s3 + $0x64] ss:$16 sps:$4 sm:$0xff]  }
  0x8e   :  { %vm119_vm10 = vcmp.eq.s32.totalorder %v91_v63, %v5332_v36  ;;  %vm118_vm11 = vcmp.eq.s32.totalorder %v88_v1, %v5332_v36  ;;  %v5539_v63 = vld [vmem:[%s8301_s3 + $0x60] ss:$16 sps:$4 sm:$0xff]   ;;  %v5544_v1 = vld [vmem:[%s8301_s3 + $0x6c] ss:$16 sps:$4 sm:$0xff]  }
  0x8f   :  { %v3901_v3 = vsel %vm119_vm10, 1.0, %v5158_v41  ;;  %v3900_v4 = vsel %vm118_vm11, 1.0, %v5158_v41  ;;  %4198 = vmatmul.mubr.msk.bf16.gmra.mxu0 %vm194_vm5, %v161_v61  ;;  %v5532_v61 = vld [vmem:[%s8301_s3 + $0x88] ss:$16 sps:$4 sm:$0xff]  }
  0x90   :  { %v162_v5 = vpack.c.bf16 %v3901_v3, %v3900_v4  ;;  %660 = vmatpush1.bf16.msra.mxu0 %v4268_v62  ;;  %v5550_v3 = vld [vmem:[%s8301_s3 + $0x44] ss:$16 sps:$4 sm:$0xff]   ;;  %v5556_v4 = vld [vmem:[%s8301_s3 + $0x68] ss:$16 sps:$4 sm:$0xff]  }
  0x91   :  { %v97_v7 = vpop.permute.xlu1 %96  ;;  %v94_v8 = vpop.permute.xlu0 %93  ;;  %661 = vmatprep.subr.bf16.mxu0 %v4276_v2 }
  0x92   :  { %vm121_vm12 = vcmp.eq.s32.totalorder %v97_v7, %v5332_v36  ;;  %vm120_vm13 = vcmp.eq.s32.totalorder %v94_v8, %v5332_v36  ;;  %4201 = vmatprep.mubr.msk.bf16.mxu0 %vm194_vm5, %v162_v5  ;;  %v5561_v5 = vld [vmem:[%s8301_s3 + $0x4c] ss:$16 sps:$4 sm:$0xff]   ;;  %v5576_v8 = vld [vmem:[%s8301_s3 + $0x24] ss:$16 sps:$4 sm:$0xff]  }
  0x93   :  { %v3903_v10 = vsel %vm121_vm12, 1.0, %v5158_v41  ;;  %v3902_v11 = vsel %vm120_vm13, 1.0, %v5158_v41 }
  0x94   :  { %v163_v12 = vpack.c.bf16 %v3903_v10, %v3902_v11  ;;  %662 = vmatpush1.bf16.msra.mxu0 %v4274_v6  ;;  %v5569_v6 = vld [vmem:[%s8301_s3 + $0x40] ss:$16 sps:$4 sm:$0xff]  }
  0x95   :  { %v103_v14 = vpop.permute.xlu1 %102  ;;  %v100_v15 = vpop.permute.xlu0 %99  ;;  %663 = vmatprep.subr.bf16.mxu0 %v4282_v9  ;;  %v5582_v9 = vld [vmem:[%s8301_s3 + $0x48] ss:$16 sps:$4 sm:$0xff]   ;;  %v5589_v11 = vld [vmem:[%s8301_s3 + $0x20] ss:$16 sps:$4 sm:$0xff]  }
  0x96   :  { %vm123_vm14 = vcmp.eq.s32.totalorder %v103_v14, %v5332_v36  ;;  %vm122_vm15 = vcmp.eq.s32.totalorder %v100_v15, %v5332_v36  ;;  %v5601_v14 = vld [vmem:[%s8301_s3 + $0x4] ss:$16 sps:$4 sm:$0xff]   ;;  %v5606_v15 = vld [vmem:[%s8301_s3 + $0x28] ss:$16 sps:$4 sm:$0xff]  }
  0x97   :  { %v3905_v17 = vsel %vm123_vm14, 1.0, %v5158_v41  ;;  %v3904_v18 = vsel %vm122_vm15, 1.0, %v5158_v41  ;;  %4202 = vmatmul.mubr.msk.bf16.gmra.mxu0 %vm194_vm5, %v163_v12  ;;  %v5594_v12 = vld [vmem:[%s8301_s3 + $0x2c] ss:$16 sps:$4 sm:$0xff]  }
  0x98   :  { %v164_v19 = vpack.c.bf16 %v3905_v17, %v3904_v18  ;;  %664 = vmatpush1.bf16.msra.mxu0 %v4280_v13  ;;  %v5619_v17 = vld [vmem:[%s8301_s3] ss:$16 sps:$4 sm:$0xff]  }
  0x99   :  { %v109_v21 = vpop.permute.xlu1 %108  ;;  %v106_v22 = vpop.permute.xlu0 %105  ;;  %665 = vmatprep.subr.bf16.mxu0 %v4288_v16  ;;  %v5611_v16 = vld [vmem:[%s8301_s3 + $0xc] ss:$16 sps:$4 sm:$0xff]  }
  0x9a   :  { %vm125_vm0 = vcmp.eq.s32.totalorder %v109_v21, %v5332_v36  ;;  %vm124_vm1 = vcmp.eq.s32.totalorder %v106_v22, %v5332_v36  ;;  %4205 = vmatprep.mubr.msk.bf16.mxu0 %vm194_vm5, %v164_v19  ;;  %v5441_v36 = vld [vmem:[%s8301_s3 + $0xec] ss:$16 sps:$4 sm:$0xff]   ;;  %v5627_v19 = vld [vmem:[%s8301_s3 + $0x8] ss:$16 sps:$4 sm:$0xff]  }
  0x9b   :  { %v3907_v23 = vsel %vm125_vm0, 1.0, %v5158_v41  ;;  %v3906_v24 = vsel %vm124_vm1, 1.0, %v5158_v41  ;;  %v5447_v41 = vld [vmem:[%s8301_s3 + $0xe0] ss:$16 sps:$4 sm:$0xff]  }
  0x9c   :  { %v165_v25 = vpack.c.bf16 %v3907_v23, %v3906_v24  ;;  %666 = vmatpush1.bf16.msra.mxu0 %v4286_v20 }
  0x9d   :  { %667 = vmatprep.subr.bf16.mxu0 %v4294_v27 }
  0x9f   :  { %4206 = vmatmul.mubr.msk.bf16.gmra.mxu0 %vm194_vm5, %v165_v25 }
  0xa0   :  { %687 = vmatprep.mubr.bf16.mxu0 %v8316_v0  ;;  %668 = vmatpush1.bf16.msra.mxu0 %v4292_v29  ;;  %v841_v29 = vld [vmem:[%s8302_s9 + $0x8] sm:$0xff] }
  0xa1   :  { %669 = vmatprep.subr.bf16.mxu0 %v4300_v31  ;;  %v844_v30 = vpack.c.bf16 %v841_v29, %v840_v28  ;;  %v5683_v31 = vld [vmem:[%s8303_s5 + $0xe4] ss:$16 sps:$4 sm:$0xff]  }
  0xa4   :  { %670 = vmatpush1.bf16.msra.mxu0 %v4298_v33  ;;  %v5693_v33 = vshrl.u32 %v44_v35, 7 }
  0xa5   :  { %1080 = vmatprep.subr.bf16.mxu0 %v5441_v36 }
 0x147   :  { %v4195_v37 = vpop.f32.mrf.mxu0 }
 0x149   :  { %v257_v38 = vpop.f32.mrf.mxu0 }
 0x14b   :  { %v4196_v39 = vpop.f32.mrf.mxu0 }
 0x14c   :  { %v321_v51 = vpack.c.bf16 %v4196_v39, %v4195_v37  ;;  %v8315_v39 = vsub.s32 0, %v5693_v33 }
 0x14d   :  { %v260_v40 = vpop.f32.mrf.mxu0 }
 0x14e   :  { %v320_v42 = vpack.c.bf16 %v260_v40, %v257_v38  ;;  %v8312_v40 = vsub.s32 2, %v5693_v33 }
 0x14f   :  { %v4199_v44 = vpop.f32.mrf.mxu0 }
 0x150   :  { %575 = vmatmul.mubr.bf16.vlgmr.msra.gmra.mxu1 %v320_v42  ;;  %688 = vmatmul.mubr.bf16.vlgmr.msra.gmra.mxu0 %v320_v42 }
 0x151   :  { %1038 = vmatpush1.bf16.msra.mxu1 %v5447_v41  ;;  %584 = vmatprep.mubr.bf16.mxu1 %v8316_v0  ;;  %v273_v49 = vpop.f32.mrf.mxu0 }
 0x152   :  { %697 = vmatprep.mubr.bf16.mxu0 %v8316_v0  ;;  %1039 = vmatprep.subr.bf16.mxu1 %v5452_v43 }
 0x153   :  { %1081 = vmatpush1.bf16.msra.mxu0 %v5457_v45  ;;  %v4200_v54 = vpop.f32.mrf.mxu0 }
 0x154   :  { %1082 = vmatprep.subr.bf16.mxu0 %v5462_v46  ;;  %v323_v10 = vpack.c.bf16 %v4200_v54, %v4199_v44  ;;  %v8313_v44 = vsub.s32 3, %v5693_v33 }
 0x155   :  { %1040 = vmatpush1.bf16.msra.mxu1 %v5469_v47  ;;  %v276_v59 = vpop.f32.mrf.mxu0 }
 0x156   :  { %1041 = vmatprep.subr.bf16.mxu1 %v5476_v48  ;;  %v322_v62 = vpack.c.bf16 %v276_v59, %v273_v49 }
 0x157   :  { %1083 = vmatpush1.bf16.msra.mxu0 %v5482_v50  ;;  %v4203_v2 = vpop.f32.mrf.mxu0 }
 0x158   :  { %585 = vmatmul.mubr.bf16.gmra.mxu1 %v321_v51  ;;  %698 = vmatmul.mubr.bf16.gmra.mxu0 %v321_v51 }
 0x159   :  { %594 = vmatprep.mubr.bf16.mxu1 %v8316_v0  ;;  %707 = vmatprep.mubr.bf16.mxu0 %v8316_v0  ;;  %v289_v7 = vpop.f32.mrf.mxu0 }
 0x15a   :  { %1042 = vmatpush1.bf16.msra.mxu1 %v5490_v52  ;;  %1084 = vmatprep.subr.bf16.mxu0 %v5495_v53 }
 0x15b   :  { %1043 = vmatprep.subr.bf16.mxu1 %v5500_v55  ;;  %1085 = vmatpush1.bf16.msra.mxu0 %v5506_v56  ;;  %v4204_v13 = vpop.f32.mrf.mxu0 }
 0x15c   :  { %1086 = vmatprep.subr.bf16.mxu0 %v5511_v57  ;;  %v325_v23 = vpack.c.bf16 %v4204_v13, %v4203_v2 }
 0x15d   :  { %v292_v18 = vpop.f32.mrf.mxu0 }
 0x15e   :  { %1044 = vmatpush1.bf16.msra.mxu1 %v5519_v58  ;;  %v324_v20 = vpack.c.bf16 %v292_v18, %v289_v7 }
 0x15f   :  { %1045 = vmatprep.subr.bf16.mxu1 %v5526_v60  ;;  %1087 = vmatpush1.bf16.msra.mxu0 %v5532_v61  ;;  %v4207_v21 = vpop.f32.mrf.mxu0 }
 0x160   :  { %595 = vmatmul.mubr.bf16.gmra.mxu1 %v322_v62  ;;  %708 = vmatmul.mubr.bf16.gmra.mxu0 %v322_v62 }
 0x161   :  { %604 = vmatprep.mubr.bf16.mxu1 %v8316_v0  ;;  %717 = vmatprep.mubr.bf16.mxu0 %v8316_v0  ;;  %v305_v22 = vpop.f32.mrf.mxu0 }
 0x162   :  { %1046 = vmatpush1.bf16.msra.mxu1 %v5539_v63  ;;  %1088 = vmatprep.subr.bf16.mxu0 %v5544_v1 }
 0x163   :  { %1047 = vmatprep.subr.bf16.mxu1 %v5550_v3  ;;  %1089 = vmatpush1.bf16.msra.mxu0 %v5556_v4  ;;  %v4208_v24 = vpop.f32.mrf.mxu0 }
 0x164   :  { %1090 = vmatprep.subr.bf16.mxu0 %v5561_v5  ;;  %v327_v27 = vpack.c.bf16 %v4208_v24, %v4207_v21 }
 0x165   :  { %v308_v25 = vpop.f32.mrf.mxu0 }
 0x166   :  { %1048 = vmatpush1.bf16.msra.mxu1 %v5569_v6  ;;  %v326_v26 = vpack.c.bf16 %v308_v25, %v305_v22 }
 0x167   :  { %1049 = vmatprep.subr.bf16.mxu1 %v5576_v8  ;;  %1091 = vmatpush1.bf16.msra.mxu0 %v5582_v9 }
 0x168   :  { %605 = vmatmul.mubr.bf16.gmra.mxu1 %v323_v10  ;;  %718 = vmatmul.mubr.bf16.gmra.mxu0 %v323_v10 }
 0x169   :  { %614 = vmatprep.mubr.bf16.mxu1 %v8316_v0  ;;  %727 = vmatprep.mubr.bf16.mxu0 %v8316_v0 }
 0x16a   :  { %1050 = vmatpush1.bf16.msra.mxu1 %v5589_v11  ;;  %1092 = vmatprep.subr.bf16.mxu0 %v5594_v12 }
 0x16b   :  { %1051 = vmatprep.subr.bf16.mxu1 %v5601_v14  ;;  %1093 = vmatpush1.bf16.msra.mxu0 %v5606_v15 }
 0x16c   :  { %1094 = vmatprep.subr.bf16.mxu0 %v5611_v16 }
 0x16e   :  { %1052 = vmatpush1.bf16.msra.mxu1 %v5619_v17 }
 0x16f   :  { %1095 = vmatpush1.bf16.msra.mxu0 %v5627_v19  ;;  %1197 = vmatprep.subr.bf16.mxu1 %v5435_v34 }
 0x170   :  { %615 = vmatmul.mubr.bf16.gmra.mxu1 %v324_v20  ;;  %728 = vmatmul.mubr.bf16.gmra.mxu0 %v324_v20 }
 0x171   :  { %624 = vmatprep.mubr.bf16.mxu1 %v8316_v0  ;;  %737 = vmatprep.mubr.bf16.mxu0 %v8316_v0 }
 0x172   :  { %1240 = vmatprep.subr.bf16.mxu0 %v5441_v36 }
 0x178   :  { %625 = vmatmul.mubr.bf16.gmra.mxu1 %v325_v23  ;;  %738 = vmatmul.mubr.bf16.gmra.mxu0 %v325_v23 }
 0x179   :  { %634 = vmatprep.mubr.bf16.mxu1 %v8316_v0  ;;  %747 = vmatprep.mubr.bf16.mxu0 %v8316_v0 }
 0x180   :  { %635 = vmatmul.mubr.bf16.gmra.mxu1 %v326_v26  ;;  %748 = vmatmul.mubr.bf16.gmra.mxu0 %v326_v26 }
 0x181   :  { %644 = vmatprep.mubr.bf16.mxu1 %v8316_v0  ;;  %757 = vmatprep.mubr.bf16.mxu0 %v8316_v0 }
 0x188   :  { %645 = vmatmul.mubr.bf16.gmra.mxu1 %v327_v27  ;;  %758 = vmatmul.mubr.bf16.gmra.mxu0 %v327_v27 }
 0x189   :  { %1069 = vmatprep.mubr.bf16.mxu1 %v8316_v0  ;;  %1112 = vmatprep.mubr.bf16.mxu0 %v8316_v0 }
 0x190   :  { %1070 = vmatmul.mubr.bf16.vlgmr.msra.gmra.mxu1 %v844_v30  ;;  %1113 = vmatmul.mubr.bf16.vlgmr.msra.gmra.mxu0 %v844_v30 }
 0x191   :  { %1198 = vmatpush1.bf16.msra.mxu1 %v5447_v41  ;;  %1241 = vmatpush1.bf16.msra.mxu0 %v5457_v45  ;;  %v360_v41 = vld [vmem:[%s8304_s4] sm:$0xf] }
 0x192   :  { %1199 = vmatprep.subr.bf16.mxu1 %v5452_v43  ;;  %1242 = vmatprep.subr.bf16.mxu0 %v5462_v46  ;;  %v8314_v43 = vsub.s32 1, %v5693_v33 }
 0x193   :  { %1229 = vmatprep.mubr.bf16.mxu1 %v8316_v0  ;;  %1272 = vmatprep.mubr.bf16.mxu0 %v8316_v0 }
 0x194   :  { %v5728_v51 = vrot.slane %v360_v41, %v8314_v43 }
 0x195   :  { %1200 = vmatpush1.bf16.msra.mxu1 %v5469_v47  ;;  %1243 = vmatpush1.bf16.msra.mxu0 %v5482_v50  ;;  %v5720_v47 = vrot.slane %v360_v41, %v8315_v39 }
 0x196   :  { %1201 = vmatprep.subr.bf16.mxu1 %v5476_v48  ;;  %1244 = vmatprep.subr.bf16.mxu0 %v5495_v53  ;;  %v5724_v48 = vrot.slane %v360_v41, %v8312_v40 }
 0x199   :  { %1202 = vmatpush1.bf16.msra.mxu1 %v5490_v52  ;;  %1245 = vmatpush1.bf16.msra.mxu0 %v5506_v56  ;;  %v5732_v52 = vrot.slane %v360_v41, %v8313_v44 }
 0x19a   :  { %1203 = vmatprep.subr.bf16.mxu1 %v5500_v55  ;;  %1246 = vmatprep.subr.bf16.mxu0 %v5511_v57 }
 0x19d   :  { %1204 = vmatpush1.bf16.msra.mxu1 %v5519_v58  ;;  %1247 = vmatpush1.bf16.msra.mxu0 %v5532_v61 }
 0x19e   :  { %1205 = vmatprep.subr.bf16.mxu1 %v5526_v60  ;;  %1248 = vmatprep.subr.bf16.mxu0 %v5544_v1 }
 0x1a1   :  { %1206 = vmatpush1.bf16.msra.mxu1 %v5539_v63  ;;  %1249 = vmatpush1.bf16.msra.mxu0 %v5556_v4 }
 0x1a2   :  { %1207 = vmatprep.subr.bf16.mxu1 %v5550_v3  ;;  %1250 = vmatprep.subr.bf16.mxu0 %v5561_v5 }
 0x1a5   :  { %1208 = vmatpush1.bf16.msra.mxu1 %v5569_v6  ;;  %1251 = vmatpush1.bf16.msra.mxu0 %v5582_v9 }
 0x1a6   :  { %1209 = vmatprep.subr.bf16.mxu1 %v5576_v8  ;;  %1252 = vmatprep.subr.bf16.mxu0 %v5594_v12 }
 0x1a9   :  { %1210 = vmatpush1.bf16.msra.mxu1 %v5589_v11  ;;  %1253 = vmatpush1.bf16.msra.mxu0 %v5606_v15 }
 0x1aa   :  { %1211 = vmatprep.subr.bf16.mxu1 %v5601_v14  ;;  %1254 = vmatprep.subr.bf16.mxu0 %v5611_v16 }
 0x1ad   :  { %1212 = vmatpush1.bf16.msra.mxu1 %v5619_v17  ;;  %1255 = vmatpush1.bf16.msra.mxu0 %v5627_v19 }
 0x1ae   :  { %1746 = vmatprep.subr.bf16.mxu1 %v5683_v31  ;;  %1789 = vmatprep.subr.bf16.mxu0 %v5688_v32 }
 0x210   :  { %v5695_v34 = vpop.f32.mrf.mxu1  ;;  %v5697_v36 = vpop.f32.mrf.mxu0 }
 0x212   :  { %v5699_v37 = vpop.f32.mrf.mxu1  ;;  %v5701_v38 = vpop.f32.mrf.mxu0 }
 0x214   :  { %v5708_v42 = vpop.f32.mrf.mxu1  ;;  %v5710_v35 = vpop.f32.mrf.mxu0 }
 0x216   :  { %v5714_v45 = vpop.f32.mrf.mxu1  ;;  %v5716_v46 = vpop.f32.mrf.mxu0 }
 0x218   :  { %v586_v49 = vpop.f32.mrf.mxu1  ;;  %v699_v50 = vpop.f32.mrf.mxu0 }
 0x219   :  { %v5735_v53 = vadd.f32 %v586_v49, %v5720_v47  ;;  %v5738_v54 = vadd.f32 %v699_v50, %v5724_v48 }
 0x21a   :  { %v588_v55 = vpop.f32.mrf.mxu1  ;;  %v701_v56 = vpop.f32.mrf.mxu0 }
 0x21b   :  { %v5741_v57 = vadd.f32 %v588_v55, %v5728_v51  ;;  %v5744_v58 = vadd.f32 %v701_v56, %v5732_v52 }
 0x21c   :  { %v590_v59 = vpop.f32.mrf.mxu1  ;;  %v703_v60 = vpop.f32.mrf.mxu0 }
 0x21d   :  { %v5747_v61 = vadd.f32 %v590_v59, %v5720_v47  ;;  %v5750_v62 = vadd.f32 %v703_v60, %v5724_v48 }
 0x21e   :  { %v592_v63 = vpop.f32.mrf.mxu1  ;;  %v705_v1 = vpop.f32.mrf.mxu0 }
 0x21f   :  { %v5753_v2 = vadd.f32 %v592_v63, %v5728_v51  ;;  %v5756_v3 = vadd.f32 %v705_v1, %v5732_v52 }
 0x220   :  { %v596_v4 = vpop.f32.mrf.mxu1  ;;  %v709_v5 = vpop.f32.mrf.mxu0 }
 0x221   :  { %v5759_v6 = vadd.f32 %v596_v4, %v5720_v47  ;;  %v5762_v7 = vadd.f32 %v709_v5, %v5724_v48 }
 0x222   :  { %v598_v8 = vpop.f32.mrf.mxu1  ;;  %v711_v9 = vpop.f32.mrf.mxu0 }
 0x223   :  { %8586 = vst [vmem:[#allocation4_spill] sm:$0xff] %v5759_v6  ;;  %8587 = vst [vmem:[#allocation5_spill] sm:$0xff] %v5762_v7  ;;  %v5765_v10 = vadd.f32 %v598_v8, %v5728_v51  ;;  %v5768_v11 = vadd.f32 %v711_v9, %v5732_v52  ;;  %v6205_v7 = vld [vmem:[%s8303_s5 + $0x180] ss:$16 sps:$4 sm:$0xff]   ;;  %v6234_v6 = vld [vmem:[%s8303_s5 + $0x168] ss:$16 sps:$4 sm:$0xff]  }
 0x224   :  { %v600_v12 = vpop.f32.mrf.mxu1  ;;  %v713_v13 = vpop.f32.mrf.mxu0  ;;  %8642 = vst [vmem:[#allocation60_spill] sm:$0xff] %v6205_v7  ;;  %8647 = vst [vmem:[#allocation65_spill] sm:$0xff] %v6234_v6 }
 0x225   :  { %8588 = vst [vmem:[#allocation6_spill] sm:$0xff] %v5765_v10  ;;  %8589 = vst [vmem:[#allocation7_spill] sm:$0xff] %v5768_v11  ;;  %v5771_v14 = vadd.f32 %v600_v12, %v5720_v47  ;;  %v5774_v15 = vadd.f32 %v713_v13, %v5724_v48  ;;  %v6210_v11 = vld [vmem:[%s8303_s5 + $0x188] ss:$16 sps:$4 sm:$0xff]   ;;  %v6229_v10 = vld [vmem:[%s8303_s5 + $0x160] ss:$16 sps:$4 sm:$0xff]  }
 0x226   :  { %v602_v16 = vpop.f32.mrf.mxu1  ;;  %v715_v17 = vpop.f32.mrf.mxu0  ;;  %8643 = vst [vmem:[#allocation61_spill] sm:$0xff] %v6210_v11  ;;  %8646 = vst [vmem:[#allocation64_spill] sm:$0xff] %v6229_v10 }
 0x227   :  { %8590 = vst [vmem:[#allocation8_spill] sm:$0xff] %v5771_v14  ;;  %8591 = vst [vmem:[#allocation9_spill] sm:$0xff] %v5774_v15  ;;  %v5777_v18 = vadd.f32 %v602_v16, %v5728_v51  ;;  %v5780_v19 = vadd.f32 %v715_v17, %v5732_v52  ;;  %v6193_v15 = vld [vmem:[%s8303_s5 + $0x184] ss:$16 sps:$4 sm:$0xff]   ;;  %v6222_v14 = vld [vmem:[%s8303_s5 + $0x16c] ss:$16 sps:$4 sm:$0xff]  }
 0x228   :  { %v606_v20 = vpop.f32.mrf.mxu1  ;;  %v719_v21 = vpop.f32.mrf.mxu0  ;;  %8640 = vst [vmem:[#allocation58_spill] sm:$0xff] %v6193_v15  ;;  %8645 = vst [vmem:[#allocation63_spill] sm:$0xff] %v6222_v14 }
 0x229   :  { %8592 = vst [vmem:[#allocation10_spill] sm:$0xff] %v5777_v18  ;;  %8593 = vst [vmem:[#allocation11_spill] sm:$0xff] %v5780_v19  ;;  %v5783_v22 = vadd.f32 %v606_v20, %v5720_v47  ;;  %v5786_v23 = vadd.f32 %v719_v21, %v5724_v48  ;;  %v6198_v19 = vld [vmem:[%s8303_s5 + $0x18c] ss:$16 sps:$4 sm:$0xff]   ;;  %v6217_v18 = vld [vmem:[%s8303_s5 + $0x164] ss:$16 sps:$4 sm:$0xff]  }
 0x22a   :  { %v608_v24 = vpop.f32.mrf.mxu1  ;;  %v721_v25 = vpop.f32.mrf.mxu0  ;;  %8641 = vst [vmem:[#allocation59_spill] sm:$0xff] %v6198_v19  ;;  %8644 = vst [vmem:[#allocation62_spill] sm:$0xff] %v6217_v18 }
 0x22b   :  { %8594 = vst [vmem:[#allocation12_spill] sm:$0xff] %v5783_v22  ;;  %8595 = vst [vmem:[#allocation13_spill] sm:$0xff] %v5786_v23  ;;  %v5789_v26 = vadd.f32 %v608_v24, %v5728_v51  ;;  %v5792_v27 = vadd.f32 %v721_v25, %v5732_v52  ;;  %v6157_v23 = vld [vmem:[%s8303_s5 + $0x1c0] ss:$16 sps:$4 sm:$0xff]   ;;  %v6186_v22 = vld [vmem:[%s8303_s5 + $0x1a8] ss:$16 sps:$4 sm:$0xff]  }
 0x22c   :  { %v610_v28 = vpop.f32.mrf.mxu1  ;;  %v723_v29 = vpop.f32.mrf.mxu0  ;;  %8634 = vst [vmem:[#allocation52_spill] sm:$0xff] %v6157_v23  ;;  %8639 = vst [vmem:[#allocation57_spill] sm:$0xff] %v6186_v22 }
 0x22d   :  { %8596 = vst [vmem:[#allocation14_spill] sm:$0xff] %v5789_v26  ;;  %8597 = vst [vmem:[#allocation15_spill] sm:$0xff] %v5792_v27  ;;  %v5795_v30 = vadd.f32 %v610_v28, %v5720_v47  ;;  %v5798_v41 = vadd.f32 %v723_v29, %v5724_v48  ;;  %v6162_v27 = vld [vmem:[%s8303_s5 + $0x1c8] ss:$16 sps:$4 sm:$0xff]   ;;  %v6181_v26 = vld [vmem:[%s8303_s5 + $0x1a0] ss:$16 sps:$4 sm:$0xff]  }
 0x22e   :  { %v612_v49 = vpop.f32.mrf.mxu1  ;;  %v725_v50 = vpop.f32.mrf.mxu0  ;;  %8635 = vst [vmem:[#allocation53_spill] sm:$0xff] %v6162_v27  ;;  %8638 = vst [vmem:[#allocation56_spill] sm:$0xff] %v6181_v26 }
 0x22f   :  { %8598 = vst [vmem:[#allocation16_spill] sm:$0xff] %v5795_v30  ;;  %8599 = vst [vmem:[#allocation17_spill] sm:$0xff] %v5798_v41  ;;  %v5801_v55 = vadd.f32 %v612_v49, %v5728_v51  ;;  %v5804_v56 = vadd.f32 %v725_v50, %v5732_v52  ;;  %v6145_v41 = vld [vmem:[%s8303_s5 + $0x1c4] ss:$16 sps:$4 sm:$0xff]   ;;  %v6174_v30 = vld [vmem:[%s8303_s5 + $0x1ac] ss:$16 sps:$4 sm:$0xff]  }
 0x230   :  { %v616_v59 = vpop.f32.mrf.mxu1  ;;  %v729_v60 = vpop.f32.mrf.mxu0  ;;  %8637 = vst [vmem:[#allocation55_spill] sm:$0xff] %v6174_v30 }
 0x231   :  { %8600 = vst [vmem:[#allocation18_spill] sm:$0xff] %v5801_v55  ;;  %8601 = vst [vmem:[#allocation19_spill] sm:$0xff] %v5804_v56  ;;  %v5807_v63 = vadd.f32 %v616_v59, %v5720_v47  ;;  %v5810_v1 = vadd.f32 %v729_v60, %v5724_v48  ;;  %v6150_v56 = vld [vmem:[%s8303_s5 + $0x1cc] ss:$16 sps:$4 sm:$0xff]   ;;  %v6169_v55 = vld [vmem:[%s8303_s5 + $0x1a4] ss:$16 sps:$4 sm:$0xff]  }
 0x232   :  { %v618_v4 = vpop.f32.mrf.mxu1  ;;  %v731_v5 = vpop.f32.mrf.mxu0  ;;  %8636 = vst [vmem:[#allocation54_spill] sm:$0xff] %v6169_v55 }
 0x233   :  { %8602 = vst [vmem:[#allocation20_spill] sm:$0xff] %v5807_v63  ;;  %8603 = vst [vmem:[#allocation21_spill] sm:$0xff] %v5810_v1  ;;  %v5813_v8 = vadd.f32 %v618_v4, %v5728_v51  ;;  %v5816_v9 = vadd.f32 %v731_v5, %v5732_v52  ;;  %v6109_v1 = vld [vmem:[%s8303_s5] ss:$16 sps:$4 sm:$0xff]   ;;  %v6138_v63 = vld [vmem:[%s8303_s5 + $0x1e8] ss:$16 sps:$4 sm:$0xff]  }
 0x234   :  { %v620_v12 = vpop.f32.mrf.mxu1  ;;  %v733_v13 = vpop.f32.mrf.mxu0 }
 0x235   :  { %8604 = vst [vmem:[#allocation22_spill] sm:$0xff] %v5813_v8  ;;  %8605 = vst [vmem:[#allocation23_spill] sm:$0xff] %v5816_v9  ;;  %v5819_v16 = vadd.f32 %v620_v12, %v5720_v47  ;;  %v5822_v17 = vadd.f32 %v733_v13, %v5724_v48  ;;  %v6114_v9 = vld [vmem:[%s8303_s5 + $0x8] ss:$16 sps:$4 sm:$0xff]   ;;  %v6133_v8 = vld [vmem:[%s8303_s5 + $0x1e0] ss:$16 sps:$4 sm:$0xff]  }
 0x236   :  { %v622_v20 = vpop.f32.mrf.mxu1  ;;  %v735_v21 = vpop.f32.mrf.mxu0 }
 0x237   :  { %8606 = vst [vmem:[#allocation24_spill] sm:$0xff] %v5819_v16  ;;  %8607 = vst [vmem:[#allocation25_spill] sm:$0xff] %v5822_v17  ;;  %v5825_v24 = vadd.f32 %v622_v20, %v5728_v51  ;;  %v5828_v25 = vadd.f32 %v735_v21, %v5732_v52  ;;  %v6097_v17 = vld [vmem:[%s8303_s5 + $0x4] ss:$16 sps:$4 sm:$0xff]   ;;  %v6126_v16 = vld [vmem:[%s8303_s5 + $0x1ec] ss:$16 sps:$4 sm:$0xff]  }
 0x238   :  { %v626_v28 = vpop.f32.mrf.mxu1  ;;  %v739_v29 = vpop.f32.mrf.mxu0 }
 0x239   :  { %8608 = vst [vmem:[#allocation26_spill] sm:$0xff] %v5825_v24  ;;  %8609 = vst [vmem:[#allocation27_spill] sm:$0xff] %v5828_v25  ;;  %v5831_v49 = vadd.f32 %v626_v28, %v5720_v47  ;;  %v5834_v50 = vadd.f32 %v739_v29, %v5724_v48  ;;  %v6102_v25 = vld [vmem:[%s8303_s5 + $0xc] ss:$16 sps:$4 sm:$0xff]   ;;  %v6121_v24 = vld [vmem:[%s8303_s5 + $0x1e4] ss:$16 sps:$4 sm:$0xff]  }
 0x23a   :  { %v628_v59 = vpop.f32.mrf.mxu1  ;;  %v741_v60 = vpop.f32.mrf.mxu0 }
 0x23b   :  { %8610 = vst [vmem:[#allocation28_spill] sm:$0xff] %v5831_v49  ;;  %8611 = vst [vmem:[#allocation29_spill] sm:$0xff] %v5834_v50  ;;  %v5837_v4 = vadd.f32 %v628_v59, %v5728_v51  ;;  %v5840_v5 = vadd.f32 %v741_v60, %v5732_v52  ;;  %v6090_v49 = vld [vmem:[%s8303_s5 + $0x28] ss:$16 sps:$4 sm:$0xff]  }
 0x23c   :  { %v630_v12 = vpop.f32.mrf.mxu1  ;;  %v743_v13 = vpop.f32.mrf.mxu0 }
 0x23d   :  { %8612 = vst [vmem:[#allocation30_spill] sm:$0xff] %v5837_v4  ;;  %8613 = vst [vmem:[#allocation31_spill] sm:$0xff] %v5840_v5  ;;  %v5843_v20 = vadd.f32 %v630_v12, %v5720_v47  ;;  %v5846_v21 = vadd.f32 %v743_v13, %v5724_v48  ;;  %v6085_v4 = vld [vmem:[%s8303_s5 + $0x20] ss:$16 sps:$4 sm:$0xff]  }
 0x23e   :  { %v632_v28 = vpop.f32.mrf.mxu1  ;;  %v745_v40 = vpop.f32.mrf.mxu0 }
 0x23f   :  { %8614 = vst [vmem:[#allocation32_spill] sm:$0xff] %v5843_v20  ;;  %8615 = vst [vmem:[#allocation33_spill] sm:$0xff] %v5846_v21  ;;  %v5849_v29 = vadd.f32 %v632_v28, %v5728_v51  ;;  %v5852_v44 = vadd.f32 %v745_v40, %v5732_v52 }
 0x240   :  { %v636_v59 = vpop.f32.mrf.mxu1  ;;  %v749_v43 = vpop.f32.mrf.mxu0 }
 0x241   :  { %8616 = vst [vmem:[#allocation34_spill] sm:$0xff] %v5849_v29  ;;  %8617 = vst [vmem:[#allocation35_spill] sm:$0xff] %v5852_v44  ;;  %v5855_v60 = vadd.f32 %v636_v59, %v5720_v47  ;;  %v5858_v39 = vadd.f32 %v749_v43, %v5724_v48 }
 0x242   :  { %v638_v12 = vpop.f32.mrf.mxu1  ;;  %v751_v0 = vpop.f32.mrf.mxu0 }
 0x243   :  { %8618 = vst [vmem:[#allocation36_spill] sm:$0xff] %v5855_v60  ;;  %8619 = vst [vmem:[#allocation37_spill] sm:$0xff] %v5858_v39  ;;  %v5861_v13 = vadd.f32 %v638_v12, %v5728_v51  ;;  %v5864_v21 = vadd.f32 %v751_v0, %v5732_v52 }
 0x244   :  { %v640_v28 = vpop.f32.mrf.mxu1  ;;  %v753_v50 = vpop.f32.mrf.mxu0 }
 0x245   :  { %8620 = vst [vmem:[#allocation38_spill] sm:$0xff] %v5861_v13  ;;  %8621 = vst [vmem:[#allocation39_spill] sm:$0xff] %v5864_v21  ;;  %v5867_v40 = vadd.f32 %v640_v28, %v5720_v47  ;;  %v5870_v44 = vadd.f32 %v753_v50, %v5724_v48 }
 0x246   :  { %v642_v59 = vpop.f32.mrf.mxu1  ;;  %v755_v60 = vpop.f32.mrf.mxu0 }
 0x247   :  { %8622 = vst [vmem:[#allocation40_spill] sm:$0xff] %v5867_v40  ;;  %8623 = vst [vmem:[#allocation41_spill] sm:$0xff] %v5870_v44  ;;  %v5873_v43 = vadd.f32 %v642_v59, %v5728_v51  ;;  %v5876_v39 = vadd.f32 %v755_v60, %v5732_v52 }
 0x248   :  { %v646_v12 = vpop.f32.mrf.mxu1  ;;  %v759_v13 = vpop.f32.mrf.mxu0 }
 0x249   :  { %8624 = vst [vmem:[#allocation42_spill] sm:$0xff] %v5873_v43  ;;  %8625 = vst [vmem:[#allocation43_spill] sm:$0xff] %v5876_v39  ;;  %v5879_v0 = vadd.f32 %v646_v12, %v5720_v47  ;;  %v5882_v21 = vadd.f32 %v759_v13, %v5724_v48  ;;  %v577_v13 = vadd.f32 %v5695_v34, %v5720_v47 }
 0x24a   :  { %v648_v28 = vpop.f32.mrf.mxu1  ;;  %v761_v40 = vpop.f32.mrf.mxu0  ;;  %v583_v34 = vadd.f32 %v5714_v45, %v5728_v51 }
 0x24b   :  { %8626 = vst [vmem:[#allocation44_spill] sm:$0xff] %v5879_v0  ;;  %8627 = vst [vmem:[#allocation45_spill] sm:$0xff] %v5882_v21  ;;  %v5885_v50 = vadd.f32 %v648_v28, %v5728_v51  ;;  %v5888_v44 = vadd.f32 %v761_v40, %v5732_v52 }
 0x24c   :  { %v650_v59 = vpop.f32.mrf.mxu1  ;;  %v763_v43 = vpop.f32.mrf.mxu0 }
 0x24d   :  { %8628 = vst [vmem:[#allocation46_spill] sm:$0xff] %v5885_v50  ;;  %8629 = vst [vmem:[#allocation47_spill] sm:$0xff] %v5888_v44  ;;  %v5891_v60 = vadd.f32 %v650_v59, %v5720_v47  ;;  %v5894_v39 = vadd.f32 %v763_v43, %v5724_v48  ;;  %v579_v44 = vadd.f32 %v5699_v37, %v5728_v51 }
 0x24e   :  { %v652_v12 = vpop.f32.mrf.mxu1  ;;  %v765_v0 = vpop.f32.mrf.mxu0  ;;  %v581_v43 = vadd.f32 %v5708_v42, %v5720_v47  ;;  %v692_v42 = vadd.f32 %v5701_v38, %v5732_v52  ;;  %v690_v47 = vadd.f32 %v5697_v36, %v5724_v48 }
 0x24f   :  { %8630 = vst [vmem:[#allocation48_spill] sm:$0xff] %v5891_v60  ;;  %8631 = vst [vmem:[#allocation49_spill] sm:$0xff] %v5894_v39  ;;  %v5899_v21 = vadd.f32 %v652_v12, %v5728_v51  ;;  %v5902_v28 = vadd.f32 %v765_v0, %v5732_v52 }
 0x250   :  { %v1071_v40 = vpop.f32.mrf.mxu1  ;;  %v1114_v60 = vpop.f32.mrf.mxu0 }
 0x251   :  { %8632 = vst [vmem:[#allocation50_spill] sm:$0xff] %v5899_v21  ;;  %8633 = vst [vmem:[#allocation51_spill] sm:$0xff] %v5902_v28  ;;  %v1123_v59 = vadd.f32 %v1071_v40, %v577_v13  ;;  %v1125_v51 = vadd.f32 %v1114_v60, %v690_v47 }
 0x252   :  { %v1073_v50 = vpop.f32.mrf.mxu1  ;;  %v1116_v0 = vpop.f32.mrf.mxu0 }
 0x253   :  { %v3984_v39 = vmul.f32 -1.442695, %v1123_v59  ;;  %v1124_v5 = vadd.f32 %v1073_v50, %v579_v44  ;;  %v1126_v44 = vadd.f32 %v1116_v0, %v692_v42 }
 0x254   :  { %v1075_v29 = vpop.f32.mrf.mxu1  ;;  %v1118_v13 = vpop.f32.mrf.mxu0 }
 0x255   :  { %4445 = vpow2.f32 %v3984_v39  ;;  %v3986_v12 = vmul.f32 -1.442695, %v1124_v5  ;;  %v1127_v28 = vadd.f32 %v1075_v29, %v581_v43  ;;  %v696_v39 = vadd.f32 %v5716_v46, %v5732_v52 }
 0x256   :  { %v1077_v21 = vpop.f32.mrf.mxu1  ;;  %v1120_v45 = vpop.f32.mrf.mxu0  ;;  %v694_v5 = vadd.f32 %v5710_v35, %v5724_v48 }
 0x257   :  { %4447 = vpow2.f32 %v3986_v12  ;;  %v3985_v20 = vmul.f32 -1.442695, %v1127_v28  ;;  %v1128_v37 = vadd.f32 %v1077_v21, %v583_v34  ;;  %v3988_v21 = vmul.f32 -1.442695, %v1126_v44  ;;  %v842_v12 = vld [vmem:[%s8305_s10] sm:$0xff] }
 0x258   :  { %v1129_v50 = vadd.f32 %v1118_v13, %v694_v5 }
 0x259   :  { %4449 = vpow2.f32 %v3985_v20  ;;  %v3987_v40 = vmul.f32 -1.442695, %v1128_v37  ;;  %v1130_v20 = vadd.f32 %v1120_v45, %v696_v39  ;;  %v843_v45 = vld [vmem:[%s8305_s10 + $0x8] sm:$0xff] }
 0x25b   :  { %4451 = vpow2.f32 %v3987_v40  ;;  %v3989_v59 = vmul.f32 -1.442695, %v1130_v20 }
 0x25c   :  { %4453 = vtanh.f32 %v1125_v51 }
 0x25d   :  { %4455 = vpow2.f32 %v3988_v21 }
 0x262   :  { %v4446_v29 = vpop.eup %4445 }
 0x263   :  { %v1137_v28 = vadd.f32 1.0, %v4446_v29 }
 0x264   :  { %v4448_v38 = vpop.eup %4447 }
 0x265   :  { %4457 = vrcp.f32 %v1137_v28  ;;  %v1149_v43 = vadd.f32 1.0, %v4448_v38 }
 0x266   :  { %v4450_v36 = vpop.eup %4449  ;;  %4459 = vtanh.f32 %v1129_v50 }
 0x267   :  { %4461 = vrcp.f32 %v1149_v43  ;;  %v1138_v34 = vadd.f32 1.0, %v4450_v36 }
 0x268   :  { %v4452_v46 = vpop.eup %4451  ;;  %4463 = vpow2.f32 %v3989_v59 }
 0x269   :  { %4465 = vrcp.f32 %v1138_v34  ;;  %v1150_v52 = vadd.f32 1.0, %v4452_v46  ;;  %v4454_v35 = vpop.eup %4453  ;;  %v3990_v34 = vld [vmem:[%s8302_s9 + $0x10] sm:$0xff]  ;;  %v3991_v46 = vld [vmem:[%s8302_s9 + $0x18] sm:$0xff] }
 0x26a   :  { %v4456_v48 = vpop.eup %4455 }
 0x26b   :  { %4467 = vrcp.f32 %v1150_v52  ;;  %v1163_v47 = vadd.f32 1.0, %v4456_v48  ;;  %v5939_v52 = vld [vmem:[%s8303_s5 + $0xe0] ss:$16 sps:$4 sm:$0xff]  }
 0x26d   :  { %4469 = vrcp.f32 %v1163_v47  ;;  %v5994_v47 = vld [vmem:[%s8303_s5 + $0xa8] ss:$16 sps:$4 sm:$0xff]  }
 0x272   :  { %v4458_v60 = vpop.eup %4457 }
 0x273   :  { %v4460_v0 = vpop.eup %4459  ;;  %v1171_v37 = vmul.f32 %v4458_v60, %v4454_v35  ;;  %v5944_v35 = vld [vmem:[%s8303_s5 + $0xe8] ss:$16 sps:$4 sm:$0xff]   ;;  %v5951_v60 = vld [vmem:[%s8303_s5 + $0xc4] ss:$16 sps:$4 sm:$0xff]  }
 0x274   :  { %v4462_v13 = vpop.eup %4461 }
 0x275   :  { %v4464_v40 = vpop.eup %4463  ;;  %v1169_v42 = vmul.f32 %v4462_v13, %v842_v12  ;;  %v5956_v12 = vld [vmem:[%s8303_s5 + $0xcc] ss:$16 sps:$4 sm:$0xff]   ;;  %v5970_v13 = vld [vmem:[%s8303_s5 + $0xc8] ss:$16 sps:$4 sm:$0xff]  }
 0x276   :  { %v4466_v44 = vpop.eup %4465  ;;  %v1164_v21 = vadd.f32 1.0, %v4464_v40  ;;  %v5977_v40 = vld [vmem:[%s8303_s5 + $0xa4] ss:$16 sps:$4 sm:$0xff]  }
 0x277   :  { %v5924_v39 = vadd.f32 %v1171_v37, %v1169_v42  ;;  %v1172_v51 = vmul.f32 %v4466_v44, %v4460_v0  ;;  %v1339_v0 = vpack.c.bf16 %v3991_v46, %v3990_v34  ;;  %v5965_v37 = vld [vmem:[%s8303_s5 + $0xc0] ss:$16 sps:$4 sm:$0xff]   ;;  %v5982_v42 = vld [vmem:[%s8303_s5 + $0xac] ss:$16 sps:$4 sm:$0xff]   ;;  %v6066_v34 = vld [vmem:[%s8303_s5 + $0x48] ss:$16 sps:$4 sm:$0xff]  }
 0x278   :  { %v4468_v5 = vpop.eup %4467  ;;  %v5989_v44 = vld [vmem:[%s8303_s5 + $0xa0] ss:$16 sps:$4 sm:$0xff]   ;;  %v6073_v46 = vld [vmem:[%s8303_s5 + $0x24] ss:$16 sps:$4 sm:$0xff]  }
 0x279   :  { %v1170_v20 = vmul.f32 %v4468_v5, %v843_v45  ;;  %4471 = vtanh.f32 %v5924_v39  ;;  %v6001_v45 = vld [vmem:[%s8303_s5 + $0x84] ss:$16 sps:$4 sm:$0xff]   ;;  %v6013_v5 = vld [vmem:[%s8303_s5 + $0x80] ss:$16 sps:$4 sm:$0xff]  }
 0x27a   :  { %4473 = vrcp.f32 %v1164_v21  ;;  %v4470_v50 = vpop.eup %4469  ;;  %v6018_v21 = vld [vmem:[%s8303_s5 + $0x88] ss:$16 sps:$4 sm:$0xff]  }
 0x27b   :  { %v5926_v29 = vadd.f32 %v1172_v51, %v1170_v20  ;;  %v6006_v51 = vld [vmem:[%s8303_s5 + $0x8c] ss:$16 sps:$4 sm:$0xff]   ;;  %v6025_v20 = vld [vmem:[%s8303_s5 + $0x64] ss:$16 sps:$4 sm:$0xff]  }
 0x27d   :  { %4475 = vtanh.f32 %v5926_v29 }
 0x286   :  { %v4472_v28 = vpop.eup %4471 }
 0x287   :  { %v4474_v38 = vpop.eup %4473  ;;  %v1177_v43 = vmul.f32 %v4472_v28, %v4470_v50  ;;  %v6030_v50 = vld [vmem:[%s8303_s5 + $0x6c] ss:$16 sps:$4 sm:$0xff]   ;;  %v6037_v28 = vld [vmem:[%s8303_s5 + $0x60] ss:$16 sps:$4 sm:$0xff]  }
 0x28a   :  { %v4476_v59 = vpop.eup %4475 }
 0x28b   :  { %v1178_v36 = vmul.f32 %v4476_v59, %v4474_v38  ;;  %v6042_v38 = vld [vmem:[%s8303_s5 + $0x68] ss:$16 sps:$4 sm:$0xff]   ;;  %v6049_v59 = vld [vmem:[%s8303_s5 + $0x44] ss:$16 sps:$4 sm:$0xff]  }
 0x28d   :  { %v5946_v48 = vpack.c.bf16 %v1178_v36, %v1177_v43  ;;  %v6054_v43 = vld [vmem:[%s8303_s5 + $0x4c] ss:$16 sps:$4 sm:$0xff]   ;;  %v6061_v36 = vld [vmem:[%s8303_s5 + $0x40] ss:$16 sps:$4 sm:$0xff]  }
 0x28f   :  { %1230 = vmatmul.mubr.bf16.vlgmr.msra.gmra.mxu1 %v5946_v48  ;;  %1273 = vmatmul.mubr.bf16.vlgmr.msra.gmra.mxu0 %v5946_v48 }
 0x290   :  { %1747 = vmatpush1.bf16.msra.mxu1 %v5939_v52  ;;  %1790 = vmatpush1.bf16.msra.mxu0 %v5944_v35 }
 0x291   :  { %1748 = vmatprep.subr.bf16.mxu1 %v5951_v60  ;;  %1791 = vmatprep.subr.bf16.mxu0 %v5956_v12 }
 0x292   :  { %1778 = vmatprep.mubr.bf16.mxu1 %v1339_v0  ;;  %1821 = vmatprep.mubr.bf16.mxu0 %v1339_v0  ;;  %v6078_v0 = vld [vmem:[%s8303_s5 + $0x2c] ss:$16 sps:$4 sm:$0xff]  }
 0x294   :  { %1749 = vmatpush1.bf16.msra.mxu1 %v5965_v37  ;;  %1792 = vmatpush1.bf16.msra.mxu0 %v5970_v13 }
 0x295   :  { %1750 = vmatprep.subr.bf16.mxu1 %v5977_v40  ;;  %1793 = vmatprep.subr.bf16.mxu0 %v5982_v42 }
 0x298   :  { %1751 = vmatpush1.bf16.msra.mxu1 %v5989_v44  ;;  %1794 = vmatpush1.bf16.msra.mxu0 %v5994_v47 }
 0x299   :  { %1752 = vmatprep.subr.bf16.mxu1 %v6001_v45  ;;  %1795 = vmatprep.subr.bf16.mxu0 %v6006_v51 }
 0x29c   :  { %1753 = vmatpush1.bf16.msra.mxu1 %v6013_v5  ;;  %1796 = vmatpush1.bf16.msra.mxu0 %v6018_v21 }
 0x29d   :  { %1754 = vmatprep.subr.bf16.mxu1 %v6025_v20  ;;  %1797 = vmatprep.subr.bf16.mxu0 %v6030_v50 }
 0x2a0   :  { %1755 = vmatpush1.bf16.msra.mxu1 %v6037_v28  ;;  %1798 = vmatpush1.bf16.msra.mxu0 %v6042_v38 }
 0x2a1   :  { %1756 = vmatprep.subr.bf16.mxu1 %v6049_v59  ;;  %1799 = vmatprep.subr.bf16.mxu0 %v6054_v43 }
 0x2a4   :  { %1757 = vmatpush1.bf16.msra.mxu1 %v6061_v36  ;;  %1800 = vmatpush1.bf16.msra.mxu0 %v6066_v34 }
 0x2a5   :  { %1758 = vmatprep.subr.bf16.mxu1 %v6073_v46  ;;  %1801 = vmatprep.subr.bf16.mxu0 %v6078_v0 }
 0x2a8   :  { %1759 = vmatpush1.bf16.msra.mxu1 %v6085_v4  ;;  %1802 = vmatpush1.bf16.msra.mxu0 %v6090_v49 }
 0x2a9   :  { %1760 = vmatprep.subr.bf16.mxu1 %v6097_v17  ;;  %1803 = vmatprep.subr.bf16.mxu0 %v6102_v25 }
 0x2ac   :  { %1761 = vmatpush1.bf16.msra.mxu1 %v6109_v1  ;;  %1804 = vmatpush1.bf16.msra.mxu0 %v6114_v9 }
 0x2ad   :  { %1762 = vmatprep.subr.bf16.mxu1 %v6121_v24  ;;  %1805 = vmatprep.subr.bf16.mxu0 %v6126_v16 }
 0x2b0   :  { %1763 = vmatpush2.bf16.msra.mxu1 %v6133_v8  ;;  %1806 = vmatpush2.bf16.msra.mxu0 %v6138_v63 }
 0x2b1   :  { %1764 = vmatprep.subr.bf16.mxu1 %v6145_v41  ;;  %1807 = vmatprep.subr.bf16.mxu0 %v6150_v56 }
 0x2b4   :  { %1765 = vmatpush2.bf16.msra.mxu1 %v6157_v23  ;;  %1808 = vmatpush2.bf16.msra.mxu0 %v6162_v27 }
 0x2b5   :  { %1766 = vmatprep.subr.bf16.mxu1 %v6169_v55  ;;  %1809 = vmatprep.subr.bf16.mxu0 %v6174_v30 }
 0x2b8   :  { %1767 = vmatpush2.bf16.msra.mxu1 %v6181_v26  ;;  %1810 = vmatpush2.bf16.msra.mxu0 %v6186_v22 }
 0x2b9   :  { %1768 = vmatprep.subr.bf16.mxu1 %v6193_v15  ;;  %1811 = vmatprep.subr.bf16.mxu0 %v6198_v19 }
 0x2bc   :  { %1769 = vmatpush2.bf16.msra.mxu1 %v6205_v7  ;;  %1812 = vmatpush2.bf16.msra.mxu0 %v6210_v11  ;;  %v6241_v7 = vld [vmem:[%s8303_s5 + $0x144] ss:$16 sps:$4 sm:$0xff]   ;;  %v6246_v11 = vld [vmem:[%s8303_s5 + $0x14c] ss:$16 sps:$4 sm:$0xff]  }
 0x2bd   :  { %1770 = vmatprep.subr.bf16.mxu1 %v6217_v18  ;;  %1813 = vmatprep.subr.bf16.mxu0 %v6222_v14  ;;  %8648 = vst [vmem:[#allocation66_spill] sm:$0xff] %v6241_v7  ;;  %8649 = vst [vmem:[#allocation67_spill] sm:$0xff] %v6246_v11  ;;  %v6253_v18 = vld [vmem:[%s8303_s5 + $0x140] ss:$16 sps:$4 sm:$0xff]   ;;  %v6258_v14 = vld [vmem:[%s8303_s5 + $0x148] ss:$16 sps:$4 sm:$0xff]  }
 0x2be   :  { %8650 = vst [vmem:[#allocation68_spill] sm:$0xff] %v6253_v18  ;;  %8651 = vst [vmem:[#allocation69_spill] sm:$0xff] %v6258_v14 }
 0x2c0   :  { %1771 = vmatpush2.bf16.msra.mxu1 %v6229_v10  ;;  %1814 = vmatpush2.bf16.msra.mxu0 %v6234_v6  ;;  %v6265_v10 = vld [vmem:[%s8303_s5 + $0x124] ss:$16 sps:$4 sm:$0xff]   ;;  %v6270_v6 = vld [vmem:[%s8303_s5 + $0x12c] ss:$16 sps:$4 sm:$0xff]  }
 0x2c1   :  { %1772 = vmatprep.subr.bf16.mxu1 %v6241_v7  ;;  %1815 = vmatprep.subr.bf16.mxu0 %v6246_v11  ;;  %8652 = vst [vmem:[#allocation70_spill] sm:$0xff] %v6265_v10  ;;  %8653 = vst [vmem:[#allocation71_spill] sm:$0xff] %v6270_v6  ;;  %v6277_v7 = vld [vmem:[%s8303_s5 + $0x120] ss:$16 sps:$4 sm:$0xff]   ;;  %v6282_v11 = vld [vmem:[%s8303_s5 + $0x128] ss:$16 sps:$4 sm:$0xff]  }
 0x2c2   :  { %8654 = vst [vmem:[#allocation72_spill] sm:$0xff] %v6277_v7  ;;  %8655 = vst [vmem:[#allocation73_spill] sm:$0xff] %v6282_v11 }
 0x2c4   :  { %1773 = vmatpush2.bf16.msra.mxu1 %v6253_v18  ;;  %1816 = vmatpush2.bf16.msra.mxu0 %v6258_v14  ;;  %v6289_v18 = vld [vmem:[%s8303_s5 + $0x104] ss:$16 sps:$4 sm:$0xff]   ;;  %v6294_v14 = vld [vmem:[%s8303_s5 + $0x10c] ss:$16 sps:$4 sm:$0xff]  }
 0x2c5   :  { %1774 = vmatprep.subr.bf16.mxu1 %v6265_v10  ;;  %1817 = vmatprep.subr.bf16.mxu0 %v6270_v6  ;;  %8656 = vst [vmem:[#allocation74_spill] sm:$0xff] %v6289_v18  ;;  %8657 = vst [vmem:[#allocation75_spill] sm:$0xff] %v6294_v14  ;;  %v6301_v10 = vld [vmem:[%s8303_s5 + $0x100] ss:$16 sps:$4 sm:$0xff]   ;;  %v6306_v6 = vld [vmem:[%s8303_s5 + $0x108] ss:$16 sps:$4 sm:$0xff]  }
 0x2c6   :  { %8658 = vst [vmem:[#allocation76_spill] sm:$0xff] %v6301_v10  ;;  %8659 = vst [vmem:[#allocation77_spill] sm:$0xff] %v6306_v6 }
 0x2c8   :  { %1775 = vmatpush2.bf16.msra.mxu1 %v6277_v7  ;;  %1818 = vmatpush2.bf16.msra.mxu0 %v6282_v11  ;;  %v6315_v11 = vld [vmem:[%s8301_s3 + $0xe4] ss:$16 sps:$4 sm:$0xff]   ;;  %v6321_v7 = vld [vmem:[%s8301_s3 + $0xec] ss:$16 sps:$4 sm:$0xff]  }
 0x2c9   :  { %1776 = vmatprep.subr.bf16.mxu1 %v6289_v18  ;;  %1819 = vmatprep.subr.bf16.mxu0 %v6294_v14  ;;  %8660 = vst [vmem:[#allocation78_spill] sm:$0xff] %v6315_v11  ;;  %8661 = vst [vmem:[#allocation79_spill] sm:$0xff] %v6321_v7 }
 0x2cc   :  { %1777 = vmatpush2.bf16.msra.mxu1 %v6301_v10  ;;  %1820 = vmatpush2.bf16.msra.mxu0 %v6306_v6  ;;  %v6329_v6 = vld [vmem:[%s8301_s3 + $0xe0] ss:$16 sps:$4 sm:$0xff]  }
 0x2cd   :  { %1892 = vmatprep.subr.bf16.mxu1 %v6315_v11  ;;  %1935 = vmatprep.subr.bf16.mxu0 %v6321_v7  ;;  %8662 = vst [vmem:[#allocation80_spill] sm:$0xff] %v6329_v6  ;;  %v6335_v11 = vld [vmem:[%s8301_s3 + $0xe8] ss:$16 sps:$4 sm:$0xff]   ;;  %v6341_v7 = vld [vmem:[%s8301_s3 + $0xc4] ss:$16 sps:$4 sm:$0xff]  }
 0x2ce   :  { %8663 = vst [vmem:[#allocation81_spill] sm:$0xff] %v6335_v11  ;;  %8664 = vst [vmem:[#allocation82_spill] sm:$0xff] %v6341_v7 }
 0x2cf   :  { %1779 = vmatmul.mubr.bf16.vlgmr.msra.gmra.mxu1 %v5946_v48  ;;  %1822 = vmatmul.mubr.bf16.vlgmr.msra.gmra.mxu0 %v5946_v48  ;;  %v6347_v48 = vld [vmem:[%s8301_s3 + $0xcc] ss:$16 sps:$4 sm:$0xff]  }
 0x2d0   :  { %1893 = vmatpush1.bf16.msra.mxu1 %v6329_v6  ;;  %1936 = vmatpush1.bf16.msra.mxu0 %v6335_v11  ;;  %8665 = vst [vmem:[#allocation83_spill] sm:$0xff] %v6347_v48  ;;  %v8666_v6 = vmov 0   ;;  %v6355_v11 = vld [vmem:[%s8301_s3 + $0xc0] ss:$16 sps:$4 sm:$0xff]  }
 0x2d1   :  { %1894 = vmatprep.subr.bf16.mxu1 %v6341_v7  ;;  %1937 = vmatprep.subr.bf16.mxu0 %v6347_v48  ;;  %8667 = vst [vmem:[#allocation84_spill] sm:$0xff] %v6355_v11  ;;  %v6361_v7 = vld [vmem:[%s8301_s3 + $0xc8] ss:$16 sps:$4 sm:$0xff]   ;;  %v6367_v48 = vld [vmem:[%s8301_s3 + $0xa4] ss:$16 sps:$4 sm:$0xff]  }
 0x2d2   :  { %1924 = vmatprep.mubr.bf16.mxu1 %v8666_v6  ;;  %1967 = vmatprep.mubr.bf16.mxu0 %v8666_v6  ;;  %8668 = vst [vmem:[#allocation85_spill] sm:$0xff] %v6361_v7  ;;  %8669 = vst [vmem:[#allocation86_spill] sm:$0xff] %v6367_v48  ;;  %v6373_v6 = vld [vmem:[%s8301_s3 + $0xac] ss:$16 sps:$4 sm:$0xff]  }
 0x2d3   :  { %8670 = vst [vmem:[#allocation87_spill] sm:$0xff] %v6373_v6 }
 0x2d4   :  { %1895 = vmatpush1.bf16.msra.mxu1 %v6355_v11  ;;  %1938 = vmatpush1.bf16.msra.mxu0 %v6361_v7  ;;  %v6379_v11 = vld [vmem:[%s8301_s3 + $0xa0] ss:$16 sps:$4 sm:$0xff]   ;;  %v6385_v7 = vld [vmem:[%s8301_s3 + $0xa8] ss:$16 sps:$4 sm:$0xff]  }
 0x2d5   :  { %1896 = vmatprep.subr.bf16.mxu1 %v6367_v48  ;;  %1939 = vmatprep.subr.bf16.mxu0 %v6373_v6  ;;  %8671 = vst [vmem:[#allocation88_spill] sm:$0xff] %v6379_v11  ;;  %8672 = vst [vmem:[#allocation89_spill] sm:$0xff] %v6385_v7  ;;  %v6391_v48 = vld [vmem:[%s8301_s3 + $0x84] ss:$16 sps:$4 sm:$0xff]   ;;  %v6397_v6 = vld [vmem:[%s8301_s3 + $0x8c] ss:$16 sps:$4 sm:$0xff]  }
 0x2d6   :  { %8673 = vst [vmem:[#allocation90_spill] sm:$0xff] %v6391_v48  ;;  %8674 = vst [vmem:[#allocation91_spill] sm:$0xff] %v6397_v6 }
 0x2d8   :  { %1897 = vmatpush1.bf16.msra.mxu1 %v6379_v11  ;;  %1940 = vmatpush1.bf16.msra.mxu0 %v6385_v7  ;;  %v6403_v11 = vld [vmem:[%s8301_s3 + $0x80] ss:$16 sps:$4 sm:$0xff]   ;;  %v6409_v7 = vld [vmem:[%s8301_s3 + $0x88] ss:$16 sps:$4 sm:$0xff]  }
 0x2d9   :  { %1898 = vmatprep.subr.bf16.mxu1 %v6391_v48  ;;  %1941 = vmatprep.subr.bf16.mxu0 %v6397_v6  ;;  %8675 = vst [vmem:[#allocation92_spill] sm:$0xff] %v6403_v11  ;;  %8676 = vst [vmem:[#allocation93_spill] sm:$0xff] %v6409_v7  ;;  %v6415_v48 = vld [vmem:[%s8301_s3 + $0x64] ss:$16 sps:$4 sm:$0xff]   ;;  %v6421_v6 = vld [vmem:[%s8301_s3 + $0x6c] ss:$16 sps:$4 sm:$0xff]  }
 0x2da   :  { %8677 = vst [vmem:[#allocation94_spill] sm:$0xff] %v6415_v48  ;;  %8678 = vst [vmem:[#allocation95_spill] sm:$0xff] %v6421_v6 }
 0x2dc   :  { %1899 = vmatpush1.bf16.msra.mxu1 %v6403_v11  ;;  %1942 = vmatpush1.bf16.msra.mxu0 %v6409_v7  ;;  %v6427_v11 = vld [vmem:[%s8301_s3 + $0x60] ss:$16 sps:$4 sm:$0xff]   ;;  %v6433_v7 = vld [vmem:[%s8301_s3 + $0x68] ss:$16 sps:$4 sm:$0xff]  }
 0x2dd   :  { %1900 = vmatprep.subr.bf16.mxu1 %v6415_v48  ;;  %1943 = vmatprep.subr.bf16.mxu0 %v6421_v6  ;;  %8679 = vst [vmem:[#allocation96_spill] sm:$0xff] %v6427_v11  ;;  %8680 = vst [vmem:[#allocation97_spill] sm:$0xff] %v6433_v7  ;;  %v6439_v48 = vld [vmem:[%s8301_s3 + $0x44] ss:$16 sps:$4 sm:$0xff]   ;;  %v6445_v6 = vld [vmem:[%s8301_s3 + $0x4c] ss:$16 sps:$4 sm:$0xff]  }
 0x2de   :  { %8681 = vst [vmem:[#allocation98_spill] sm:$0xff] %v6439_v48  ;;  %8682 = vst [vmem:[#allocation99_spill] sm:$0xff] %v6445_v6 }
 0x2e0   :  { %1901 = vmatpush1.bf16.msra.mxu1 %v6427_v11  ;;  %1944 = vmatpush1.bf16.msra.mxu0 %v6433_v7  ;;  %v6451_v11 = vld [vmem:[%s8301_s3 + $0x40] ss:$16 sps:$4 sm:$0xff]   ;;  %v6457_v7 = vld [vmem:[%s8301_s3 + $0x48] ss:$16 sps:$4 sm:$0xff]  }
 0x2e1   :  { %1902 = vmatprep.subr.bf16.mxu1 %v6439_v48  ;;  %1945 = vmatprep.subr.bf16.mxu0 %v6445_v6  ;;  %8683 = vst [vmem:[#allocation100_spill] sm:$0xff] %v6451_v11  ;;  %8684 = vst [vmem:[#allocation101_spill] sm:$0xff] %v6457_v7  ;;  %v6463_v48 = vld [vmem:[%s8301_s3 + $0x24] ss:$16 sps:$4 sm:$0xff]   ;;  %v6469_v6 = vld [vmem:[%s8301_s3 + $0x2c] ss:$16 sps:$4 sm:$0xff]  }
 0x2e2   :  { %8685 = vst [vmem:[#allocation102_spill] sm:$0xff] %v6463_v48  ;;  %8686 = vst [vmem:[#allocation103_spill] sm:$0xff] %v6469_v6 }
 0x2e4   :  { %1903 = vmatpush1.bf16.msra.mxu1 %v6451_v11  ;;  %1946 = vmatpush1.bf16.msra.mxu0 %v6457_v7  ;;  %v6475_v11 = vld [vmem:[%s8301_s3 + $0x20] ss:$16 sps:$4 sm:$0xff]   ;;  %v6481_v7 = vld [vmem:[%s8301_s3 + $0x28] ss:$16 sps:$4 sm:$0xff]  }
 0x2e5   :  { %1904 = vmatprep.subr.bf16.mxu1 %v6463_v48  ;;  %1947 = vmatprep.subr.bf16.mxu0 %v6469_v6  ;;  %8687 = vst [vmem:[#allocation104_spill] sm:$0xff] %v6475_v11  ;;  %8688 = vst [vmem:[#allocation105_spill] sm:$0xff] %v6481_v7  ;;  %v6487_v48 = vld [vmem:[%s8301_s3 + $0x4] ss:$16 sps:$4 sm:$0xff]   ;;  %v6493_v6 = vld [vmem:[%s8301_s3 + $0xc] ss:$16 sps:$4 sm:$0xff]  }
 0x2e6   :  { %8689 = vst [vmem:[#allocation106_spill] sm:$0xff] %v6487_v48  ;;  %8690 = vst [vmem:[#allocation107_spill] sm:$0xff] %v6493_v6 }
 0x2e8   :  { %1905 = vmatpush1.bf16.msra.mxu1 %v6475_v11  ;;  %1948 = vmatpush1.bf16.msra.mxu0 %v6481_v7  ;;  %v6499_v11 = vld [vmem:[%s8301_s3] ss:$16 sps:$4 sm:$0xff]   ;;  %v6505_v7 = vld [vmem:[%s8301_s3 + $0x8] ss:$16 sps:$4 sm:$0xff]  }
 0x2e9   :  { %1906 = vmatprep.subr.bf16.mxu1 %v6487_v48  ;;  %1949 = vmatprep.subr.bf16.mxu0 %v6493_v6  ;;  %8691 = vst [vmem:[#allocation108_spill] sm:$0xff] %v6499_v11  ;;  %8692 = vst [vmem:[#allocation109_spill] sm:$0xff] %v6505_v7 }
 0x2ec   :  { %1907 = vmatpush1.bf16.msra.mxu1 %v6499_v11  ;;  %1950 = vmatpush1.bf16.msra.mxu0 %v6505_v7 }
 0x2ed   :  { %2035 = vmatprep.subr.bf16.mxu1 %v5683_v31  ;;  %2078 = vmatprep.subr.bf16.mxu0 %v5688_v32 }
 0x34f   :  { %v1231_v48 = vpop.f32.mrf.mxu1  ;;  %v1274_v10 = vpop.f32.mrf.mxu0 }
 0x350   :  { %v1283_v6 = vadd.f32 %v1231_v48, %v5735_v53 }
 0x351   :  { %v1233_v14 = vpop.f32.mrf.mxu1  ;;  %v1276_v22 = vpop.f32.mrf.mxu0 }
 0x352   :  { %v3994_v18 = vmul.f32 -1.442695, %v1283_v6  ;;  %v1284_v19 = vadd.f32 %v1233_v14, %v5741_v57  ;;  %v1286_v53 = vadd.f32 %v1276_v22, %v5744_v58  ;;  %v1285_v57 = vadd.f32 %v1274_v10, %v5738_v54 }
 0x353   :  { %v1235_v11 = vpop.f32.mrf.mxu1  ;;  %v1278_v32 = vpop.f32.mrf.mxu0 }
 0x354   :  { %4477 = vpow2.f32 %v3994_v18  ;;  %v3996_v15 = vmul.f32 -1.442695, %v1284_v19  ;;  %v1287_v26 = vadd.f32 %v1235_v11, %v5747_v61  ;;  %v3998_v14 = vmul.f32 -1.442695, %v1286_v53 }
 0x355   :  { %v1237_v30 = vpop.f32.mrf.mxu1  ;;  %v1280_v6 = vpop.f32.mrf.mxu0  ;;  %v1289_v61 = vadd.f32 %v1278_v32, %v5750_v62 }
 0x356   :  { %4479 = vpow2.f32 %v3996_v15  ;;  %v3995_v7 = vmul.f32 -1.442695, %v1287_v26  ;;  %v1288_v31 = vadd.f32 %v1237_v30, %v5753_v2  ;;  %v1290_v18 = vadd.f32 %v1280_v6, %v5756_v3 }
 0x358   :  { %4481 = vpow2.f32 %v3995_v7  ;;  %v3997_v55 = vmul.f32 -1.442695, %v1288_v31  ;;  %v3999_v2 = vmul.f32 -1.442695, %v1290_v18 }
 0x35a   :  { %4483 = vpow2.f32 %v3997_v55 }
 0x35b   :  { %4485 = vtanh.f32 %v1285_v57 }
 0x35c   :  { %4487 = vpow2.f32 %v3998_v14 }
 0x361   :  { %v4478_v19 = vpop.eup %4477 }
 0x362   :  { %v1297_v11 = vadd.f32 1.0, %v4478_v19 }
 0x363   :  { %v4480_v15 = vpop.eup %4479 }
 0x364   :  { %4489 = vrcp.f32 %v1297_v11  ;;  %v1309_v7 = vadd.f32 1.0, %v4480_v15 }
 0x365   :  { %v4482_v26 = vpop.eup %4481  ;;  %4491 = vtanh.f32 %v1289_v61 }
 0x366   :  { %4493 = vrcp.f32 %v1309_v7  ;;  %v1298_v58 = vadd.f32 1.0, %v4482_v26  ;;  %v1404_v26 = vld [vmem:[%s8306_s6] sm:$0xf] }
 0x367   :  { %v4484_v22 = vpop.eup %4483  ;;  %4495 = vpow2.f32 %v3999_v2 }
 0x368   :  { %4497 = vrcp.f32 %v1298_v58  ;;  %v1310_v54 = vadd.f32 1.0, %v4484_v22  ;;  %v4486_v3 = vpop.eup %4485 }
 0x369   :  { %v4488_v10 = vpop.eup %4487 }
 0x36a   :  { %4499 = vrcp.f32 %v1310_v54  ;;  %v1323_v6 = vadd.f32 1.0, %v4488_v10  ;;  %v8695_v10 = vsub.s32 1, %v5693_v33 }
 0x36c   :  { %4501 = vrcp.f32 %v1323_v6 }
 0x371   :  { %v4490_v30 = vpop.eup %4489 }
 0x372   :  { %v4492_v62 = vpop.eup %4491  ;;  %v1331_v55 = vmul.f32 %v4490_v30, %v4486_v3  ;;  %v6539_v30 = vrot.slane %v1404_v26, %v8695_v10 }
 0x373   :  { %v4494_v48 = vpop.eup %4493 }
 0x374   :  { %v4496_v31 = vpop.eup %4495  ;;  %v1329_v32 = vmul.f32 %v4494_v48, %v5924_v39  ;;  %8696 = vst [vmem:[#allocation111_spill] sm:$0xff] %v6539_v30 }
 0x375   :  { %v4498_v53 = vpop.eup %4497  ;;  %v1324_v19 = vadd.f32 1.0, %v4496_v31 }
 0x376   :  { %v6519_v57 = vadd.f32 %v1331_v55, %v1329_v32  ;;  %v1332_v14 = vmul.f32 %v4498_v53, %v4492_v62 }
 0x377   :  { %v4500_v18 = vpop.eup %4499 }
 0x378   :  { %v1330_v61 = vmul.f32 %v4500_v18, %v5926_v29  ;;  %4503 = vtanh.f32 %v6519_v57  ;;  %v8693_v29 = vsub.s32 0, %v5693_v33 }
 0x379   :  { %4505 = vrcp.f32 %v1324_v19  ;;  %v4502_v15 = vpop.eup %4501 }
 0x37a   :  { %v6522_v11 = vadd.f32 %v1332_v14, %v1330_v61  ;;  %v6531_v54 = vrot.slane %v1404_v26, %v8693_v29  ;;  %v8699_v29 = vsub.s32 2, %v5693_v33 }
 0x37c   :  { %4507 = vtanh.f32 %v6522_v11  ;;  %8694 = vst [vmem:[#allocation110_spill] sm:$0xff] %v6531_v54  ;;  %v6563_v10 = vrot.slane %v1404_v26, %v8699_v29 }
 0x37e   :  { %8700 = vst [vmem:[#allocation113_spill] sm:$0xff] %v6563_v10 }
 0x385   :  { %v4504_v2 = vpop.eup %4503 }
 0x386   :  { %v4506_v39 = vpop.eup %4505  ;;  %v1337_v58 = vmul.f32 %v4504_v2, %v4502_v15 }
 0x389   :  { %v4508_v7 = vpop.eup %4507 }
 0x38a   :  { %v1338_v22 = vmul.f32 %v4508_v7, %v4506_v39 }
 0x38c   :  { %v6533_v3 = vpack.c.bf16 %v1338_v22, %v1337_v58  ;;  %v8697_v58 = vsub.s32 3, %v5693_v33 }
 0x38e   :  { %1925 = vmatmul.mubr.bf16.vlgmr.msra.gmra.mxu1 %v6533_v3  ;;  %1968 = vmatmul.mubr.bf16.vlgmr.msra.gmra.mxu0 %v6533_v3  ;;  %v6559_v22 = vrot.slane %v1404_v26, %v8697_v58  ;;  %v3992_v58 = vld [vmem:[%s8305_s10 + $0x10] sm:$0xff] }
 0x38f   :  { %v1780_v62 = vpop.f32.mrf.mxu1  ;;  %2036 = vmatpush1.bf16.msra.mxu1 %v5939_v52  ;;  %2079 = vmatpush1.bf16.msra.mxu0 %v5944_v35  ;;  %v1823_v48 = vpop.f32.mrf.mxu0 }
 0x390   :  { %v1781_v55 = vadd.f32 %v1780_v62, %v6531_v54  ;;  %2037 = vmatprep.subr.bf16.mxu1 %v5951_v60  ;;  %2080 = vmatprep.subr.bf16.mxu0 %v5956_v12  ;;  %8698 = vst [vmem:[#allocation112_spill] sm:$0xff] %v6559_v22 }
 0x391   :  { %v1782_v31 = vpop.f32.mrf.mxu1  ;;  %v1825_v18 = vpop.f32.mrf.mxu0 }
 0x392   :  { %v4064_v32 = vmul.f32 -1.442695, %v1781_v55  ;;  %v1783_v53 = vadd.f32 %v1782_v31, %v6539_v30  ;;  %v1826_v55 = vadd.f32 %v1825_v18, %v6559_v22  ;;  %v1824_v31 = vadd.f32 %v1823_v48, %v6563_v10 }
 0x393   :  { %v1784_v6 = vpop.f32.mrf.mxu1  ;;  %2038 = vmatpush1.bf16.msra.mxu1 %v5965_v37  ;;  %2081 = vmatpush1.bf16.msra.mxu0 %v5970_v13  ;;  %v1827_v39 = vpop.f32.mrf.mxu0 }
 0x394   :  { %4509 = vpow2.f32 %v4064_v32  ;;  %v4066_v14 = vmul.f32 -1.442695, %v1783_v53  ;;  %v1785_v19 = vadd.f32 %v1784_v6, %v6531_v54  ;;  %2039 = vmatprep.subr.bf16.mxu1 %v5977_v40  ;;  %2082 = vmatprep.subr.bf16.mxu0 %v5982_v42  ;;  %v4068_v26 = vmul.f32 -1.442695, %v1826_v55 }
 0x395   :  { %v1786_v61 = vpop.f32.mrf.mxu1  ;;  %v1829_v62 = vpop.f32.mrf.mxu0 }
 0x396   :  { %4511 = vpow2.f32 %v4066_v14  ;;  %v4065_v15 = vmul.f32 -1.442695, %v1785_v19  ;;  %v1787_v2 = vadd.f32 %v1786_v61, %v6539_v30  ;;  %v1830_v32 = vadd.f32 %v1829_v62, %v6559_v22 }
 0x397   :  { %2040 = vmatpush1.bf16.msra.mxu1 %v5989_v44  ;;  %2083 = vmatpush1.bf16.msra.mxu0 %v5994_v47  ;;  %v1828_v19 = vadd.f32 %v1827_v39, %v6563_v10 }
 0x398   :  { %4513 = vpow2.f32 %v4065_v15  ;;  %v4067_v7 = vmul.f32 -1.442695, %v1787_v2  ;;  %2041 = vmatprep.subr.bf16.mxu1 %v6001_v45  ;;  %2084 = vmatprep.subr.bf16.mxu0 %v6006_v51  ;;  %v4069_v14 = vmul.f32 -1.442695, %v1830_v32 }
 0x39a   :  { %4515 = vpow2.f32 %v4067_v7 }
 0x39b   :  { %2042 = vmatpush1.bf16.msra.mxu1 %v6013_v5  ;;  %2085 = vmatpush1.bf16.msra.mxu0 %v6018_v21  ;;  %4517 = vtanh.f32 %v1824_v31 }
 0x39c   :  { %2043 = vmatprep.subr.bf16.mxu1 %v6025_v20  ;;  %2086 = vmatprep.subr.bf16.mxu0 %v6030_v50 }
 0x39f   :  { %2044 = vmatpush1.bf16.msra.mxu1 %v6037_v28  ;;  %2087 = vmatpush1.bf16.msra.mxu0 %v6042_v38 }
 0x3a0   :  { %2045 = vmatprep.subr.bf16.mxu1 %v6049_v59  ;;  %2088 = vmatprep.subr.bf16.mxu0 %v6054_v43 }
 0x3a1   :  { %v4510_v33 = vpop.eup %4509 }
 0x3a2   :  { %v1838_v53 = vadd.f32 1.0, %v4510_v33  ;;  %v8701_v33 = vld [vmem:[#allocation54_spill] sm:$0xff] }
 0x3a3   :  { %v4512_v6 = vpop.eup %4511  ;;  %2046 = vmatpush1.bf16.msra.mxu1 %v6061_v36  ;;  %2089 = vmatpush1.bf16.msra.mxu0 %v6066_v34 }
 0x3a4   :  { %4519 = vrcp.f32 %v1838_v53  ;;  %v1850_v48 = vadd.f32 1.0, %v4512_v6  ;;  %2047 = vmatprep.subr.bf16.mxu1 %v6073_v46  ;;  %2090 = vmatprep.subr.bf16.mxu0 %v6078_v0 }
 0x3a5   :  { %v4514_v18 = vpop.eup %4513  ;;  %4521 = vpow2.f32 %v4068_v26  ;;  %v8702_v26 = vld [vmem:[#allocation55_spill] sm:$0xff] }
 0x3a6   :  { %4523 = vrcp.f32 %v1850_v48  ;;  %v1839_v61 = vadd.f32 1.0, %v4514_v18 }
 0x3a7   :  { %v4516_v15 = vpop.eup %4515  ;;  %4525 = vpow2.f32 %v4069_v14  ;;  %2048 = vmatpush1.bf16.msra.mxu1 %v6085_v4  ;;  %2091 = vmatpush1.bf16.msra.mxu0 %v6090_v49  ;;  %v3993_v14 = vld [vmem:[%s8305_s10 + $0x18] sm:$0xff] }
 0x3a8   :  { %4527 = vrcp.f32 %v1839_v61  ;;  %v1851_v2 = vadd.f32 1.0, %v4516_v15  ;;  %2049 = vmatprep.subr.bf16.mxu1 %v6097_v17  ;;  %2092 = vmatprep.subr.bf16.mxu0 %v6102_v25  ;;  %v4518_v39 = vpop.eup %4517  ;;  %v8704_v15 = vld [vmem:[#allocation56_spill] sm:$0xff] }
 0x3a9   :  { %4529 = vtanh.f32 %v1828_v19 }
 0x3aa   :  { %4531 = vrcp.f32 %v1851_v2  ;;  %v8705_v2 = vld [vmem:[#allocation57_spill] sm:$0xff] }
 0x3ab   :  { %2050 = vmatpush1.bf16.msra.mxu1 %v6109_v1  ;;  %2093 = vmatpush1.bf16.msra.mxu0 %v6114_v9 }
 0x3ac   :  { %2051 = vmatprep.subr.bf16.mxu1 %v6121_v24  ;;  %2094 = vmatprep.subr.bf16.mxu0 %v6126_v16 }
 0x3af   :  { %2052 = vmatpush2.bf16.msra.mxu1 %v6133_v8  ;;  %2095 = vmatpush2.bf16.msra.mxu0 %v6138_v63 }
 0x3b0   :  { %2053 = vmatprep.subr.bf16.mxu1 %v6145_v41  ;;  %2096 = vmatprep.subr.bf16.mxu0 %v6150_v56 }
 0x3b1   :  { %v4520_v7 = vpop.eup %4519 }
 0x3b2   :  { %v4522_v29 = vpop.eup %4521  ;;  %v1872_v31 = vmul.f32 %v4520_v7, %v4518_v39 }
 0x3b3   :  { %v4524_v62 = vpop.eup %4523  ;;  %2054 = vmatpush2.bf16.msra.mxu1 %v6157_v23  ;;  %2097 = vmatpush2.bf16.msra.mxu0 %v6162_v27  ;;  %v1864_v6 = vadd.f32 1.0, %v4522_v29  ;;  %v8769_v23 = vld [vmem:[#allocation9_spill] sm:$0xff] }
 0x3b4   :  { %v4526_v55 = vpop.eup %4525  ;;  %v1870_v32 = vmul.f32 %v4524_v62, %v3992_v58  ;;  %2055 = vmatprep.subr.bf16.mxu1 %v8701_v33  ;;  %2098 = vmatprep.subr.bf16.mxu0 %v8702_v26  ;;  %v8706_v58 = vld [vmem:[#allocation58_spill] sm:$0xff]  ;;  %v8707_v62 = vld [vmem:[#allocation59_spill] sm:$0xff]  ;;  %v8767_v33 = vld [vmem:[#allocation5_spill] sm:$0xff] }
 0x3b5   :  { %v4528_v53 = vpop.eup %4527  ;;  %v1865_v61 = vadd.f32 1.0, %v4526_v55  ;;  %4533 = vrcp.f32 %v1864_v6  ;;  %v8711_v55 = vld [vmem:[#allocation62_spill] sm:$0xff] }
 0x3b6   :  { %v4530_v48 = vpop.eup %4529  ;;  %v6603_v18 = vadd.f32 %v1872_v31, %v1870_v32  ;;  %v8709_v31 = vld [vmem:[#allocation60_spill] sm:$0xff]  ;;  %v8710_v32 = vld [vmem:[#allocation61_spill] sm:$0xff]  ;;  %v8715_v6 = vld [vmem:[#allocation66_spill] sm:$0xff] }
 0x3b7   :  { %v4532_v19 = vpop.eup %4531  ;;  %2056 = vmatpush2.bf16.msra.mxu1 %v8704_v15  ;;  %2099 = vmatpush2.bf16.msra.mxu0 %v8705_v2  ;;  %v1873_v39 = vmul.f32 %v4530_v48, %v4528_v53  ;;  %v8712_v15 = vld [vmem:[#allocation63_spill] sm:$0xff]  ;;  %v8713_v53 = vld [vmem:[#allocation64_spill] sm:$0xff]  ;;  %v8765_v2 = vld [vmem:[#allocation10_spill] sm:$0xff] }
 0x3b8   :  { %8703 = vst [vmem:[#allocation114_spill] sm:$0xff] %v6603_v18  ;;  %v1871_v7 = vmul.f32 %v4532_v19, %v3993_v14  ;;  %2057 = vmatprep.subr.bf16.mxu1 %v8706_v58  ;;  %2100 = vmatprep.subr.bf16.mxu0 %v8707_v62  ;;  %4535 = vtanh.f32 %v6603_v18  ;;  %v8714_v14 = vld [vmem:[#allocation65_spill] sm:$0xff]  ;;  %v8716_v48 = vld [vmem:[#allocation67_spill] sm:$0xff]  ;;  %v8717_v19 = vld [vmem:[#allocation68_spill] sm:$0xff] }
 0x3b9   :  { %4537 = vrcp.f32 %v1865_v61  ;;  %v8718_v61 = vld [vmem:[#allocation69_spill] sm:$0xff]  ;;  %v8725_v62 = vld [vmem:[#allocation76_spill] sm:$0xff]  ;;  %v8728_v58 = vld [vmem:[#allocation79_spill] sm:$0xff] }
 0x3ba   :  { %v6609_v29 = vadd.f32 %v1873_v39, %v1871_v7  ;;  %v8719_v39 = vld [vmem:[#allocation70_spill] sm:$0xff]  ;;  %v8720_v7 = vld [vmem:[#allocation71_spill] sm:$0xff] }
 0x3bb   :  { %2058 = vmatpush2.bf16.msra.mxu1 %v8709_v31  ;;  %2101 = vmatpush2.bf16.msra.mxu0 %v8710_v32  ;;  %v8721_v32 = vld [vmem:[#allocation72_spill] sm:$0xff]  ;;  %v8722_v31 = vld [vmem:[#allocation73_spill] sm:$0xff] }
 0x3bc   :  { %8708 = vst [vmem:[#allocation115_spill] sm:$0xff] %v6609_v29  ;;  %2059 = vmatprep.subr.bf16.mxu1 %v8711_v55  ;;  %2102 = vmatprep.subr.bf16.mxu0 %v8712_v15  ;;  %4539 = vtanh.f32 %v6609_v29 }
 0x3bf   :  { %2060 = vmatpush2.bf16.msra.mxu1 %v8713_v53  ;;  %2103 = vmatpush2.bf16.msra.mxu0 %v8714_v14  ;;  %v8723_v14 = vld [vmem:[#allocation74_spill] sm:$0xff] }
 0x3c0   :  { %2061 = vmatprep.subr.bf16.mxu1 %v8715_v6  ;;  %2104 = vmatprep.subr.bf16.mxu0 %v8716_v48  ;;  %v8724_v6 = vld [vmem:[#allocation75_spill] sm:$0xff] }
 0x3c2   :  { %v4534_v55 = vpop.eup %4533 }
 0x3c3   :  { %2062 = vmatpush2.bf16.msra.mxu1 %v8717_v19  ;;  %2105 = vmatpush2.bf16.msra.mxu0 %v8718_v61  ;;  %v8726_v61 = vld [vmem:[#allocation77_spill] sm:$0xff] }
 0x3c4   :  { %2063 = vmatprep.subr.bf16.mxu1 %v8719_v39  ;;  %2106 = vmatprep.subr.bf16.mxu0 %v8720_v7  ;;  %v8727_v7 = vld [vmem:[#allocation78_spill] sm:$0xff] }
 0x3c5   :  { %v4536_v15 = vpop.eup %4535 }
 0x3c6   :  { %v4538_v53 = vpop.eup %4537  ;;  %v1878_v29 = vmul.f32 %v4536_v15, %v4534_v55  ;;  %v8731_v15 = vld [vmem:[#allocation82_spill] sm:$0xff]  ;;  %v8732_v55 = vld [vmem:[#allocation83_spill] sm:$0xff] }
 0x3c7   :  { %2064 = vmatpush2.bf16.msra.mxu1 %v8721_v32  ;;  %2107 = vmatpush2.bf16.msra.mxu0 %v8722_v31 }
 0x3c8   :  { %2065 = vmatprep.subr.bf16.mxu1 %v8723_v14  ;;  %2108 = vmatprep.subr.bf16.mxu0 %v8724_v6  ;;  %v8729_v14 = vld [vmem:[#allocation80_spill] sm:$0xff]  ;;  %v8730_v6 = vld [vmem:[#allocation81_spill] sm:$0xff] }
 0x3c9   :  { %v4540_v48 = vpop.eup %4539 }
 0x3ca   :  { %v1879_v19 = vmul.f32 %v4540_v48, %v4538_v53  ;;  %v8733_v53 = vmov 0   ;;  %v8735_v48 = vld [vmem:[#allocation85_spill] sm:$0xff] }
 0x3cb   :  { %2066 = vmatpush2.bf16.msra.mxu1 %v8725_v62  ;;  %2109 = vmatpush2.bf16.msra.mxu0 %v8726_v61 }
 0x3cc   :  { %v2034_v39 = vpack.c.bf16 %v1879_v19, %v1878_v29  ;;  %2181 = vmatprep.subr.bf16.mxu1 %v8727_v7  ;;  %2224 = vmatprep.subr.bf16.mxu0 %v8728_v58  ;;  %v8734_v29 = vld [vmem:[#allocation84_spill] sm:$0xff]  ;;  %v8736_v19 = vld [vmem:[#allocation86_spill] sm:$0xff]  ;;  %v8743_v58 = vld [vmem:[#allocation93_spill] sm:$0xff] }
 0x3ce   :  { %2067 = vmatprep.mubr.bf16.mxu1 %v2034_v39  ;;  %2110 = vmatprep.mubr.bf16.mxu0 %v2034_v39  ;;  %v8737_v39 = vld [vmem:[#allocation87_spill] sm:$0xff] }
 0x3cf   :  { %2068 = vmatmul.mubr.bf16.vlgmr.msra.gmra.mxu1 %v6533_v3  ;;  %2111 = vmatmul.mubr.bf16.vlgmr.msra.gmra.mxu0 %v6533_v3  ;;  %v8738_v3 = vld [vmem:[#allocation88_spill] sm:$0xff] }
 0x3d0   :  { %2182 = vmatpush1.bf16.msra.mxu1 %v8729_v14  ;;  %2225 = vmatpush1.bf16.msra.mxu0 %v8730_v6  ;;  %v8739_v14 = vld [vmem:[#allocation89_spill] sm:$0xff]  ;;  %v8740_v6 = vld [vmem:[#allocation90_spill] sm:$0xff] }
 0x3d1   :  { %2183 = vmatprep.subr.bf16.mxu1 %v8731_v15  ;;  %2226 = vmatprep.subr.bf16.mxu0 %v8732_v55  ;;  %v8741_v15 = vld [vmem:[#allocation91_spill] sm:$0xff]  ;;  %v8742_v55 = vld [vmem:[#allocation92_spill] sm:$0xff] }
 0x3d2   :  { %2213 = vmatprep.mubr.bf16.mxu1 %v8733_v53  ;;  %2256 = vmatprep.mubr.bf16.mxu0 %v8733_v53  ;;  %v8744_v53 = vld [vmem:[#allocation94_spill] sm:$0xff] }
 0x3d4   :  { %2184 = vmatpush1.bf16.msra.mxu1 %v8734_v29  ;;  %2227 = vmatpush1.bf16.msra.mxu0 %v8735_v48  ;;  %v8745_v29 = vld [vmem:[#allocation95_spill] sm:$0xff]  ;;  %v8746_v48 = vld [vmem:[#allocation96_spill] sm:$0xff] }
 0x3d5   :  { %2185 = vmatprep.subr.bf16.mxu1 %v8736_v19  ;;  %2228 = vmatprep.subr.bf16.mxu0 %v8737_v39  ;;  %v8747_v19 = vld [vmem:[#allocation97_spill] sm:$0xff]  ;;  %v8748_v39 = vld [vmem:[#allocation98_spill] sm:$0xff] }
 0x3d8   :  { %2186 = vmatpush1.bf16.msra.mxu1 %v8738_v3  ;;  %2229 = vmatpush1.bf16.msra.mxu0 %v8739_v14  ;;  %v8749_v3 = vld [vmem:[#allocation99_spill] sm:$0xff]  ;;  %v8750_v14 = vld [vmem:[#allocation100_spill] sm:$0xff] }
 0x3d9   :  { %2187 = vmatprep.subr.bf16.mxu1 %v8740_v6  ;;  %2230 = vmatprep.subr.bf16.mxu0 %v8741_v15  ;;  %v8751_v6 = vld [vmem:[#allocation101_spill] sm:$0xff]  ;;  %v8752_v15 = vld [vmem:[#allocation102_spill] sm:$0xff] }
 0x3dc   :  { %2188 = vmatpush1.bf16.msra.mxu1 %v8742_v55  ;;  %2231 = vmatpush1.bf16.msra.mxu0 %v8743_v58  ;;  %v8753_v55 = vld [vmem:[#allocation103_spill] sm:$0xff]  ;;  %v8754_v58 = vld [vmem:[#allocation104_spill] sm:$0xff] }
 0x3dd   :  { %2189 = vmatprep.subr.bf16.mxu1 %v8744_v53  ;;  %2232 = vmatprep.subr.bf16.mxu0 %v8745_v29  ;;  %v8755_v53 = vld [vmem:[#allocation105_spill] sm:$0xff]  ;;  %v8756_v29 = vld [vmem:[#allocation106_spill] sm:$0xff] }
 0x3e0   :  { %2190 = vmatpush1.bf16.msra.mxu1 %v8746_v48  ;;  %2233 = vmatpush1.bf16.msra.mxu0 %v8747_v19  ;;  %v8757_v48 = vld [vmem:[#allocation107_spill] sm:$0xff]  ;;  %v8758_v19 = vld [vmem:[#allocation108_spill] sm:$0xff] }
 0x3e1   :  { %2191 = vmatprep.subr.bf16.mxu1 %v8748_v39  ;;  %2234 = vmatprep.subr.bf16.mxu0 %v8749_v3  ;;  %v8759_v39 = vld [vmem:[#allocation109_spill] sm:$0xff] }
 0x3e4   :  { %2192 = vmatpush1.bf16.msra.mxu1 %v8750_v14  ;;  %2235 = vmatpush1.bf16.msra.mxu0 %v8751_v6  ;;  %v6670_v6 = vld [vmem:[%s8303_s5 + $0xe4] ss:$16 sps:$4 sm:$0xff]  }
 0x3e5   :  { %2193 = vmatprep.subr.bf16.mxu1 %v8752_v15  ;;  %2236 = vmatprep.subr.bf16.mxu0 %v8753_v55  ;;  %8760 = vst [vmem:[#allocation116_spill] sm:$0xff] %v6670_v6  ;;  %v8763_v15 = vld [vmem:[#allocation6_spill] sm:$0xff] }
 0x3e8   :  { %2194 = vmatpush1.bf16.msra.mxu1 %v8754_v58  ;;  %2237 = vmatpush1.bf16.msra.mxu0 %v8755_v53  ;;  %v6676_v58 = vld [vmem:[%s8303_s5 + $0xec] ss:$16 sps:$4 sm:$0xff]  }
 0x3e9   :  { %2195 = vmatprep.subr.bf16.mxu1 %v8756_v29  ;;  %2238 = vmatprep.subr.bf16.mxu0 %v8757_v48  ;;  %8761 = vst [vmem:[#allocation117_spill] sm:$0xff] %v6676_v58  ;;  %v8762_v48 = vld [vmem:[#allocation4_spill] sm:$0xff] }
 0x3ec   :  { %2196 = vmatpush1.bf16.msra.mxu1 %v8758_v19  ;;  %2239 = vmatpush1.bf16.msra.mxu0 %v8759_v39 }
 0x3ed   :  { %2324 = vmatprep.subr.bf16.mxu1 %v6670_v6  ;;  %2367 = vmatprep.subr.bf16.mxu0 %v6676_v58  ;;  %v8764_v6 = vld [vmem:[#allocation8_spill] sm:$0xff] }
 0x44e   :  { %v1926_v29 = vpop.f32.mrf.mxu1  ;;  %v1969_v19 = vpop.f32.mrf.mxu0 }
 0x44f   :  { %v1978_v53 = vadd.f32 %v1926_v29, %v8762_v48  ;;  %v8766_v29 = vld [vmem:[#allocation7_spill] sm:$0xff] }
 0x450   :  { %v1928_v55 = vpop.f32.mrf.mxu1  ;;  %v1971_v61 = vpop.f32.mrf.mxu0 }
 0x451   :  { %v4070_v39 = vmul.f32 -1.442695, %v1978_v53  ;;  %v1979_v14 = vadd.f32 %v1928_v55, %v8763_v15  ;;  %v1981_v48 = vadd.f32 %v1971_v61, %v8766_v29  ;;  %v1980_v15 = vadd.f32 %v1969_v19, %v8767_v33 }
 0x452   :  { %v1930_v3 = vpop.f32.mrf.mxu1  ;;  %v1973_v58 = vpop.f32.mrf.mxu0 }
 0x453   :  { %4541 = vpow2.f32 %v4070_v39  ;;  %v4072_v7 = vmul.f32 -1.442695, %v1979_v14  ;;  %v1982_v62 = vadd.f32 %v1930_v3, %v8764_v6  ;;  %v4074_v55 = vmul.f32 -1.442695, %v1981_v48  ;;  %v8768_v39 = vld [vmem:[#allocation11_spill] sm:$0xff] }
 0x454   :  { %v1932_v31 = vpop.f32.mrf.mxu1  ;;  %v1975_v53 = vpop.f32.mrf.mxu0  ;;  %v1984_v6 = vadd.f32 %v1973_v58, %v8769_v23 }
 0x455   :  { %4543 = vpow2.f32 %v4072_v7  ;;  %v4071_v32 = vmul.f32 -1.442695, %v1982_v62  ;;  %v1983_v18 = vadd.f32 %v1932_v31, %v8765_v2  ;;  %v1985_v14 = vadd.f32 %v1975_v53, %v8768_v39 }
 0x457   :  { %4545 = vpow2.f32 %v4071_v32  ;;  %v4073_v26 = vmul.f32 -1.442695, %v1983_v18  ;;  %v4075_v2 = vmul.f32 -1.442695, %v1985_v14 }
 0x459   :  { %4547 = vpow2.f32 %v4073_v26 }
 0x45a   :  { %4549 = vtanh.f32 %v1980_v15 }
 0x45b   :  { %4551 = vpow2.f32 %v4074_v55 }
 0x460   :  { %v4542_v27 = vpop.eup %4541 }
 0x461   :  { %v1992_v3 = vadd.f32 1.0, %v4542_v27 }
 0x462   :  { %v4544_v62 = vpop.eup %4543 }
 0x463   :  { %4553 = vrcp.f32 %v1992_v3  ;;  %v2004_v31 = vadd.f32 1.0, %v4544_v62 }
 0x464   :  { %v4546_v18 = vpop.eup %4545  ;;  %4555 = vtanh.f32 %v1984_v6 }
 0x465   :  { %4557 = vrcp.f32 %v2004_v31  ;;  %v1993_v26 = vadd.f32 1.0, %v4546_v18 }
 0x466   :  { %v4548_v32 = vpop.eup %4547  ;;  %4559 = vpow2.f32 %v4075_v2 }
 0x467   :  { %4561 = vrcp.f32 %v1993_v26  ;;  %v2005_v33 = vadd.f32 1.0, %v4548_v32  ;;  %v4550_v61 = vpop.eup %4549 }
 0x468   :  { %v4552_v7 = vpop.eup %4551 }
 0x469   :  { %4563 = vrcp.f32 %v2005_v33  ;;  %v2018_v15 = vadd.f32 1.0, %v4552_v7 }
 0x46b   :  { %4565 = vrcp.f32 %v2018_v15  ;;  %v8775_v15 = vld [vmem:[#allocation56_spill] sm:$0xff] }
 0x470   :  { %v4554_v19 = vpop.eup %4553 }
 0x471   :  { %v4556_v23 = vpop.eup %4555  ;;  %v2026_v27 = vmul.f32 %v4554_v19, %v4550_v61 }
 0x472   :  { %v4558_v58 = vpop.eup %4557 }
 0x473   :  { %v4560_v29 = vpop.eup %4559  ;;  %v2024_v48 = vmul.f32 %v4558_v58, %v6519_v57 }
 0x474   :  { %v4562_v53 = vpop.eup %4561  ;;  %v2019_v6 = vadd.f32 1.0, %v4560_v29 }
 0x475   :  { %v6688_v55 = vadd.f32 %v2026_v27, %v2024_v48  ;;  %v2027_v39 = vmul.f32 %v4562_v53, %v4556_v23 }
 0x476   :  { %v4564_v14 = vpop.eup %4563 }
 0x477   :  { %v2025_v3 = vmul.f32 %v4564_v14, %v6522_v11  ;;  %4567 = vtanh.f32 %v6688_v55 }
 0x478   :  { %4569 = vrcp.f32 %v2019_v6  ;;  %v4566_v2 = vpop.eup %4565 }
 0x479   :  { %v6691_v62 = vadd.f32 %v2027_v39, %v2025_v3  ;;  %v8776_v39 = vld [vmem:[#allocation57_spill] sm:$0xff]  ;;  %v8777_v3 = vld [vmem:[#allocation58_spill] sm:$0xff] }
 0x47b   :  { %4571 = vtanh.f32 %v6691_v62 }
 0x484   :  { %v4568_v31 = vpop.eup %4567 }
 0x485   :  { %v4570_v57 = vpop.eup %4569  ;;  %v2032_v26 = vmul.f32 %v4568_v31, %v4566_v2  ;;  %v8778_v2 = vld [vmem:[#allocation59_spill] sm:$0xff] }
 0x488   :  { %v4572_v18 = vpop.eup %4571 }
 0x489   :  { %v2033_v32 = vmul.f32 %v4572_v18, %v4570_v57  ;;  %v8779_v57 = vld [vmem:[#allocation115_spill] sm:$0xff] }
 0x48b   :  { %v6695_v33 = vpack.c.bf16 %v2033_v32, %v2032_v26  ;;  %v8780_v32 = vld [vmem:[#allocation60_spill] sm:$0xff] }
 0x48d   :  { %2214 = vmatmul.mubr.bf16.vlgmr.msra.gmra.mxu1 %v6695_v33  ;;  %2257 = vmatmul.mubr.bf16.vlgmr.msra.gmra.mxu0 %v6695_v33 }
 0x48e   :  { %2325 = vmatpush1.bf16.msra.mxu1 %v5939_v52  ;;  %2368 = vmatpush1.bf16.msra.mxu0 %v5944_v35 }
 0x48f   :  { %v2069_v11 = vpop.f32.mrf.mxu1  ;;  %2326 = vmatprep.subr.bf16.mxu1 %v5951_v60  ;;  %2369 = vmatprep.subr.bf16.mxu0 %v5956_v12  ;;  %v2112_v7 = vpop.f32.mrf.mxu0 }
 0x490   :  { %v2070_v61 = vadd.f32 %v2069_v11, %v6531_v54  ;;  %v8781_v11 = vld [vmem:[#allocation61_spill] sm:$0xff] }
 0x491   :  { %v2071_v19 = vpop.f32.mrf.mxu1  ;;  %v2114_v35 = vpop.f32.mrf.mxu0 }
 0x492   :  { %v4076_v23 = vmul.f32 -1.442695, %v2070_v61  ;;  %v2072_v27 = vadd.f32 %v2071_v19, %v6539_v30  ;;  %2327 = vmatpush1.bf16.msra.mxu1 %v5965_v37  ;;  %2370 = vmatpush1.bf16.msra.mxu0 %v5970_v13  ;;  %v8782_v61 = vld [vmem:[#allocation62_spill] sm:$0xff]  ;;  %v8784_v19 = vld [vmem:[#allocation64_spill] sm:$0xff] }
 0x493   :  { %v2073_v58 = vpop.f32.mrf.mxu1  ;;  %2328 = vmatprep.subr.bf16.mxu1 %v5977_v40  ;;  %2371 = vmatprep.subr.bf16.mxu0 %v5982_v42  ;;  %v2116_v37 = vpop.f32.mrf.mxu0  ;;  %v2115_v42 = vadd.f32 %v2114_v35, %v6559_v22  ;;  %v8789_v35 = vld [vmem:[#allocation69_spill] sm:$0xff] }
 0x494   :  { %4573 = vpow2.f32 %v4076_v23  ;;  %v4078_v52 = vmul.f32 -1.442695, %v2072_v27  ;;  %v2074_v60 = vadd.f32 %v2073_v58, %v6531_v54  ;;  %v8785_v23 = vld [vmem:[#allocation65_spill] sm:$0xff]  ;;  %v8786_v27 = vld [vmem:[#allocation66_spill] sm:$0xff]  ;;  %v8787_v58 = vld [vmem:[#allocation67_spill] sm:$0xff] }
 0x495   :  { %v2075_v12 = vpop.f32.mrf.mxu1  ;;  %v2118_v40 = vpop.f32.mrf.mxu0 }
 0x496   :  { %4575 = vpow2.f32 %v4078_v52  ;;  %v4077_v29 = vmul.f32 -1.442695, %v2074_v60  ;;  %v2076_v48 = vadd.f32 %v2075_v12, %v6539_v30  ;;  %2329 = vmatpush1.bf16.msra.mxu1 %v5989_v44  ;;  %2372 = vmatpush1.bf16.msra.mxu0 %v5994_v47  ;;  %v2113_v44 = vadd.f32 %v2112_v7, %v6563_v10  ;;  %v8783_v7 = vld [vmem:[#allocation63_spill] sm:$0xff]  ;;  %v8788_v52 = vld [vmem:[#allocation68_spill] sm:$0xff]  ;;  %v8790_v60 = vld [vmem:[#allocation70_spill] sm:$0xff] }
 0x497   :  { %2330 = vmatprep.subr.bf16.mxu1 %v6001_v45  ;;  %2373 = vmatprep.subr.bf16.mxu0 %v6006_v51  ;;  %v2119_v47 = vadd.f32 %v2118_v40, %v6559_v22  ;;  %v4080_v51 = vmul.f32 -1.442695, %v2115_v42  ;;  %v8791_v12 = vld [vmem:[#allocation71_spill] sm:$0xff]  ;;  %v8794_v40 = vld [vmem:[#allocation74_spill] sm:$0xff] }
 0x498   :  { %4577 = vpow2.f32 %v4077_v29  ;;  %v4079_v13 = vmul.f32 -1.442695, %v2076_v48  ;;  %v8792_v48 = vld [vmem:[#allocation72_spill] sm:$0xff]  ;;  %v8795_v42 = vld [vmem:[#allocation75_spill] sm:$0xff] }
 0x49a   :  { %4579 = vpow2.f32 %v4079_v13  ;;  %2331 = vmatpush1.bf16.msra.mxu1 %v6013_v5  ;;  %2374 = vmatpush1.bf16.msra.mxu0 %v6018_v21 }
 0x49b   :  { %2332 = vmatprep.subr.bf16.mxu1 %v6025_v20  ;;  %2375 = vmatprep.subr.bf16.mxu0 %v6030_v50  ;;  %4581 = vtanh.f32 %v2113_v44  ;;  %v4081_v20 = vmul.f32 -1.442695, %v2119_v47 }
 0x49e   :  { %2333 = vmatpush1.bf16.msra.mxu1 %v6037_v28  ;;  %2376 = vmatpush1.bf16.msra.mxu0 %v6042_v38  ;;  %v2117_v38 = vadd.f32 %v2116_v37, %v6563_v10  ;;  %v8793_v37 = vld [vmem:[#allocation73_spill] sm:$0xff] }
 0x49f   :  { %2334 = vmatprep.subr.bf16.mxu1 %v6049_v59  ;;  %2377 = vmatprep.subr.bf16.mxu0 %v6054_v43 }
 0x4a1   :  { %v4574_v45 = vpop.eup %4573 }
 0x4a2   :  { %v2127_v5 = vadd.f32 1.0, %v4574_v45  ;;  %2335 = vmatpush1.bf16.msra.mxu1 %v6061_v36  ;;  %2378 = vmatpush1.bf16.msra.mxu0 %v6066_v34  ;;  %v8772_v34 = vld [vmem:[#allocation54_spill] sm:$0xff]  ;;  %v8796_v45 = vld [vmem:[#allocation76_spill] sm:$0xff] }
 0x4a3   :  { %v4576_v21 = vpop.eup %4575  ;;  %2336 = vmatprep.subr.bf16.mxu1 %v6073_v46  ;;  %2379 = vmatprep.subr.bf16.mxu0 %v6078_v0  ;;  %v8774_v46 = vld [vmem:[#allocation114_spill] sm:$0xff] }
 0x4a4   :  { %4583 = vrcp.f32 %v2127_v5  ;;  %v2139_v50 = vadd.f32 1.0, %v4576_v21 }
 0x4a5   :  { %v4578_v28 = vpop.eup %4577  ;;  %4585 = vpow2.f32 %v4080_v51  ;;  %v8797_v51 = vld [vmem:[#allocation77_spill] sm:$0xff] }
 0x4a6   :  { %4587 = vrcp.f32 %v2139_v50  ;;  %v2128_v59 = vadd.f32 1.0, %v4578_v28  ;;  %2337 = vmatpush1.bf16.msra.mxu1 %v6085_v4  ;;  %2380 = vmatpush1.bf16.msra.mxu0 %v6090_v49  ;;  %v8770_v4 = vld [vmem:[#allocation52_spill] sm:$0xff]  ;;  %v8799_v50 = vld [vmem:[#allocation79_spill] sm:$0xff] }
 0x4a7   :  { %v4580_v43 = vpop.eup %4579  ;;  %4589 = vpow2.f32 %v4081_v20  ;;  %2338 = vmatprep.subr.bf16.mxu1 %v6097_v17  ;;  %2381 = vmatprep.subr.bf16.mxu0 %v6102_v25  ;;  %v8798_v20 = vld [vmem:[#allocation78_spill] sm:$0xff] }
 0x4a8   :  { %4591 = vrcp.f32 %v2128_v59  ;;  %v2140_v36 = vadd.f32 1.0, %v4580_v43  ;;  %v4582_v17 = vpop.eup %4581  ;;  %v8801_v59 = vld [vmem:[#allocation81_spill] sm:$0xff]  ;;  %v8802_v43 = vld [vmem:[#allocation82_spill] sm:$0xff] }
 0x4a9   :  { %4593 = vtanh.f32 %v2117_v38  ;;  %v8800_v38 = vld [vmem:[#allocation80_spill] sm:$0xff] }
 0x4aa   :  { %4595 = vrcp.f32 %v2140_v36  ;;  %2339 = vmatpush1.bf16.msra.mxu1 %v6109_v1  ;;  %2382 = vmatpush1.bf16.msra.mxu0 %v6114_v9  ;;  %v8771_v1 = vld [vmem:[#allocation53_spill] sm:$0xff]  ;;  %v8803_v36 = vld [vmem:[#allocation83_spill] sm:$0xff] }
 0x4ab   :  { %2340 = vmatprep.subr.bf16.mxu1 %v6121_v24  ;;  %2383 = vmatprep.subr.bf16.mxu0 %v6126_v16  ;;  %v8773_v24 = vld [vmem:[#allocation55_spill] sm:$0xff] }
 0x4ae   :  { %2341 = vmatpush2.bf16.msra.mxu1 %v6133_v8  ;;  %2384 = vmatpush2.bf16.msra.mxu0 %v6138_v63 }
 0x4af   :  { %2342 = vmatprep.subr.bf16.mxu1 %v6145_v41  ;;  %2385 = vmatprep.subr.bf16.mxu0 %v6150_v56 }
 0x4b1   :  { %v4584_v25 = vpop.eup %4583 }
 0x4b2   :  { %v4586_v49 = vpop.eup %4585  ;;  %2343 = vmatpush2.bf16.msra.mxu1 %v8770_v4  ;;  %2386 = vmatpush2.bf16.msra.mxu0 %v8771_v1  ;;  %v2161_v8 = vmul.f32 %v4584_v25, %v4582_v17  ;;  %v8804_v17 = vmov 0   ;;  %v8805_v25 = vld [vmem:[#allocation84_spill] sm:$0xff]  ;;  %v8807_v4 = vld [vmem:[#allocation86_spill] sm:$0xff]  ;;  %v8808_v1 = vld [vmem:[#allocation87_spill] sm:$0xff] }
 0x4b3   :  { %v4588_v9 = vpop.eup %4587  ;;  %2344 = vmatprep.subr.bf16.mxu1 %v8772_v34  ;;  %2387 = vmatprep.subr.bf16.mxu0 %v8773_v24  ;;  %v2153_v41 = vadd.f32 1.0, %v4586_v49  ;;  %v8806_v49 = vld [vmem:[#allocation85_spill] sm:$0xff]  ;;  %v8811_v34 = vld [vmem:[#allocation90_spill] sm:$0xff]  ;;  %v8812_v24 = vld [vmem:[#allocation91_spill] sm:$0xff] }
 0x4b4   :  { %v4590_v16 = vpop.eup %4589  ;;  %v2159_v63 = vmul.f32 %v4588_v9, %v8774_v46  ;;  %v8810_v9 = vld [vmem:[#allocation89_spill] sm:$0xff]  ;;  %v8815_v46 = vld [vmem:[#allocation94_spill] sm:$0xff] }
 0x4b5   :  { %v4592_v0 = vpop.eup %4591  ;;  %v2154_v6 = vadd.f32 1.0, %v4590_v16  ;;  %4597 = vrcp.f32 %v2153_v41  ;;  %v8813_v16 = vld [vmem:[#allocation92_spill] sm:$0xff]  ;;  %v8818_v41 = vld [vmem:[#allocation97_spill] sm:$0xff] }
 0x4b6   :  { %v4594_v53 = vpop.eup %4593  ;;  %v6748_v56 = vadd.f32 %v2161_v8, %v2159_v63  ;;  %2345 = vmatpush2.bf16.msra.mxu1 %v8775_v15  ;;  %2388 = vmatpush2.bf16.msra.mxu0 %v8776_v39  ;;  %v8814_v8 = vld [vmem:[#allocation93_spill] sm:$0xff]  ;;  %v8816_v63 = vld [vmem:[#allocation95_spill] sm:$0xff]  ;;  %v8821_v39 = vld [vmem:[#allocation100_spill] sm:$0xff] }
 0x4b7   :  { %v4596_v14 = vpop.eup %4595  ;;  %2346 = vmatprep.subr.bf16.mxu1 %v8777_v3  ;;  %2389 = vmatprep.subr.bf16.mxu0 %v8778_v2  ;;  %v2162_v31 = vmul.f32 %v4594_v53, %v4592_v0  ;;  %v8817_v0 = vld [vmem:[#allocation96_spill] sm:$0xff]  ;;  %v8819_v53 = vld [vmem:[#allocation98_spill] sm:$0xff]  ;;  %v8820_v15 = vld [vmem:[#allocation99_spill] sm:$0xff] }
 0x4b8   :  { %v2160_v18 = vmul.f32 %v4596_v14, %v8779_v57  ;;  %4599 = vtanh.f32 %v6748_v56  ;;  %v8822_v14 = vld [vmem:[#allocation101_spill] sm:$0xff]  ;;  %v8824_v3 = vld [vmem:[#allocation103_spill] sm:$0xff]  ;;  %v8825_v2 = vld [vmem:[#allocation104_spill] sm:$0xff] }
 0x4b9   :  { %4601 = vrcp.f32 %v2154_v6  ;;  %v8823_v6 = vld [vmem:[#allocation102_spill] sm:$0xff] }
 0x4ba   :  { %v6755_v26 = vadd.f32 %v2162_v31, %v2160_v18  ;;  %2347 = vmatpush2.bf16.msra.mxu1 %v8780_v32  ;;  %2390 = vmatpush2.bf16.msra.mxu0 %v8781_v11  ;;  %v8826_v31 = vld [vmem:[#allocation105_spill] sm:$0xff]  ;;  %v8827_v57 = vld [vmem:[#allocation106_spill] sm:$0xff]  ;;  %v8828_v18 = vld [vmem:[#allocation107_spill] sm:$0xff] }
 0x4bb   :  { %2348 = vmatprep.subr.bf16.mxu1 %v8782_v61  ;;  %2391 = vmatprep.subr.bf16.mxu0 %v8783_v7  ;;  %v8829_v32 = vld [vmem:[#allocation108_spill] sm:$0xff]  ;;  %v8830_v11 = vld [vmem:[#allocation109_spill] sm:$0xff] }
 0x4bc   :  { %4603 = vtanh.f32 %v6755_v26  ;;  %v8831_v61 = vld [vmem:[#allocation116_spill] sm:$0xff]  ;;  %v8832_v7 = vld [vmem:[#allocation117_spill] sm:$0xff] }
 0x4be   :  { %2349 = vmatpush2.bf16.msra.mxu1 %v8784_v19  ;;  %2392 = vmatpush2.bf16.msra.mxu0 %v8785_v23  ;;  %v8833_v23 = vld [vmem:[#allocation12_spill] sm:$0xff] }
 0x4bf   :  { %2350 = vmatprep.subr.bf16.mxu1 %v8786_v27  ;;  %2393 = vmatprep.subr.bf16.mxu0 %v8787_v58 }
 0x4c2   :  { %2351 = vmatpush2.bf16.msra.mxu1 %v8788_v52  ;;  %2394 = vmatpush2.bf16.msra.mxu0 %v8789_v35  ;;  %v4598_v29 = vpop.eup %4597 }
 0x4c3   :  { %2352 = vmatprep.subr.bf16.mxu1 %v8790_v60  ;;  %2395 = vmatprep.subr.bf16.mxu0 %v8791_v12  ;;  %v8834_v60 = vld [vmem:[#allocation14_spill] sm:$0xff] }
 0x4c5   :  { %v4600_v13 = vpop.eup %4599 }
 0x4c6   :  { %2353 = vmatpush2.bf16.msra.mxu1 %v8792_v48  ;;  %2396 = vmatpush2.bf16.msra.mxu0 %v8793_v37  ;;  %v4602_v44 = vpop.eup %4601  ;;  %v2167_v5 = vmul.f32 %v4600_v13, %v4598_v29  ;;  %v8835_v13 = vld [vmem:[#allocation16_spill] sm:$0xff] }
 0x4c7   :  { %2354 = vmatprep.subr.bf16.mxu1 %v8794_v40  ;;  %2397 = vmatprep.subr.bf16.mxu0 %v8795_v42 }
 0x4c9   :  { %v4604_v47 = vpop.eup %4603 }
 0x4ca   :  { %2355 = vmatpush2.bf16.msra.mxu1 %v8796_v45  ;;  %2398 = vmatpush2.bf16.msra.mxu0 %v8797_v51  ;;  %v2168_v21 = vmul.f32 %v4604_v47, %v4602_v44  ;;  %v8836_v47 = vld [vmem:[#allocation18_spill] sm:$0xff] }
 0x4cb   :  { %2470 = vmatprep.subr.bf16.mxu1 %v8798_v20  ;;  %2513 = vmatprep.subr.bf16.mxu0 %v8799_v50 }
 0x4cc   :  { %v2323_v28 = vpack.c.bf16 %v2168_v21, %v2167_v5  ;;  %v8837_v21 = vld [vmem:[#allocation15_spill] sm:$0xff] }
 0x4ce   :  { %2356 = vmatprep.mubr.bf16.mxu1 %v2323_v28  ;;  %2399 = vmatprep.mubr.bf16.mxu0 %v2323_v28  ;;  %v8838_v28 = vld [vmem:[#allocation13_spill] sm:$0xff] }
 0x4cf   :  { %2357 = vmatmul.mubr.bf16.vlgmr.msra.gmra.mxu1 %v6695_v33  ;;  %2400 = vmatmul.mubr.bf16.vlgmr.msra.gmra.mxu0 %v6695_v33  ;;  %v8809_v33 = vld [vmem:[#allocation88_spill] sm:$0xff] }
 0x4d0   :  { %2471 = vmatpush1.bf16.msra.mxu1 %v8800_v38  ;;  %2514 = vmatpush1.bf16.msra.mxu0 %v8801_v59 }
 0x4d1   :  { %2472 = vmatprep.subr.bf16.mxu1 %v8802_v43  ;;  %2515 = vmatprep.subr.bf16.mxu0 %v8803_v36  ;;  %v8839_v43 = vld [vmem:[#allocation19_spill] sm:$0xff] }
 0x4d2   :  { %2502 = vmatprep.mubr.bf16.mxu1 %v8804_v17  ;;  %2545 = vmatprep.mubr.bf16.mxu0 %v8804_v17 }
 0x4d4   :  { %2473 = vmatpush1.bf16.msra.mxu1 %v8805_v25  ;;  %2516 = vmatpush1.bf16.msra.mxu0 %v8806_v49  ;;  %v8840_v49 = vld [vmem:[#allocation17_spill] sm:$0xff] }
 0x4d5   :  { %2474 = vmatprep.subr.bf16.mxu1 %v8807_v4  ;;  %2517 = vmatprep.subr.bf16.mxu0 %v8808_v1 }
 0x4d8   :  { %2475 = vmatpush1.bf16.msra.mxu1 %v8809_v33  ;;  %2518 = vmatpush1.bf16.msra.mxu0 %v8810_v9 }
 0x4d9   :  { %2476 = vmatprep.subr.bf16.mxu1 %v8811_v34  ;;  %2519 = vmatprep.subr.bf16.mxu0 %v8812_v24 }
 0x4dc   :  { %2477 = vmatpush1.bf16.msra.mxu1 %v8813_v16  ;;  %2520 = vmatpush1.bf16.msra.mxu0 %v8814_v8 }
 0x4dd   :  { %2478 = vmatprep.subr.bf16.mxu1 %v8815_v46  ;;  %2521 = vmatprep.subr.bf16.mxu0 %v8816_v63 }
 0x4e0   :  { %2479 = vmatpush1.bf16.msra.mxu1 %v8817_v0  ;;  %2522 = vmatpush1.bf16.msra.mxu0 %v8818_v41 }
 0x4e1   :  { %2480 = vmatprep.subr.bf16.mxu1 %v8819_v53  ;;  %2523 = vmatprep.subr.bf16.mxu0 %v8820_v15 }
 0x4e4   :  { %2481 = vmatpush1.bf16.msra.mxu1 %v8821_v39  ;;  %2524 = vmatpush1.bf16.msra.mxu0 %v8822_v14 }
 0x4e5   :  { %2482 = vmatprep.subr.bf16.mxu1 %v8823_v6  ;;  %2525 = vmatprep.subr.bf16.mxu0 %v8824_v3 }
 0x4e8   :  { %2483 = vmatpush1.bf16.msra.mxu1 %v8825_v2  ;;  %2526 = vmatpush1.bf16.msra.mxu0 %v8826_v31 }
 0x4e9   :  { %2484 = vmatprep.subr.bf16.mxu1 %v8827_v57  ;;  %2527 = vmatprep.subr.bf16.mxu0 %v8828_v18 }
 0x4ec   :  { %2485 = vmatpush1.bf16.msra.mxu1 %v8829_v32  ;;  %2528 = vmatpush1.bf16.msra.mxu0 %v8830_v11 }
 0x4ed   :  { %2613 = vmatprep.subr.bf16.mxu1 %v8831_v61  ;;  %2656 = vmatprep.subr.bf16.mxu0 %v8832_v7 }
 0x54d   :  { %v2215_v19 = vpop.f32.mrf.mxu1  ;;  %v2258_v58 = vpop.f32.mrf.mxu0 }
 0x54e   :  { %v2267_v27 = vadd.f32 %v2215_v19, %v8833_v23  ;;  %v2269_v38 = vadd.f32 %v2258_v58, %v8838_v28 }
 0x54f   :  { %v2217_v52 = vpop.f32.mrf.mxu1  ;;  %v2260_v37 = vpop.f32.mrf.mxu0 }
 0x550   :  { %v4082_v35 = vmul.f32 -1.442695, %v2267_v27  ;;  %v2268_v12 = vadd.f32 %v2217_v52, %v8834_v60  ;;  %v2270_v20 = vadd.f32 %v2260_v37, %v8837_v21  ;;  %v6882_v21 = vld [vmem:[%s8303_s5 + $0xac] ss:$16 sps:$4 sm:$0xff]  }
 0x551   :  { %v2219_v29 = vpop.f32.mrf.mxu1  ;;  %v2262_v51 = vpop.f32.mrf.mxu0 }
 0x552   :  { %4605 = vpow2.f32 %v4082_v35  ;;  %v4084_v48 = vmul.f32 -1.442695, %v2268_v12  ;;  %v2271_v40 = vadd.f32 %v2219_v29, %v8835_v13  ;;  %v4086_v59 = vmul.f32 -1.442695, %v2270_v20  ;;  %v6844_v12 = vld [vmem:[%s8303_s5 + $0xe8] ss:$16 sps:$4 sm:$0xff]  }
 0x553   :  { %v2221_v42 = vpop.f32.mrf.mxu1  ;;  %v2264_v50 = vpop.f32.mrf.mxu0  ;;  %v2273_v4 = vadd.f32 %v2262_v51, %v8840_v49  ;;  %v6850_v29 = vld [vmem:[%s8303_s5 + $0xc4] ss:$16 sps:$4 sm:$0xff]  }
 0x554   :  { %4607 = vpow2.f32 %v4084_v48  ;;  %v4083_v44 = vmul.f32 -1.442695, %v2271_v40  ;;  %v2272_v45 = vadd.f32 %v2221_v42, %v8836_v47  ;;  %v2274_v36 = vadd.f32 %v2264_v50, %v8839_v43  ;;  %v6856_v48 = vld [vmem:[%s8303_s5 + $0xcc] ss:$16 sps:$4 sm:$0xff]   ;;  %v6869_v47 = vld [vmem:[%s8303_s5 + $0xc8] ss:$16 sps:$4 sm:$0xff]  }
 0x555   :  { %v6889_v43 = vld [vmem:[%s8303_s5 + $0xa0] ss:$16 sps:$4 sm:$0xff]  }
 0x556   :  { %4609 = vpow2.f32 %v4083_v44  ;;  %v4085_v5 = vmul.f32 -1.442695, %v2272_v45  ;;  %v4087_v9 = vmul.f32 -1.442695, %v2274_v36  ;;  %v6863_v44 = vld [vmem:[%s8303_s5 + $0xc0] ss:$16 sps:$4 sm:$0xff]  }
 0x557   :  { %v6895_v36 = vld [vmem:[%s8303_s5 + $0xa8] ss:$16 sps:$4 sm:$0xff]  }
 0x558   :  { %4611 = vpow2.f32 %v4085_v5  ;;  %v6876_v5 = vld [vmem:[%s8303_s5 + $0xa4] ss:$16 sps:$4 sm:$0xff]  }
 0x559   :  { %4613 = vtanh.f32 %v2269_v38 }
 0x55a   :  { %4615 = vpow2.f32 %v4086_v59 }
 0x55f   :  { %v4606_v25 = vpop.eup %4605 }
 0x560   :  { %v2281_v1 = vadd.f32 1.0, %v4606_v25 }
 0x561   :  { %v4608_v33 = vpop.eup %4607 }
 0x562   :  { %4617 = vrcp.f32 %v2281_v1  ;;  %v2293_v34 = vadd.f32 1.0, %v4608_v33  ;;  %v6908_v1 = vld [vmem:[%s8303_s5 + $0x8c] ss:$16 sps:$4 sm:$0xff]  }
 0x563   :  { %v4610_v24 = vpop.eup %4609  ;;  %4619 = vtanh.f32 %v2273_v4  ;;  %v6902_v4 = vld [vmem:[%s8303_s5 + $0x84] ss:$16 sps:$4 sm:$0xff]  }
 0x564   :  { %4621 = vrcp.f32 %v2293_v34  ;;  %v2282_v16 = vadd.f32 1.0, %v4610_v24  ;;  %v6914_v34 = vld [vmem:[%s8303_s5 + $0x80] ss:$16 sps:$4 sm:$0xff]   ;;  %v6920_v24 = vld [vmem:[%s8303_s5 + $0x88] ss:$16 sps:$4 sm:$0xff]  }
 0x565   :  { %v4612_v8 = vpop.eup %4611  ;;  %4623 = vpow2.f32 %v4087_v9 }
 0x566   :  { %4625 = vrcp.f32 %v2282_v16  ;;  %v2294_v46 = vadd.f32 1.0, %v4612_v8  ;;  %v4614_v63 = vpop.eup %4613  ;;  %v6926_v16 = vld [vmem:[%s8303_s5 + $0x64] ss:$16 sps:$4 sm:$0xff]   ;;  %v6932_v8 = vld [vmem:[%s8303_s5 + $0x6c] ss:$16 sps:$4 sm:$0xff]  }
 0x567   :  { %v4616_v0 = vpop.eup %4615 }
 0x568   :  { %4627 = vrcp.f32 %v2294_v46  ;;  %v2307_v2 = vadd.f32 1.0, %v4616_v0  ;;  %v6939_v0 = vld [vmem:[%s8303_s5 + $0x60] ss:$16 sps:$4 sm:$0xff]  }
 0x56a   :  { %4629 = vrcp.f32 %v2307_v2  ;;  %v6965_v2 = vld [vmem:[%s8303_s5 + $0x40] ss:$16 sps:$4 sm:$0xff]  }
 0x56f   :  { %v4618_v41 = vpop.eup %4617 }
 0x570   :  { %v4620_v53 = vpop.eup %4619  ;;  %v2315_v15 = vmul.f32 %v4618_v41, %v4614_v63  ;;  %v6945_v41 = vld [vmem:[%s8303_s5 + $0x68] ss:$16 sps:$4 sm:$0xff]  }
 0x571   :  { %v4622_v39 = vpop.eup %4621 }
 0x572   :  { %v4624_v14 = vpop.eup %4623  ;;  %v2313_v6 = vmul.f32 %v4622_v39, %v6688_v55 }
 0x573   :  { %v4626_v3 = vpop.eup %4625  ;;  %v2308_v32 = vadd.f32 1.0, %v4624_v14 }
 0x574   :  { %v6824_v31 = vadd.f32 %v2315_v15, %v2313_v6  ;;  %v2316_v57 = vmul.f32 %v4626_v3, %v4620_v53  ;;  %v6951_v53 = vld [vmem:[%s8303_s5 + $0x44] ss:$16 sps:$4 sm:$0xff]   ;;  %v6957_v15 = vld [vmem:[%s8303_s5 + $0x4c] ss:$16 sps:$4 sm:$0xff]  }
 0x575   :  { %v4628_v18 = vpop.eup %4627 }
 0x576   :  { %v2314_v11 = vmul.f32 %v4628_v18, %v6691_v62  ;;  %4631 = vtanh.f32 %v6824_v31  ;;  %v6838_v62 = vld [vmem:[%s8303_s5 + $0xe0] ss:$16 sps:$4 sm:$0xff]  }
 0x577   :  { %4633 = vrcp.f32 %v2308_v32  ;;  %v4630_v23 = vpop.eup %4629  ;;  %v6977_v32 = vld [vmem:[%s8303_s5 + $0x24] ss:$16 sps:$4 sm:$0xff]  }
 0x578   :  { %v6827_v19 = vadd.f32 %v2316_v57, %v2314_v11  ;;  %v6971_v57 = vld [vmem:[%s8303_s5 + $0x48] ss:$16 sps:$4 sm:$0xff]   ;;  %v6983_v11 = vld [vmem:[%s8303_s5 + $0x2c] ss:$16 sps:$4 sm:$0xff]  }
 0x57a   :  { %4635 = vtanh.f32 %v6827_v19 }
 0x583   :  { %v4632_v27 = vpop.eup %4631 }
 0x584   :  { %v4634_v55 = vpop.eup %4633  ;;  %v2321_v52 = vmul.f32 %v4632_v27, %v4630_v23 }
 0x587   :  { %v4636_v58 = vpop.eup %4635 }
 0x588   :  { %v2322_v35 = vmul.f32 %v4636_v58, %v4634_v55 }
 0x58a   :  { %v6831_v60 = vpack.c.bf16 %v2322_v35, %v2321_v52  ;;  %v6990_v35 = vld [vmem:[%s8303_s5 + $0x20] ss:$16 sps:$4 sm:$0xff]  }
 0x58c   :  { %2503 = vmatmul.mubr.bf16.vlgmr.msra.gmra.mxu1 %v6831_v60  ;;  %2546 = vmatmul.mubr.bf16.vlgmr.msra.gmra.mxu0 %v6831_v60 }
 0x58d   :  { %2614 = vmatpush1.bf16.msra.mxu1 %v6838_v62  ;;  %2657 = vmatpush1.bf16.msra.mxu0 %v6844_v12 }
 0x58e   :  { %2615 = vmatprep.subr.bf16.mxu1 %v6850_v29  ;;  %2658 = vmatprep.subr.bf16.mxu0 %v6856_v48 }
 0x58f   :  { %v2358_v37 = vpop.f32.mrf.mxu1  ;;  %v2401_v40 = vpop.f32.mrf.mxu0 }
 0x590   :  { %v2359_v13 = vadd.f32 %v2358_v37, %v6531_v54  ;;  %v2402_v39 = vadd.f32 %v2401_v40, %v6563_v10  ;;  %v6996_v37 = vld [vmem:[%s8303_s5 + $0x28] ss:$16 sps:$4 sm:$0xff]   ;;  %v7002_v40 = vld [vmem:[%s8303_s5 + $0x4] ss:$16 sps:$4 sm:$0xff]  }
 0x591   :  { %v2360_v42 = vpop.f32.mrf.mxu1  ;;  %2616 = vmatpush1.bf16.msra.mxu1 %v6863_v44  ;;  %2659 = vmatpush1.bf16.msra.mxu0 %v6869_v47  ;;  %v2403_v28 = vpop.f32.mrf.mxu0 }
 0x592   :  { %v4088_v45 = vmul.f32 -1.442695, %v2359_v13  ;;  %v2361_v51 = vadd.f32 %v2360_v42, %v6539_v30  ;;  %2617 = vmatprep.subr.bf16.mxu1 %v6876_v5  ;;  %2660 = vmatprep.subr.bf16.mxu0 %v6882_v21  ;;  %v2404_v63 = vadd.f32 %v2403_v28, %v6559_v22  ;;  %v7008_v42 = vld [vmem:[%s8303_s5 + $0xc] ss:$16 sps:$4 sm:$0xff]   ;;  %v7026_v28 = vld [vmem:[%s8303_s5 + $0x1e4] ss:$16 sps:$4 sm:$0xff]  }
 0x593   :  { %v2362_v20 = vpop.f32.mrf.mxu1  ;;  %v2405_v33 = vpop.f32.mrf.mxu0 }
 0x594   :  { %4637 = vpow2.f32 %v4088_v45  ;;  %v4090_v50 = vmul.f32 -1.442695, %v2361_v51  ;;  %v2363_v38 = vadd.f32 %v2362_v20, %v6531_v54  ;;  %v4092_v3 = vmul.f32 -1.442695, %v2404_v63  ;;  %v7014_v20 = vld [vmem:[%s8303_s5] ss:$16 sps:$4 sm:$0xff]  }
 0x595   :  { %v2364_v59 = vpop.f32.mrf.mxu1  ;;  %2618 = vmatpush1.bf16.msra.mxu1 %v6889_v43  ;;  %2661 = vmatpush1.bf16.msra.mxu0 %v6895_v36  ;;  %v2407_v46 = vpop.f32.mrf.mxu0  ;;  %v2406_v52 = vadd.f32 %v2405_v33, %v6563_v10  ;;  %v7056_v33 = vld [vmem:[%s8303_s5 + $0x1cc] ss:$16 sps:$4 sm:$0xff]   ;;  %v7062_v63 = vld [vmem:[%s8303_s5 + $0x1c0] ss:$16 sps:$4 sm:$0xff]  }
 0x596   :  { %4639 = vpow2.f32 %v4090_v50  ;;  %v4089_v25 = vmul.f32 -1.442695, %v2363_v38  ;;  %v2365_v49 = vadd.f32 %v2364_v59, %v6539_v30  ;;  %2619 = vmatprep.subr.bf16.mxu1 %v6902_v4  ;;  %2662 = vmatprep.subr.bf16.mxu0 %v6908_v1  ;;  %v2408_v14 = vadd.f32 %v2407_v46, %v6559_v22  ;;  %v7020_v50 = vld [vmem:[%s8303_s5 + $0x8] ss:$16 sps:$4 sm:$0xff]   ;;  %v7032_v38 = vld [vmem:[%s8303_s5 + $0x1ec] ss:$16 sps:$4 sm:$0xff]  }
 0x597   :  { %v7038_v59 = vld [vmem:[%s8303_s5 + $0x1e0] ss:$16 sps:$4 sm:$0xff]   ;;  %8841 = vst [vmem:[#allocation4_spill] sm:$0xff] %v7062_v63 }
 0x598   :  { %4641 = vpow2.f32 %v4089_v25  ;;  %v4091_v9 = vmul.f32 -1.442695, %v2365_v49  ;;  %v4093_v27 = vmul.f32 -1.442695, %v2408_v14  ;;  %v7044_v25 = vld [vmem:[%s8303_s5 + $0x1e8] ss:$16 sps:$4 sm:$0xff]  }
 0x599   :  { %2620 = vmatpush1.bf16.msra.mxu1 %v6914_v34  ;;  %2663 = vmatpush1.bf16.msra.mxu0 %v6920_v24  ;;  %v7050_v49 = vld [vmem:[%s8303_s5 + $0x1c4] ss:$16 sps:$4 sm:$0xff]  }
 0x59a   :  { %4643 = vpow2.f32 %v4091_v9  ;;  %2621 = vmatprep.subr.bf16.mxu1 %v6926_v16  ;;  %2664 = vmatprep.subr.bf16.mxu0 %v6932_v8 }
 0x59b   :  { %4645 = vtanh.f32 %v2402_v39  ;;  %v7068_v39 = vld [vmem:[%s8303_s5 + $0x1c8] ss:$16 sps:$4 sm:$0xff]  }
 0x59c   :  { %8842 = vst [vmem:[#allocation6_spill] sm:$0xff] %v7068_v39 }
 0x59d   :  { %2622 = vmatpush1.bf16.msra.mxu1 %v6939_v0  ;;  %2665 = vmatpush1.bf16.msra.mxu0 %v6945_v41 }
 0x59e   :  { %2623 = vmatprep.subr.bf16.mxu1 %v6951_v53  ;;  %2666 = vmatprep.subr.bf16.mxu0 %v6957_v15 }
 0x5a1   :  { %v4638_v6 = vpop.eup %4637  ;;  %2624 = vmatpush1.bf16.msra.mxu1 %v6965_v2  ;;  %2667 = vmatpush1.bf16.msra.mxu0 %v6971_v57 }
 0x5a2   :  { %v2416_v18 = vadd.f32 1.0, %v4638_v6  ;;  %2625 = vmatprep.subr.bf16.mxu1 %v6977_v32  ;;  %2668 = vmatprep.subr.bf16.mxu0 %v6983_v11  ;;  %v7074_v6 = vld [vmem:[%s8303_s5 + $0x1a4] ss:$16 sps:$4 sm:$0xff]  }
 0x5a3   :  { %v4640_v23 = vpop.eup %4639  ;;  %8843 = vst [vmem:[#allocation8_spill] sm:$0xff] %v7074_v6 }
 0x5a4   :  { %4647 = vrcp.f32 %v2416_v18  ;;  %v2428_v55 = vadd.f32 1.0, %v4640_v23 }
 0x5a5   :  { %v4642_v58 = vpop.eup %4641  ;;  %4649 = vpow2.f32 %v4092_v3  ;;  %2626 = vmatpush1.bf16.msra.mxu1 %v6990_v35  ;;  %2669 = vmatpush1.bf16.msra.mxu0 %v6996_v37  ;;  %v7080_v3 = vld [vmem:[%s8303_s5 + $0x1ac] ss:$16 sps:$4 sm:$0xff]  }
 0x5a6   :  { %4651 = vrcp.f32 %v2428_v55  ;;  %v2417_v13 = vadd.f32 1.0, %v4642_v58  ;;  %2627 = vmatprep.subr.bf16.mxu1 %v7002_v40  ;;  %2670 = vmatprep.subr.bf16.mxu0 %v7008_v42  ;;  %8844 = vst [vmem:[#allocation10_spill] sm:$0xff] %v7080_v3 }
 0x5a7   :  { %v4644_v45 = vpop.eup %4643  ;;  %4653 = vpow2.f32 %v4093_v27 }
 0x5a8   :  { %4655 = vrcp.f32 %v2417_v13  ;;  %v2429_v51 = vadd.f32 1.0, %v4644_v45  ;;  %v4646_v9 = vpop.eup %4645  ;;  %v7087_v13 = vld [vmem:[%s8303_s5 + $0x1a0] ss:$16 sps:$4 sm:$0xff]   ;;  %v7093_v45 = vld [vmem:[%s8303_s5 + $0x1a8] ss:$16 sps:$4 sm:$0xff]  }
 0x5a9   :  { %4657 = vtanh.f32 %v2406_v52  ;;  %2628 = vmatpush1.bf16.msra.mxu1 %v7014_v20  ;;  %2671 = vmatpush1.bf16.msra.mxu0 %v7020_v50  ;;  %8845 = vst [vmem:[#allocation7_spill] sm:$0xff] %v7087_v13  ;;  %8846 = vst [vmem:[#allocation5_spill] sm:$0xff] %v7093_v45 }
 0x5aa   :  { %4659 = vrcp.f32 %v2429_v51  ;;  %2629 = vmatprep.subr.bf16.mxu1 %v7026_v28  ;;  %2672 = vmatprep.subr.bf16.mxu0 %v7032_v38 }
 0x5ad   :  { %2630 = vmatpush2.bf16.msra.mxu1 %v7038_v59  ;;  %2673 = vmatpush2.bf16.msra.mxu0 %v7044_v25 }
 0x5ae   :  { %2631 = vmatprep.subr.bf16.mxu1 %v7050_v49  ;;  %2674 = vmatprep.subr.bf16.mxu0 %v7056_v33 }
 0x5b1   :  { %v4648_v46 = vpop.eup %4647  ;;  %2632 = vmatpush2.bf16.msra.mxu1 %v7062_v63  ;;  %2675 = vmatpush2.bf16.msra.mxu0 %v7068_v39  ;;  %v8908_v63 = vld [vmem:[#allocation25_spill] sm:$0xff] }
 0x5b2   :  { %v4650_v14 = vpop.eup %4649  ;;  %2633 = vmatprep.subr.bf16.mxu1 %v7074_v6  ;;  %2676 = vmatprep.subr.bf16.mxu0 %v7080_v3  ;;  %v2450_v27 = vmul.f32 %v4648_v46, %v4646_v9  ;;  %v7107_v46 = vld [vmem:[%s8303_s5 + $0x18c] ss:$16 sps:$4 sm:$0xff]  }
 0x5b3   :  { %v4652_v18 = vpop.eup %4651  ;;  %v2442_v52 = vadd.f32 1.0, %v4650_v14  ;;  %8849 = vst [vmem:[#allocation52_spill] sm:$0xff] %v7107_v46  ;;  %v8906_v6 = vld [vmem:[#allocation21_spill] sm:$0xff] }
 0x5b4   :  { %v4654_v23 = vpop.eup %4653  ;;  %v2448_v55 = vmul.f32 %v4652_v18, %v6748_v56  ;;  %v7101_v56 = vld [vmem:[%s8303_s5 + $0x184] ss:$16 sps:$4 sm:$0xff]  }
 0x5b5   :  { %v4656_v58 = vpop.eup %4655  ;;  %2634 = vmatpush2.bf16.msra.mxu1 %v7087_v13  ;;  %2677 = vmatpush2.bf16.msra.mxu0 %v7093_v45  ;;  %8848 = vst [vmem:[#allocation9_spill] sm:$0xff] %v7101_v56  ;;  %v2443_v18 = vadd.f32 1.0, %v4654_v23  ;;  %4661 = vrcp.f32 %v2442_v52  ;;  %v7134_v23 = vld [vmem:[%s8303_s5 + $0x16c] ss:$16 sps:$4 sm:$0xff]   ;;  %v7148_v52 = vld [vmem:[%s8303_s5 + $0x168] ss:$16 sps:$4 sm:$0xff]  }
 0x5b6   :  { %v4658_v51 = vpop.eup %4657  ;;  %v7096_v9 = vadd.f32 %v2450_v27, %v2448_v55  ;;  %2635 = vmatprep.subr.bf16.mxu1 %v7101_v56  ;;  %2678 = vmatprep.subr.bf16.mxu0 %v7107_v46  ;;  %v7114_v55 = vld [vmem:[%s8303_s5 + $0x180] ss:$16 sps:$4 sm:$0xff]   ;;  %v7120_v56 = vld [vmem:[%s8303_s5 + $0x188] ss:$16 sps:$4 sm:$0xff]   ;;  %8854 = vst [vmem:[#allocation56_spill] sm:$0xff] %v7134_v23  ;;  %8856 = vst [vmem:[#allocation58_spill] sm:$0xff] %v7148_v52 }
 0x5b7   :  { %v4660_v14 = vpop.eup %4659  ;;  %v2451_v45 = vmul.f32 %v4658_v51, %v4656_v58  ;;  %8850 = vst [vmem:[#allocation53_spill] sm:$0xff] %v7114_v55  ;;  %8851 = vst [vmem:[#allocation54_spill] sm:$0xff] %v7120_v56  ;;  %v7142_v58 = vld [vmem:[%s8303_s5 + $0x160] ss:$16 sps:$4 sm:$0xff]   ;;  %v7160_v51 = vld [vmem:[%s8303_s5 + $0x14c] ss:$16 sps:$4 sm:$0xff]  }
 0x5b8   :  { %8847 = vst [vmem:[#allocation11_spill] sm:$0xff] %v7096_v9  ;;  %v2449_v27 = vmul.f32 %v4660_v14, %v6755_v26  ;;  %v7128_v26 = vld [vmem:[%s8303_s5 + $0x164] ss:$16 sps:$4 sm:$0xff]   ;;  %4663 = vtanh.f32 %v7096_v9  ;;  %8855 = vst [vmem:[#allocation57_spill] sm:$0xff] %v7142_v58  ;;  %v7166_v14 = vld [vmem:[%s8303_s5 + $0x140] ss:$16 sps:$4 sm:$0xff]  }
 0x5b9   :  { %2636 = vmatpush2.bf16.msra.mxu1 %v7114_v55  ;;  %2679 = vmatpush2.bf16.msra.mxu0 %v7120_v56  ;;  %8853 = vst [vmem:[#allocation114_spill] sm:$0xff] %v7128_v26  ;;  %4665 = vrcp.f32 %v2443_v18  ;;  %8858 = vst [vmem:[#allocation115_spill] sm:$0xff] %v7160_v51  ;;  %v7172_v18 = vld [vmem:[%s8303_s5 + $0x148] ss:$16 sps:$4 sm:$0xff]  }
 0x5ba   :  { %v7123_v46 = vadd.f32 %v2451_v45, %v2449_v27  ;;  %2637 = vmatprep.subr.bf16.mxu1 %v7128_v26  ;;  %2680 = vmatprep.subr.bf16.mxu0 %v7134_v23  ;;  %v7154_v45 = vld [vmem:[%s8303_s5 + $0x144] ss:$16 sps:$4 sm:$0xff]   ;;  %8859 = vst [vmem:[#allocation60_spill] sm:$0xff] %v7166_v14  ;;  %8860 = vst [vmem:[#allocation61_spill] sm:$0xff] %v7172_v18 }
 0x5bb   :  { %8857 = vst [vmem:[#allocation59_spill] sm:$0xff] %v7154_v45  ;;  %v7178_v27 = vld [vmem:[%s8303_s5 + $0x124] ss:$16 sps:$4 sm:$0xff]  }
 0x5bc   :  { %8852 = vst [vmem:[#allocation55_spill] sm:$0xff] %v7123_v46  ;;  %4667 = vtanh.f32 %v7123_v46  ;;  %8861 = vst [vmem:[#allocation62_spill] sm:$0xff] %v7178_v27  ;;  %v8903_v55 = vld [vmem:[#allocation24_spill] sm:$0xff] }
 0x5bd   :  { %2638 = vmatpush2.bf16.msra.mxu1 %v7142_v58  ;;  %2681 = vmatpush2.bf16.msra.mxu0 %v7148_v52 }
 0x5be   :  { %2639 = vmatprep.subr.bf16.mxu1 %v7154_v45  ;;  %2682 = vmatprep.subr.bf16.mxu0 %v7160_v51  ;;  %v7184_v51 = vld [vmem:[%s8303_s5 + $0x12c] ss:$16 sps:$4 sm:$0xff]   ;;  %v7202_v45 = vld [vmem:[%s8303_s5 + $0x104] ss:$16 sps:$4 sm:$0xff]  }
 0x5bf   :  { %8862 = vst [vmem:[#allocation63_spill] sm:$0xff] %v7184_v51  ;;  %8865 = vst [vmem:[#allocation66_spill] sm:$0xff] %v7202_v45 }
 0x5c1   :  { %2640 = vmatpush2.bf16.msra.mxu1 %v7166_v14  ;;  %2683 = vmatpush2.bf16.msra.mxu0 %v7172_v18  ;;  %v7190_v14 = vld [vmem:[%s8303_s5 + $0x120] ss:$16 sps:$4 sm:$0xff]   ;;  %v7196_v18 = vld [vmem:[%s8303_s5 + $0x128] ss:$16 sps:$4 sm:$0xff]  }
 0x5c2   :  { %2641 = vmatprep.subr.bf16.mxu1 %v7178_v27  ;;  %2684 = vmatprep.subr.bf16.mxu0 %v7184_v51  ;;  %8863 = vst [vmem:[#allocation64_spill] sm:$0xff] %v7190_v14  ;;  %8864 = vst [vmem:[#allocation65_spill] sm:$0xff] %v7196_v18  ;;  %v4662_v27 = vpop.eup %4661  ;;  %v7208_v51 = vld [vmem:[%s8303_s5 + $0x10c] ss:$16 sps:$4 sm:$0xff]  }
 0x5c3   :  { %8866 = vst [vmem:[#allocation67_spill] sm:$0xff] %v7208_v51 }
 0x5c5   :  { %2642 = vmatpush2.bf16.msra.mxu1 %v7190_v14  ;;  %2685 = vmatpush2.bf16.msra.mxu0 %v7196_v18  ;;  %v4664_v14 = vpop.eup %4663  ;;  %v7214_v18 = vld [vmem:[%s8303_s5 + $0x100] ss:$16 sps:$4 sm:$0xff]  }
 0x5c6   :  { %2643 = vmatprep.subr.bf16.mxu1 %v7202_v45  ;;  %2686 = vmatprep.subr.bf16.mxu0 %v7208_v51  ;;  %v4666_v52 = vpop.eup %4665  ;;  %8867 = vst [vmem:[#allocation68_spill] sm:$0xff] %v7214_v18  ;;  %v7220_v45 = vld [vmem:[%s8303_s5 + $0x108] ss:$16 sps:$4 sm:$0xff]   ;;  %v2456_v23 = vmul.f32 %v4664_v14, %v4662_v27  ;;  %v7226_v51 = vld [vmem:[%s8301_s3 + $0xe4] ss:$16 sps:$4 sm:$0xff]  }
 0x5c7   :  { %8868 = vst [vmem:[#allocation69_spill] sm:$0xff] %v7220_v45  ;;  %8869 = vst [vmem:[#allocation70_spill] sm:$0xff] %v7226_v51  ;;  %v7278_v14 = vld [vmem:[%s8301_s3 + $0xa4] ss:$16 sps:$4 sm:$0xff]   ;;  %v7284_v27 = vld [vmem:[%s8301_s3 + $0xac] ss:$16 sps:$4 sm:$0xff]  }
 0x5c8   :  { %8877 = vst [vmem:[#allocation78_spill] sm:$0xff] %v7278_v14  ;;  %8878 = vst [vmem:[#allocation79_spill] sm:$0xff] %v7284_v27 }
 0x5c9   :  { %v4668_v58 = vpop.eup %4667  ;;  %2644 = vmatpush2.bf16.msra.mxu1 %v7214_v18  ;;  %2687 = vmatpush2.bf16.msra.mxu0 %v7220_v45  ;;  %v7232_v18 = vld [vmem:[%s8301_s3 + $0xec] ss:$16 sps:$4 sm:$0xff]  }
 0x5ca   :  { %v2457_v26 = vmul.f32 %v4668_v58, %v4666_v52  ;;  %2759 = vmatprep.subr.bf16.mxu1 %v7226_v51  ;;  %8870 = vst [vmem:[#allocation71_spill] sm:$0xff] %v7232_v18  ;;  %2802 = vmatprep.subr.bf16.mxu0 %v7232_v18  ;;  %v7240_v58 = vld [vmem:[%s8301_s3 + $0xe0] ss:$16 sps:$4 sm:$0xff]   ;;  %v7246_v52 = vld [vmem:[%s8301_s3 + $0xe8] ss:$16 sps:$4 sm:$0xff]  }
 0x5cb   :  { %8871 = vst [vmem:[#allocation72_spill] sm:$0xff] %v7240_v58  ;;  %8872 = vst [vmem:[#allocation73_spill] sm:$0xff] %v7246_v52 }
 0x5cc   :  { %v2612_v56 = vpack.c.bf16 %v2457_v26, %v2456_v23  ;;  %v7266_v26 = vld [vmem:[%s8301_s3 + $0xc0] ss:$16 sps:$4 sm:$0xff]   ;;  %v7272_v23 = vld [vmem:[%s8301_s3 + $0xc8] ss:$16 sps:$4 sm:$0xff]  }
 0x5cd   :  { %8875 = vst [vmem:[#allocation76_spill] sm:$0xff] %v7266_v26  ;;  %8876 = vst [vmem:[#allocation77_spill] sm:$0xff] %v7272_v23 }
 0x5ce   :  { %2645 = vmatprep.mubr.bf16.mxu1 %v2612_v56  ;;  %2688 = vmatprep.mubr.bf16.mxu0 %v2612_v56  ;;  %v7252_v56 = vld [vmem:[%s8301_s3 + $0xc4] ss:$16 sps:$4 sm:$0xff]  }
 0x5cf   :  { %2646 = vmatmul.mubr.bf16.vlgmr.msra.gmra.mxu1 %v6831_v60  ;;  %2689 = vmatmul.mubr.bf16.vlgmr.msra.gmra.mxu0 %v6831_v60  ;;  %8873 = vst [vmem:[#allocation74_spill] sm:$0xff] %v7252_v56  ;;  %v7258_v60 = vld [vmem:[%s8301_s3 + $0xcc] ss:$16 sps:$4 sm:$0xff]  }
 0x5d0   :  { %2760 = vmatpush1.bf16.msra.mxu1 %v7240_v58  ;;  %2803 = vmatpush1.bf16.msra.mxu0 %v7246_v52  ;;  %8874 = vst [vmem:[#allocation75_spill] sm:$0xff] %v7258_v60  ;;  %v8902_v58 = vld [vmem:[#allocation22_spill] sm:$0xff] }
 0x5d1   :  { %2761 = vmatprep.subr.bf16.mxu1 %v7252_v56  ;;  %2804 = vmatprep.subr.bf16.mxu0 %v7258_v60 }
 0x5d2   :  { %2791 = vmatprep.mubr.bf16.mxu1 %v8804_v17  ;;  %2834 = vmatprep.mubr.bf16.mxu0 %v8804_v17 }
 0x5d4   :  { %2762 = vmatpush1.bf16.msra.mxu1 %v7266_v26  ;;  %2805 = vmatpush1.bf16.msra.mxu0 %v7272_v23  ;;  %v7290_v26 = vld [vmem:[%s8301_s3 + $0xa0] ss:$16 sps:$4 sm:$0xff]   ;;  %v7296_v23 = vld [vmem:[%s8301_s3 + $0xa8] ss:$16 sps:$4 sm:$0xff]  }
 0x5d5   :  { %2763 = vmatprep.subr.bf16.mxu1 %v7278_v14  ;;  %2806 = vmatprep.subr.bf16.mxu0 %v7284_v27  ;;  %8879 = vst [vmem:[#allocation80_spill] sm:$0xff] %v7290_v26  ;;  %8880 = vst [vmem:[#allocation81_spill] sm:$0xff] %v7296_v23  ;;  %v7302_v14 = vld [vmem:[%s8301_s3 + $0x84] ss:$16 sps:$4 sm:$0xff]   ;;  %v7308_v27 = vld [vmem:[%s8301_s3 + $0x8c] ss:$16 sps:$4 sm:$0xff]  }
 0x5d6   :  { %8881 = vst [vmem:[#allocation82_spill] sm:$0xff] %v7302_v14  ;;  %8882 = vst [vmem:[#allocation83_spill] sm:$0xff] %v7308_v27 }
 0x5d8   :  { %2764 = vmatpush1.bf16.msra.mxu1 %v7290_v26  ;;  %2807 = vmatpush1.bf16.msra.mxu0 %v7296_v23  ;;  %v7314_v26 = vld [vmem:[%s8301_s3 + $0x80] ss:$16 sps:$4 sm:$0xff]   ;;  %v7320_v23 = vld [vmem:[%s8301_s3 + $0x88] ss:$16 sps:$4 sm:$0xff]  }
 0x5d9   :  { %2765 = vmatprep.subr.bf16.mxu1 %v7302_v14  ;;  %2808 = vmatprep.subr.bf16.mxu0 %v7308_v27  ;;  %8883 = vst [vmem:[#allocation84_spill] sm:$0xff] %v7314_v26  ;;  %8884 = vst [vmem:[#allocation85_spill] sm:$0xff] %v7320_v23  ;;  %v7326_v14 = vld [vmem:[%s8301_s3 + $0x64] ss:$16 sps:$4 sm:$0xff]   ;;  %v7332_v27 = vld [vmem:[%s8301_s3 + $0x6c] ss:$16 sps:$4 sm:$0xff]  }
 0x5da   :  { %8885 = vst [vmem:[#allocation86_spill] sm:$0xff] %v7326_v14  ;;  %8886 = vst [vmem:[#allocation87_spill] sm:$0xff] %v7332_v27 }
 0x5dc   :  { %2766 = vmatpush1.bf16.msra.mxu1 %v7314_v26  ;;  %2809 = vmatpush1.bf16.msra.mxu0 %v7320_v23  ;;  %v7338_v26 = vld [vmem:[%s8301_s3 + $0x60] ss:$16 sps:$4 sm:$0xff]   ;;  %v7344_v23 = vld [vmem:[%s8301_s3 + $0x68] ss:$16 sps:$4 sm:$0xff]  }
 0x5dd   :  { %2767 = vmatprep.subr.bf16.mxu1 %v7326_v14  ;;  %2810 = vmatprep.subr.bf16.mxu0 %v7332_v27  ;;  %8887 = vst [vmem:[#allocation88_spill] sm:$0xff] %v7338_v26  ;;  %8888 = vst [vmem:[#allocation89_spill] sm:$0xff] %v7344_v23  ;;  %v7350_v14 = vld [vmem:[%s8301_s3 + $0x44] ss:$16 sps:$4 sm:$0xff]   ;;  %v7356_v27 = vld [vmem:[%s8301_s3 + $0x4c] ss:$16 sps:$4 sm:$0xff]  }
 0x5de   :  { %8889 = vst [vmem:[#allocation90_spill] sm:$0xff] %v7350_v14  ;;  %8890 = vst [vmem:[#allocation91_spill] sm:$0xff] %v7356_v27 }
 0x5e0   :  { %2768 = vmatpush1.bf16.msra.mxu1 %v7338_v26  ;;  %2811 = vmatpush1.bf16.msra.mxu0 %v7344_v23  ;;  %v7362_v26 = vld [vmem:[%s8301_s3 + $0x40] ss:$16 sps:$4 sm:$0xff]   ;;  %v7368_v23 = vld [vmem:[%s8301_s3 + $0x48] ss:$16 sps:$4 sm:$0xff]  }
 0x5e1   :  { %2769 = vmatprep.subr.bf16.mxu1 %v7350_v14  ;;  %2812 = vmatprep.subr.bf16.mxu0 %v7356_v27  ;;  %8891 = vst [vmem:[#allocation92_spill] sm:$0xff] %v7362_v26  ;;  %8892 = vst [vmem:[#allocation93_spill] sm:$0xff] %v7368_v23  ;;  %v7374_v14 = vld [vmem:[%s8301_s3 + $0x24] ss:$16 sps:$4 sm:$0xff]   ;;  %v7380_v27 = vld [vmem:[%s8301_s3 + $0x2c] ss:$16 sps:$4 sm:$0xff]  }
 0x5e2   :  { %8893 = vst [vmem:[#allocation94_spill] sm:$0xff] %v7374_v14  ;;  %8894 = vst [vmem:[#allocation95_spill] sm:$0xff] %v7380_v27 }
 0x5e4   :  { %2770 = vmatpush1.bf16.msra.mxu1 %v7362_v26  ;;  %2813 = vmatpush1.bf16.msra.mxu0 %v7368_v23  ;;  %v7386_v26 = vld [vmem:[%s8301_s3 + $0x20] ss:$16 sps:$4 sm:$0xff]   ;;  %v7392_v23 = vld [vmem:[%s8301_s3 + $0x28] ss:$16 sps:$4 sm:$0xff]  }
 0x5e5   :  { %2771 = vmatprep.subr.bf16.mxu1 %v7374_v14  ;;  %2814 = vmatprep.subr.bf16.mxu0 %v7380_v27  ;;  %8895 = vst [vmem:[#allocation96_spill] sm:$0xff] %v7386_v26  ;;  %8896 = vst [vmem:[#allocation97_spill] sm:$0xff] %v7392_v23  ;;  %v7398_v14 = vld [vmem:[%s8301_s3 + $0x4] ss:$16 sps:$4 sm:$0xff]   ;;  %v7404_v27 = vld [vmem:[%s8301_s3 + $0xc] ss:$16 sps:$4 sm:$0xff]  }
 0x5e6   :  { %8897 = vst [vmem:[#allocation98_spill] sm:$0xff] %v7398_v14  ;;  %8898 = vst [vmem:[#allocation99_spill] sm:$0xff] %v7404_v27 }
 0x5e8   :  { %2772 = vmatpush1.bf16.msra.mxu1 %v7386_v26  ;;  %2815 = vmatpush1.bf16.msra.mxu0 %v7392_v23  ;;  %v7410_v26 = vld [vmem:[%s8301_s3] ss:$16 sps:$4 sm:$0xff]   ;;  %v7416_v23 = vld [vmem:[%s8301_s3 + $0x8] ss:$16 sps:$4 sm:$0xff]  }
 0x5e9   :  { %2773 = vmatprep.subr.bf16.mxu1 %v7398_v14  ;;  %2816 = vmatprep.subr.bf16.mxu0 %v7404_v27  ;;  %8899 = vst [vmem:[#allocation100_spill] sm:$0xff] %v7410_v26  ;;  %8900 = vst [vmem:[#allocation101_spill] sm:$0xff] %v7416_v23  ;;  %v8901_v27 = vld [vmem:[#allocation20_spill] sm:$0xff] }
 0x5ec   :  { %2774 = vmatpush1.bf16.msra.mxu1 %v7410_v26  ;;  %2817 = vmatpush1.bf16.msra.mxu0 %v7416_v23 }
 0x5ed   :  { %2902 = vmatprep.subr.bf16.mxu1 %v8831_v61  ;;  %2945 = vmatprep.subr.bf16.mxu0 %v8832_v7  ;;  %v8904_v61 = vld [vmem:[#allocation26_spill] sm:$0xff] }
 0x64c   :  { %v2504_v14 = vpop.f32.mrf.mxu1  ;;  %v2547_v60 = vpop.f32.mrf.mxu0 }
 0x64d   :  { %v2556_v17 = vadd.f32 %v2504_v14, %v8901_v27  ;;  %v8905_v14 = vld [vmem:[#allocation23_spill] sm:$0xff] }
 0x64e   :  { %v2506_v56 = vpop.f32.mrf.mxu1  ;;  %v2549_v45 = vpop.f32.mrf.mxu0 }
 0x64f   :  { %v4094_v52 = vmul.f32 -1.442695, %v2556_v17  ;;  %v2557_v18 = vadd.f32 %v2506_v56, %v8902_v58  ;;  %v2559_v27 = vadd.f32 %v2549_v45, %v8905_v14  ;;  %v2558_v58 = vadd.f32 %v2547_v60, %v8906_v6 }
 0x650   :  { %v2508_v26 = vpop.f32.mrf.mxu1  ;;  %v2551_v7 = vpop.f32.mrf.mxu0 }
 0x651   :  { %4669 = vpow2.f32 %v4094_v52  ;;  %v4096_v51 = vmul.f32 -1.442695, %v2557_v18  ;;  %v2560_v46 = vadd.f32 %v2508_v26, %v8903_v55  ;;  %v4098_v56 = vmul.f32 -1.442695, %v2559_v27  ;;  %v8907_v52 = vld [vmem:[#allocation27_spill] sm:$0xff] }
 0x652   :  { %v2510_v13 = vpop.f32.mrf.mxu1  ;;  %v2553_v17 = vpop.f32.mrf.mxu0  ;;  %v2562_v55 = vadd.f32 %v2551_v7, %v8908_v63 }
 0x653   :  { %4671 = vpow2.f32 %v4096_v51  ;;  %v4095_v23 = vmul.f32 -1.442695, %v2560_v46  ;;  %v2561_v9 = vadd.f32 %v2510_v13, %v8904_v61  ;;  %v2563_v18 = vadd.f32 %v2553_v17, %v8907_v52 }
 0x655   :  { %4673 = vpow2.f32 %v4095_v23  ;;  %v4097_v3 = vmul.f32 -1.442695, %v2561_v9  ;;  %v4099_v13 = vmul.f32 -1.442695, %v2563_v18 }
 0x657   :  { %4675 = vpow2.f32 %v4097_v3 }
 0x658   :  { %4677 = vtanh.f32 %v2558_v58 }
 0x659   :  { %4679 = vpow2.f32 %v4098_v56 }
 0x65e   :  { %v4670_v39 = vpop.eup %4669 }
 0x65f   :  { %v2570_v26 = vadd.f32 1.0, %v4670_v39 }
 0x660   :  { %v4672_v46 = vpop.eup %4671 }
 0x661   :  { %4681 = vrcp.f32 %v2570_v26  ;;  %v2582_v51 = vadd.f32 1.0, %v4672_v46 }
 0x662   :  { %v4674_v9 = vpop.eup %4673  ;;  %4683 = vtanh.f32 %v2562_v55 }
 0x663   :  { %4685 = vrcp.f32 %v2582_v51  ;;  %v2571_v3 = vadd.f32 1.0, %v4674_v9 }
 0x664   :  { %v4676_v45 = vpop.eup %4675  ;;  %4687 = vpow2.f32 %v4099_v13 }
 0x665   :  { %4689 = vrcp.f32 %v2571_v3  ;;  %v2583_v6 = vadd.f32 1.0, %v4676_v45  ;;  %v4678_v60 = vpop.eup %4677 }
 0x666   :  { %v4680_v23 = vpop.eup %4679 }
 0x667   :  { %4691 = vrcp.f32 %v2583_v6  ;;  %v2596_v58 = vadd.f32 1.0, %v4680_v23 }
 0x669   :  { %4693 = vrcp.f32 %v2596_v58 }
 0x66e   :  { %v4682_v61 = vpop.eup %4681 }
 0x66f   :  { %v4684_v63 = vpop.eup %4683  ;;  %v2604_v39 = vmul.f32 %v4682_v61, %v4678_v60 }
 0x670   :  { %v4686_v7 = vpop.eup %4685 }
 0x671   :  { %v4688_v14 = vpop.eup %4687  ;;  %v2602_v27 = vmul.f32 %v4686_v7, %v6824_v31 }
 0x672   :  { %v4690_v17 = vpop.eup %4689  ;;  %v2597_v55 = vadd.f32 1.0, %v4688_v14 }
 0x673   :  { %v7430_v56 = vadd.f32 %v2604_v39, %v2602_v27  ;;  %v2605_v52 = vmul.f32 %v4690_v17, %v4684_v63 }
 0x674   :  { %v4692_v18 = vpop.eup %4691 }
 0x675   :  { %v2603_v26 = vmul.f32 %v4692_v18, %v6827_v19  ;;  %4695 = vtanh.f32 %v7430_v56 }
 0x676   :  { %4697 = vrcp.f32 %v2597_v55  ;;  %v4694_v13 = vpop.eup %4693 }
 0x677   :  { %v7433_v46 = vadd.f32 %v2605_v52, %v2603_v26 }
 0x679   :  { %4699 = vtanh.f32 %v7433_v46 }
 0x682   :  { %v4696_v51 = vpop.eup %4695 }
 0x683   :  { %v4698_v31 = vpop.eup %4697  ;;  %v2610_v3 = vmul.f32 %v4696_v51, %v4694_v13 }
 0x686   :  { %v4700_v9 = vpop.eup %4699 }
 0x687   :  { %v2611_v45 = vmul.f32 %v4700_v9, %v4698_v31 }
 0x689   :  { %v7437_v6 = vpack.c.bf16 %v2611_v45, %v2610_v3 }
 0x68b   :  { %2792 = vmatmul.mubr.bf16.vlgmr.msra.gmra.mxu1 %v7437_v6  ;;  %2835 = vmatmul.mubr.bf16.vlgmr.msra.gmra.mxu0 %v7437_v6 }
 0x68c   :  { %2903 = vmatpush1.bf16.msra.mxu1 %v6838_v62  ;;  %2946 = vmatpush1.bf16.msra.mxu0 %v6844_v12 }
 0x68d   :  { %2904 = vmatprep.subr.bf16.mxu1 %v6850_v29  ;;  %2947 = vmatprep.subr.bf16.mxu0 %v6856_v48 }
 0x68f   :  { %v2647_v19 = vpop.f32.mrf.mxu1  ;;  %v2690_v23 = vpop.f32.mrf.mxu0 }
 0x690   :  { %v2648_v60 = vadd.f32 %v2647_v19, %v6531_v54  ;;  %2905 = vmatpush1.bf16.msra.mxu1 %v6863_v44  ;;  %2948 = vmatpush1.bf16.msra.mxu0 %v6869_v47  ;;  %v2691_v31 = vadd.f32 %v2690_v23, %v6563_v10 }
 0x691   :  { %v2649_v61 = vpop.f32.mrf.mxu1  ;;  %2906 = vmatprep.subr.bf16.mxu1 %v6876_v5  ;;  %2949 = vmatprep.subr.bf16.mxu0 %v6882_v21  ;;  %v2692_v27 = vpop.f32.mrf.mxu0 }
 0x692   :  { %v4100_v63 = vmul.f32 -1.442695, %v2648_v60  ;;  %v2650_v39 = vadd.f32 %v2649_v61, %v6539_v30  ;;  %v2693_v51 = vadd.f32 %v2692_v27, %v6559_v22 }
 0x693   :  { %v2651_v7 = vpop.f32.mrf.mxu1  ;;  %v2694_v55 = vpop.f32.mrf.mxu0 }
 0x694   :  { %4701 = vpow2.f32 %v4100_v63  ;;  %v4102_v14 = vmul.f32 -1.442695, %v2650_v39  ;;  %v2652_v17 = vadd.f32 %v2651_v7, %v6531_v54  ;;  %2907 = vmatpush1.bf16.msra.mxu1 %v6889_v43  ;;  %2950 = vmatpush1.bf16.msra.mxu0 %v6895_v36  ;;  %v4104_v45 = vmul.f32 -1.442695, %v2693_v51 }
 0x695   :  { %v2653_v58 = vpop.f32.mrf.mxu1  ;;  %2908 = vmatprep.subr.bf16.mxu1 %v6902_v4  ;;  %2951 = vmatprep.subr.bf16.mxu0 %v6908_v1  ;;  %v2696_v13 = vpop.f32.mrf.mxu0  ;;  %v2695_v39 = vadd.f32 %v2694_v55, %v6563_v10  ;;  %v8911_v55 = vld [vmem:[#allocation8_spill] sm:$0xff] }
 0x696   :  { %4703 = vpow2.f32 %v4102_v14  ;;  %v4101_v52 = vmul.f32 -1.442695, %v2652_v17  ;;  %v2654_v18 = vadd.f32 %v2653_v58, %v6539_v30  ;;  %v2697_v9 = vadd.f32 %v2696_v13, %v6559_v22  ;;  %v8909_v58 = vld [vmem:[#allocation4_spill] sm:$0xff] }
 0x698   :  { %4705 = vpow2.f32 %v4101_v52  ;;  %v4103_v26 = vmul.f32 -1.442695, %v2654_v18  ;;  %2909 = vmatpush1.bf16.msra.mxu1 %v6914_v34  ;;  %2952 = vmatpush1.bf16.msra.mxu0 %v6920_v24  ;;  %v4105_v61 = vmul.f32 -1.442695, %v2697_v9  ;;  %v8910_v52 = vld [vmem:[#allocation6_spill] sm:$0xff] }
 0x699   :  { %2910 = vmatprep.subr.bf16.mxu1 %v6926_v16  ;;  %2953 = vmatprep.subr.bf16.mxu0 %v6932_v8 }
 0x69a   :  { %4707 = vpow2.f32 %v4103_v26  ;;  %v8912_v26 = vld [vmem:[#allocation10_spill] sm:$0xff] }
 0x69b   :  { %4709 = vtanh.f32 %v2691_v31 }
 0x69c   :  { %2911 = vmatpush1.bf16.msra.mxu1 %v6939_v0  ;;  %2954 = vmatpush1.bf16.msra.mxu0 %v6945_v41 }
 0x69d   :  { %2912 = vmatprep.subr.bf16.mxu1 %v6951_v53  ;;  %2955 = vmatprep.subr.bf16.mxu0 %v6957_v15 }
 0x6a0   :  { %2913 = vmatpush1.bf16.msra.mxu1 %v6965_v2  ;;  %2956 = vmatpush1.bf16.msra.mxu0 %v6971_v57 }
 0x6a1   :  { %v4702_v3 = vpop.eup %4701  ;;  %2914 = vmatprep.subr.bf16.mxu1 %v6977_v32  ;;  %2957 = vmatprep.subr.bf16.mxu0 %v6983_v11 }
 0x6a2   :  { %v2705_v19 = vadd.f32 1.0, %v4702_v3  ;;  %v8913_v3 = vld [vmem:[#allocation11_spill] sm:$0xff] }
 0x6a3   :  { %v4704_v60 = vpop.eup %4703 }
 0x6a4   :  { %4711 = vrcp.f32 %v2705_v19  ;;  %v2717_v63 = vadd.f32 1.0, %v4704_v60  ;;  %2915 = vmatpush1.bf16.msra.mxu1 %v6990_v35  ;;  %2958 = vmatpush1.bf16.msra.mxu0 %v6996_v37  ;;  %v8914_v19 = vld [vmem:[#allocation7_spill] sm:$0xff]  ;;  %v8915_v60 = vld [vmem:[#allocation5_spill] sm:$0xff] }
 0x6a5   :  { %v4706_v23 = vpop.eup %4705  ;;  %4713 = vpow2.f32 %v4104_v45  ;;  %2916 = vmatprep.subr.bf16.mxu1 %v7002_v40  ;;  %2959 = vmatprep.subr.bf16.mxu0 %v7008_v42 }
 0x6a6   :  { %4715 = vrcp.f32 %v2717_v63  ;;  %v2706_v7 = vadd.f32 1.0, %v4706_v23  ;;  %v8916_v23 = vld [vmem:[#allocation9_spill] sm:$0xff] }
 0x6a7   :  { %v4708_v14 = vpop.eup %4707  ;;  %4717 = vpow2.f32 %v4105_v61 }
 0x6a8   :  { %4719 = vrcp.f32 %v2706_v7  ;;  %v2718_v27 = vadd.f32 1.0, %v4708_v14  ;;  %2917 = vmatpush1.bf16.msra.mxu1 %v7014_v20  ;;  %2960 = vmatpush1.bf16.msra.mxu0 %v7020_v50  ;;  %v4710_v17 = vpop.eup %4709 }
 0x6a9   :  { %4721 = vtanh.f32 %v2695_v39  ;;  %2918 = vmatprep.subr.bf16.mxu1 %v7026_v28  ;;  %2961 = vmatprep.subr.bf16.mxu0 %v7032_v38  ;;  %v8917_v39 = vld [vmem:[#allocation52_spill] sm:$0xff] }
 0x6aa   :  { %4723 = vrcp.f32 %v2718_v27 }
 0x6ac   :  { %2919 = vmatpush2.bf16.msra.mxu1 %v7038_v59  ;;  %2962 = vmatpush2.bf16.msra.mxu0 %v7044_v25 }
 0x6ad   :  { %2920 = vmatprep.subr.bf16.mxu1 %v7050_v49  ;;  %2963 = vmatprep.subr.bf16.mxu0 %v7056_v33 }
 0x6b0   :  { %2921 = vmatpush2.bf16.msra.mxu1 %v8909_v58  ;;  %2964 = vmatpush2.bf16.msra.mxu0 %v8910_v52  ;;  %v8919_v52 = vld [vmem:[#allocation55_spill] sm:$0xff]  ;;  %v8981_v58 = vld [vmem:[#allocation33_spill] sm:$0xff] }
 0x6b1   :  { %v4712_v18 = vpop.eup %4711  ;;  %2922 = vmatprep.subr.bf16.mxu1 %v8911_v55  ;;  %2965 = vmatprep.subr.bf16.mxu0 %v8912_v26 }
 0x6b2   :  { %v4714_v13 = vpop.eup %4713  ;;  %v2739_v9 = vmul.f32 %v4712_v18, %v4710_v17  ;;  %v8920_v18 = vld [vmem:[#allocation53_spill] sm:$0xff] }
 0x6b3   :  { %v4716_v51 = vpop.eup %4715  ;;  %v2731_v63 = vadd.f32 1.0, %v4714_v13  ;;  %v8923_v13 = vld [vmem:[#allocation56_spill] sm:$0xff] }
 0x6b4   :  { %v4718_v31 = vpop.eup %4717  ;;  %v2737_v45 = vmul.f32 %v4716_v51, %v8913_v3  ;;  %2923 = vmatpush2.bf16.msra.mxu1 %v8914_v19  ;;  %2966 = vmatpush2.bf16.msra.mxu0 %v8915_v60  ;;  %v8921_v51 = vld [vmem:[#allocation54_spill] sm:$0xff]  ;;  %v8979_v60 = vld [vmem:[#allocation29_spill] sm:$0xff] }
 0x6b5   :  { %v4720_v61 = vpop.eup %4719  ;;  %2924 = vmatprep.subr.bf16.mxu1 %v8916_v23  ;;  %2967 = vmatprep.subr.bf16.mxu0 %v8917_v39  ;;  %v2732_v26 = vadd.f32 1.0, %v4718_v31  ;;  %4725 = vrcp.f32 %v2731_v63  ;;  %v8922_v3 = vld [vmem:[#allocation114_spill] sm:$0xff]  ;;  %v8930_v63 = vld [vmem:[#allocation61_spill] sm:$0xff] }
 0x6b6   :  { %v4722_v7 = vpop.eup %4721  ;;  %v7494_v14 = vadd.f32 %v2739_v9, %v2737_v45  ;;  %v8925_v9 = vld [vmem:[#allocation57_spill] sm:$0xff]  ;;  %v8926_v31 = vld [vmem:[#allocation58_spill] sm:$0xff]  ;;  %v8928_v45 = vld [vmem:[#allocation115_spill] sm:$0xff] }
 0x6b7   :  { %v4724_v27 = vpop.eup %4723  ;;  %v2740_v55 = vmul.f32 %v4722_v7, %v4720_v61  ;;  %v8929_v61 = vld [vmem:[#allocation60_spill] sm:$0xff]  ;;  %v8931_v7 = vld [vmem:[#allocation62_spill] sm:$0xff] }
 0x6b8   :  { %8918 = vst [vmem:[#allocation102_spill] sm:$0xff] %v7494_v14  ;;  %v2738_v17 = vmul.f32 %v4724_v27, %v8919_v52  ;;  %2925 = vmatpush2.bf16.msra.mxu1 %v8920_v18  ;;  %2968 = vmatpush2.bf16.msra.mxu0 %v8921_v51  ;;  %4727 = vtanh.f32 %v7494_v14  ;;  %v8927_v52 = vld [vmem:[#allocation59_spill] sm:$0xff]  ;;  %v8933_v27 = vld [vmem:[#allocation64_spill] sm:$0xff]  ;;  %v8977_v18 = vld [vmem:[#allocation34_spill] sm:$0xff] }
 0x6b9   :  { %2926 = vmatprep.subr.bf16.mxu1 %v8922_v3  ;;  %2969 = vmatprep.subr.bf16.mxu0 %v8923_v13  ;;  %4729 = vrcp.f32 %v2732_v26  ;;  %v8934_v26 = vld [vmem:[#allocation65_spill] sm:$0xff]  ;;  %v8939_v3 = vld [vmem:[#allocation70_spill] sm:$0xff] }
 0x6ba   :  { %v7501_v23 = vadd.f32 %v2740_v55, %v2738_v17  ;;  %v8932_v55 = vld [vmem:[#allocation63_spill] sm:$0xff]  ;;  %v8935_v17 = vld [vmem:[#allocation66_spill] sm:$0xff] }
 0x6bc   :  { %8924 = vst [vmem:[#allocation103_spill] sm:$0xff] %v7501_v23  ;;  %2927 = vmatpush2.bf16.msra.mxu1 %v8925_v9  ;;  %2970 = vmatpush2.bf16.msra.mxu0 %v8926_v31  ;;  %4731 = vtanh.f32 %v7501_v23  ;;  %v8936_v31 = vld [vmem:[#allocation67_spill] sm:$0xff] }
 0x6bd   :  { %2928 = vmatprep.subr.bf16.mxu1 %v8927_v52  ;;  %2971 = vmatprep.subr.bf16.mxu0 %v8928_v45  ;;  %v8937_v45 = vld [vmem:[#allocation68_spill] sm:$0xff] }
 0x6c0   :  { %2929 = vmatpush2.bf16.msra.mxu1 %v8929_v61  ;;  %2972 = vmatpush2.bf16.msra.mxu0 %v8930_v63  ;;  %v8938_v61 = vld [vmem:[#allocation69_spill] sm:$0xff] }
 0x6c1   :  { %2930 = vmatprep.subr.bf16.mxu1 %v8931_v7  ;;  %2973 = vmatprep.subr.bf16.mxu0 %v8932_v55  ;;  %v8940_v7 = vld [vmem:[#allocation71_spill] sm:$0xff] }
 0x6c2   :  { %v4726_v9 = vpop.eup %4725 }
 0x6c4   :  { %2931 = vmatpush2.bf16.msra.mxu1 %v8933_v27  ;;  %2974 = vmatpush2.bf16.msra.mxu0 %v8934_v26 }
 0x6c5   :  { %2932 = vmatprep.subr.bf16.mxu1 %v8935_v17  ;;  %2975 = vmatprep.subr.bf16.mxu0 %v8936_v31  ;;  %v4728_v52 = vpop.eup %4727  ;;  %v8941_v31 = vld [vmem:[#allocation72_spill] sm:$0xff]  ;;  %v8942_v17 = vld [vmem:[#allocation73_spill] sm:$0xff] }
 0x6c6   :  { %v4730_v13 = vpop.eup %4729  ;;  %v2745_v55 = vmul.f32 %v4728_v52, %v4726_v9  ;;  %v8947_v9 = vld [vmem:[#allocation77_spill] sm:$0xff]  ;;  %v8949_v52 = vld [vmem:[#allocation79_spill] sm:$0xff] }
 0x6c8   :  { %2933 = vmatpush2.bf16.msra.mxu1 %v8937_v45  ;;  %2976 = vmatpush2.bf16.msra.mxu0 %v8938_v61  ;;  %v8943_v45 = vld [vmem:[#allocation74_spill] sm:$0xff]  ;;  %v8944_v61 = vld [vmem:[#allocation75_spill] sm:$0xff] }
 0x6c9   :  { %v4732_v63 = vpop.eup %4731  ;;  %3048 = vmatprep.subr.bf16.mxu1 %v8939_v3  ;;  %3091 = vmatprep.subr.bf16.mxu0 %v8940_v7  ;;  %v8945_v3 = vmov 0  }
 0x6ca   :  { %v2746_v27 = vmul.f32 %v4732_v63, %v4730_v13  ;;  %v8946_v13 = vld [vmem:[#allocation76_spill] sm:$0xff]  ;;  %v8951_v63 = vld [vmem:[#allocation81_spill] sm:$0xff] }
 0x6cc   :  { %v2901_v23 = vpack.c.bf16 %v2746_v27, %v2745_v55  ;;  %v8952_v55 = vld [vmem:[#allocation82_spill] sm:$0xff]  ;;  %v8953_v27 = vld [vmem:[#allocation83_spill] sm:$0xff] }
 0x6ce   :  { %2934 = vmatprep.mubr.bf16.mxu1 %v2901_v23  ;;  %2977 = vmatprep.mubr.bf16.mxu0 %v2901_v23  ;;  %v8948_v23 = vld [vmem:[#allocation78_spill] sm:$0xff] }
 0x6cf   :  { %2935 = vmatmul.mubr.bf16.vlgmr.msra.gmra.mxu1 %v7437_v6  ;;  %2978 = vmatmul.mubr.bf16.vlgmr.msra.gmra.mxu0 %v7437_v6  ;;  %v8950_v6 = vld [vmem:[#allocation80_spill] sm:$0xff] }
 0x6d0   :  { %3049 = vmatpush1.bf16.msra.mxu1 %v8941_v31  ;;  %3092 = vmatpush1.bf16.msra.mxu0 %v8942_v17 }
 0x6d1   :  { %3050 = vmatprep.subr.bf16.mxu1 %v8943_v45  ;;  %3093 = vmatprep.subr.bf16.mxu0 %v8944_v61  ;;  %v8954_v61 = vld [vmem:[#allocation84_spill] sm:$0xff]  ;;  %v8955_v45 = vld [vmem:[#allocation85_spill] sm:$0xff] }
 0x6d2   :  { %3080 = vmatprep.mubr.bf16.mxu1 %v8945_v3  ;;  %3123 = vmatprep.mubr.bf16.mxu0 %v8945_v3  ;;  %v8956_v3 = vld [vmem:[#allocation86_spill] sm:$0xff] }
 0x6d4   :  { %3051 = vmatpush1.bf16.msra.mxu1 %v8946_v13  ;;  %3094 = vmatpush1.bf16.msra.mxu0 %v8947_v9  ;;  %v8957_v13 = vld [vmem:[#allocation87_spill] sm:$0xff]  ;;  %v8958_v9 = vld [vmem:[#allocation88_spill] sm:$0xff] }
 0x6d5   :  { %3052 = vmatprep.subr.bf16.mxu1 %v8948_v23  ;;  %3095 = vmatprep.subr.bf16.mxu0 %v8949_v52  ;;  %v8959_v23 = vld [vmem:[#allocation89_spill] sm:$0xff]  ;;  %v8960_v52 = vld [vmem:[#allocation90_spill] sm:$0xff] }
 0x6d8   :  { %3053 = vmatpush1.bf16.msra.mxu1 %v8950_v6  ;;  %3096 = vmatpush1.bf16.msra.mxu0 %v8951_v63  ;;  %v8961_v6 = vld [vmem:[#allocation91_spill] sm:$0xff]  ;;  %v8962_v63 = vld [vmem:[#allocation92_spill] sm:$0xff] }
 0x6d9   :  { %3054 = vmatprep.subr.bf16.mxu1 %v8952_v55  ;;  %3097 = vmatprep.subr.bf16.mxu0 %v8953_v27  ;;  %v8963_v55 = vld [vmem:[#allocation93_spill] sm:$0xff]  ;;  %v8964_v27 = vld [vmem:[#allocation94_spill] sm:$0xff] }
 0x6dc   :  { %3055 = vmatpush1.bf16.msra.mxu1 %v8954_v61  ;;  %3098 = vmatpush1.bf16.msra.mxu0 %v8955_v45  ;;  %v8965_v61 = vld [vmem:[#allocation95_spill] sm:$0xff]  ;;  %v8966_v45 = vld [vmem:[#allocation96_spill] sm:$0xff] }
 0x6dd   :  { %3056 = vmatprep.subr.bf16.mxu1 %v8956_v3  ;;  %3099 = vmatprep.subr.bf16.mxu0 %v8957_v13  ;;  %v8967_v3 = vld [vmem:[#allocation97_spill] sm:$0xff]  ;;  %v8968_v13 = vld [vmem:[#allocation98_spill] sm:$0xff] }
 0x6e0   :  { %3057 = vmatpush1.bf16.msra.mxu1 %v8958_v9  ;;  %3100 = vmatpush1.bf16.msra.mxu0 %v8959_v23  ;;  %v8969_v9 = vld [vmem:[#allocation99_spill] sm:$0xff]  ;;  %v8970_v23 = vld [vmem:[#allocation100_spill] sm:$0xff] }
 0x6e1   :  { %3058 = vmatprep.subr.bf16.mxu1 %v8960_v52  ;;  %3101 = vmatprep.subr.bf16.mxu0 %v8961_v6  ;;  %v8971_v52 = vld [vmem:[#allocation101_spill] sm:$0xff] }
 0x6e4   :  { %3059 = vmatpush1.bf16.msra.mxu1 %v8962_v63  ;;  %3102 = vmatpush1.bf16.msra.mxu0 %v8963_v55  ;;  %v7558_v55 = vld [vmem:[%s8303_s5 + $0xe4] ss:$16 sps:$4 sm:$0xff]  }
 0x6e5   :  { %3060 = vmatprep.subr.bf16.mxu1 %v8964_v27  ;;  %3103 = vmatprep.subr.bf16.mxu0 %v8965_v61  ;;  %8972 = vst [vmem:[#allocation104_spill] sm:$0xff] %v7558_v55  ;;  %v8975_v27 = vld [vmem:[#allocation30_spill] sm:$0xff] }
 0x6e8   :  { %3061 = vmatpush1.bf16.msra.mxu1 %v8966_v45  ;;  %3104 = vmatpush1.bf16.msra.mxu0 %v8967_v3  ;;  %v7564_v45 = vld [vmem:[%s8303_s5 + $0xec] ss:$16 sps:$4 sm:$0xff]  }
 0x6e9   :  { %3062 = vmatprep.subr.bf16.mxu1 %v8968_v13  ;;  %3105 = vmatprep.subr.bf16.mxu0 %v8969_v9  ;;  %8973 = vst [vmem:[#allocation105_spill] sm:$0xff] %v7564_v45  ;;  %v8974_v9 = vld [vmem:[#allocation28_spill] sm:$0xff] }
 0x6ec   :  { %3063 = vmatpush1.bf16.msra.mxu1 %v8970_v23  ;;  %3106 = vmatpush1.bf16.msra.mxu0 %v8971_v52 }
 0x6ed   :  { %3191 = vmatprep.subr.bf16.mxu1 %v7558_v55  ;;  %3234 = vmatprep.subr.bf16.mxu0 %v7564_v45  ;;  %v8976_v55 = vld [vmem:[#allocation32_spill] sm:$0xff] }
 0x74b   :  { %v2793_v13 = vpop.f32.mrf.mxu1  ;;  %v2836_v23 = vpop.f32.mrf.mxu0 }
 0x74c   :  { %v2845_v3 = vadd.f32 %v2793_v13, %v8974_v9  ;;  %v8978_v13 = vld [vmem:[#allocation31_spill] sm:$0xff] }
 0x74d   :  { %v2795_v61 = vpop.f32.mrf.mxu1  ;;  %v2838_v31 = vpop.f32.mrf.mxu0 }
 0x74e   :  { %v4106_v52 = vmul.f32 -1.442695, %v2845_v3  ;;  %v2846_v63 = vadd.f32 %v2795_v61, %v8975_v27  ;;  %v2848_v9 = vadd.f32 %v2838_v31, %v8978_v13  ;;  %v2847_v61 = vadd.f32 %v2836_v23, %v8979_v60 }
 0x74f   :  { %v2797_v6 = vpop.f32.mrf.mxu1  ;;  %v2840_v45 = vpop.f32.mrf.mxu0 }
 0x750   :  { %4733 = vpow2.f32 %v4106_v52  ;;  %v4108_v17 = vmul.f32 -1.442695, %v2846_v63  ;;  %v2849_v7 = vadd.f32 %v2797_v6, %v8976_v55  ;;  %v4110_v27 = vmul.f32 -1.442695, %v2848_v9  ;;  %v8980_v52 = vld [vmem:[#allocation35_spill] sm:$0xff] }
 0x751   :  { %v2799_v26 = vpop.f32.mrf.mxu1  ;;  %v2842_v3 = vpop.f32.mrf.mxu0  ;;  %v2851_v6 = vadd.f32 %v2840_v45, %v8981_v58 }
 0x752   :  { %4735 = vpow2.f32 %v4108_v17  ;;  %v4107_v51 = vmul.f32 -1.442695, %v2849_v7  ;;  %v2850_v39 = vadd.f32 %v2799_v26, %v8977_v18  ;;  %v2852_v63 = vadd.f32 %v2842_v3, %v8980_v52 }
 0x754   :  { %4737 = vpow2.f32 %v4107_v51  ;;  %v4109_v14 = vmul.f32 -1.442695, %v2850_v39  ;;  %v4111_v18 = vmul.f32 -1.442695, %v2852_v63 }
 0x756   :  { %4739 = vpow2.f32 %v4109_v14 }
 0x757   :  { %4741 = vtanh.f32 %v2847_v61 }
 0x758   :  { %4743 = vpow2.f32 %v4110_v27 }
 0x75d   :  { %v4734_v19 = vpop.eup %4733 }
 0x75e   :  { %v2859_v55 = vadd.f32 1.0, %v4734_v19 }
 0x75f   :  { %v4736_v7 = vpop.eup %4735 }
 0x760   :  { %4745 = vrcp.f32 %v2859_v55  ;;  %v2871_v51 = vadd.f32 1.0, %v4736_v7 }
 0x761   :  { %v4738_v39 = vpop.eup %4737  ;;  %4747 = vtanh.f32 %v2851_v6 }
 0x762   :  { %4749 = vrcp.f32 %v2871_v51  ;;  %v2860_v14 = vadd.f32 1.0, %v4738_v39 }
 0x763   :  { %v4740_v31 = vpop.eup %4739  ;;  %4751 = vpow2.f32 %v4111_v18 }
 0x764   :  { %4753 = vrcp.f32 %v2860_v14  ;;  %v2872_v60 = vadd.f32 1.0, %v4740_v31  ;;  %v4742_v26 = vpop.eup %4741 }
 0x765   :  { %v4744_v17 = vpop.eup %4743 }
 0x766   :  { %4755 = vrcp.f32 %v2872_v60  ;;  %v2885_v61 = vadd.f32 1.0, %v4744_v17 }
 0x768   :  { %4757 = vrcp.f32 %v2885_v61 }
 0x76d   :  { %v4746_v23 = vpop.eup %4745 }
 0x76e   :  { %v4748_v58 = vpop.eup %4747  ;;  %v2893_v19 = vmul.f32 %v4746_v23, %v4742_v26 }
 0x76f   :  { %v4750_v45 = vpop.eup %4749 }
 0x770   :  { %v4752_v13 = vpop.eup %4751  ;;  %v2891_v9 = vmul.f32 %v4750_v45, %v7430_v56  ;;  %v8986_v45 = vld [vmem:[#allocation7_spill] sm:$0xff] }
 0x771   :  { %v4754_v3 = vpop.eup %4753  ;;  %v2886_v6 = vadd.f32 1.0, %v4752_v13  ;;  %v8988_v13 = vld [vmem:[#allocation102_spill] sm:$0xff] }
 0x772   :  { %v7576_v27 = vadd.f32 %v2893_v19, %v2891_v9  ;;  %v2894_v52 = vmul.f32 %v4754_v3, %v4748_v58  ;;  %v8989_v9 = vld [vmem:[#allocation9_spill] sm:$0xff]  ;;  %v8990_v3 = vld [vmem:[#allocation52_spill] sm:$0xff] }
 0x773   :  { %v4756_v63 = vpop.eup %4755 }
 0x774   :  { %v2892_v55 = vmul.f32 %v4756_v63, %v7433_v46  ;;  %4759 = vtanh.f32 %v7576_v27 }
 0x775   :  { %4761 = vrcp.f32 %v2886_v6  ;;  %v4758_v18 = vpop.eup %4757 }
 0x776   :  { %v7579_v7 = vadd.f32 %v2894_v52, %v2892_v55 }
 0x778   :  { %4763 = vtanh.f32 %v7579_v7 }
 0x781   :  { %v4760_v51 = vpop.eup %4759 }
 0x782   :  { %v4762_v56 = vpop.eup %4761  ;;  %v2899_v14 = vmul.f32 %v4760_v51, %v4758_v18  ;;  %v8991_v51 = vld [vmem:[#allocation53_spill] sm:$0xff] }
 0x785   :  { %v4764_v39 = vpop.eup %4763 }
 0x786   :  { %v2900_v31 = vmul.f32 %v4764_v39, %v4762_v56  ;;  %v8992_v56 = vld [vmem:[#allocation54_spill] sm:$0xff] }
 0x788   :  { %v7583_v60 = vpack.c.bf16 %v2900_v31, %v2899_v14  ;;  %v8993_v14 = vld [vmem:[#allocation103_spill] sm:$0xff] }
 0x78a   :  { %3081 = vmatmul.mubr.bf16.vlgmr.msra.gmra.mxu1 %v7583_v60  ;;  %3124 = vmatmul.mubr.bf16.vlgmr.msra.gmra.mxu0 %v7583_v60 }
 0x78b   :  { %3192 = vmatpush1.bf16.msra.mxu1 %v6838_v62  ;;  %3235 = vmatpush1.bf16.msra.mxu0 %v6844_v12 }
 0x78c   :  { %3193 = vmatprep.subr.bf16.mxu1 %v6850_v29  ;;  %3236 = vmatprep.subr.bf16.mxu0 %v6856_v48 }
 0x78f   :  { %v2936_v46 = vpop.f32.mrf.mxu1  ;;  %3194 = vmatpush1.bf16.msra.mxu1 %v6863_v44  ;;  %3237 = vmatpush1.bf16.msra.mxu0 %v6869_v47  ;;  %v2979_v17 = vpop.f32.mrf.mxu0 }
 0x790   :  { %v2937_v26 = vadd.f32 %v2936_v46, %v6531_v54  ;;  %3195 = vmatprep.subr.bf16.mxu1 %v6876_v5  ;;  %3238 = vmatprep.subr.bf16.mxu0 %v6882_v21  ;;  %v8994_v46 = vld [vmem:[#allocation114_spill] sm:$0xff] }
 0x791   :  { %v2938_v23 = vpop.f32.mrf.mxu1  ;;  %v2981_v48 = vpop.f32.mrf.mxu0 }
 0x792   :  { %v4112_v62 = vmul.f32 -1.442695, %v2937_v26  ;;  %v2939_v12 = vadd.f32 %v2938_v23, %v6539_v30  ;;  %v8995_v26 = vld [vmem:[#allocation56_spill] sm:$0xff]  ;;  %v8996_v23 = vld [vmem:[#allocation57_spill] sm:$0xff] }
 0x793   :  { %v2940_v58 = vpop.f32.mrf.mxu1  ;;  %3196 = vmatpush1.bf16.msra.mxu1 %v6889_v43  ;;  %3239 = vmatpush1.bf16.msra.mxu0 %v6895_v36  ;;  %v2983_v43 = vpop.f32.mrf.mxu0 }
 0x794   :  { %4765 = vpow2.f32 %v4112_v62  ;;  %v4114_v29 = vmul.f32 -1.442695, %v2939_v12  ;;  %v2941_v44 = vadd.f32 %v2940_v58, %v6531_v54  ;;  %3197 = vmatprep.subr.bf16.mxu1 %v6902_v4  ;;  %3240 = vmatprep.subr.bf16.mxu0 %v6908_v1  ;;  %v2982_v1 = vadd.f32 %v2981_v48, %v6559_v22  ;;  %v8997_v62 = vld [vmem:[#allocation58_spill] sm:$0xff]  ;;  %v8998_v12 = vld [vmem:[#allocation59_spill] sm:$0xff]  ;;  %v9001_v48 = vld [vmem:[#allocation61_spill] sm:$0xff] }
 0x795   :  { %v2942_v47 = vpop.f32.mrf.mxu1  ;;  %v2985_v4 = vpop.f32.mrf.mxu0  ;;  %v8999_v58 = vld [vmem:[#allocation115_spill] sm:$0xff] }
 0x796   :  { %4767 = vpow2.f32 %v4114_v29  ;;  %v4113_v5 = vmul.f32 -1.442695, %v2941_v44  ;;  %v2943_v21 = vadd.f32 %v2942_v47, %v6539_v30  ;;  %v9000_v29 = vld [vmem:[#allocation60_spill] sm:$0xff]  ;;  %v9002_v44 = vld [vmem:[#allocation62_spill] sm:$0xff]  ;;  %v9003_v47 = vld [vmem:[#allocation63_spill] sm:$0xff] }
 0x797   :  { %3198 = vmatpush1.bf16.msra.mxu1 %v6914_v34  ;;  %3241 = vmatpush1.bf16.msra.mxu0 %v6920_v24  ;;  %v2980_v34 = vadd.f32 %v2979_v17, %v6563_v10  ;;  %v2986_v24 = vadd.f32 %v2985_v4, %v6559_v22 }
 0x798   :  { %4769 = vpow2.f32 %v4113_v5  ;;  %v4115_v36 = vmul.f32 -1.442695, %v2943_v21  ;;  %3199 = vmatprep.subr.bf16.mxu1 %v6926_v16  ;;  %3242 = vmatprep.subr.bf16.mxu0 %v6932_v8  ;;  %v4116_v8 = vmul.f32 -1.442695, %v2982_v1  ;;  %v9004_v5 = vld [vmem:[#allocation64_spill] sm:$0xff]  ;;  %v9005_v21 = vld [vmem:[#allocation65_spill] sm:$0xff] }
 0x79a   :  { %4771 = vpow2.f32 %v4115_v36  ;;  %v9007_v36 = vld [vmem:[#allocation67_spill] sm:$0xff] }
 0x79b   :  { %3200 = vmatpush1.bf16.msra.mxu1 %v6939_v0  ;;  %3243 = vmatpush1.bf16.msra.mxu0 %v6945_v41  ;;  %4773 = vtanh.f32 %v2980_v34  ;;  %v9008_v34 = vld [vmem:[#allocation68_spill] sm:$0xff] }
 0x79c   :  { %3201 = vmatprep.subr.bf16.mxu1 %v6951_v53  ;;  %3244 = vmatprep.subr.bf16.mxu0 %v6957_v15  ;;  %v4117_v53 = vmul.f32 -1.442695, %v2986_v24  ;;  %v9009_v24 = vld [vmem:[#allocation69_spill] sm:$0xff] }
 0x79f   :  { %3202 = vmatpush1.bf16.msra.mxu1 %v6965_v2  ;;  %3245 = vmatpush1.bf16.msra.mxu0 %v6971_v57  ;;  %v2984_v57 = vadd.f32 %v2983_v43, %v6563_v10  ;;  %v9006_v43 = vld [vmem:[#allocation66_spill] sm:$0xff] }
 0x7a0   :  { %3203 = vmatprep.subr.bf16.mxu1 %v6977_v32  ;;  %3246 = vmatprep.subr.bf16.mxu0 %v6983_v11 }
 0x7a1   :  { %v4766_v16 = vpop.eup %4765 }
 0x7a2   :  { %v2994_v0 = vadd.f32 1.0, %v4766_v16 }
 0x7a3   :  { %v4768_v41 = vpop.eup %4767  ;;  %3204 = vmatpush1.bf16.msra.mxu1 %v6990_v35  ;;  %3247 = vmatpush1.bf16.msra.mxu0 %v6996_v37  ;;  %v8982_v37 = vld [vmem:[#allocation4_spill] sm:$0xff] }
 0x7a4   :  { %4775 = vrcp.f32 %v2994_v0  ;;  %v3006_v15 = vadd.f32 1.0, %v4768_v41  ;;  %3205 = vmatprep.subr.bf16.mxu1 %v7002_v40  ;;  %3248 = vmatprep.subr.bf16.mxu0 %v7008_v42  ;;  %v8983_v40 = vld [vmem:[#allocation6_spill] sm:$0xff]  ;;  %v9011_v0 = vld [vmem:[#allocation71_spill] sm:$0xff] }
 0x7a5   :  { %v4770_v2 = vpop.eup %4769  ;;  %4777 = vpow2.f32 %v4116_v8  ;;  %v9010_v8 = vld [vmem:[#allocation70_spill] sm:$0xff] }
 0x7a6   :  { %4779 = vrcp.f32 %v3006_v15  ;;  %v2995_v32 = vadd.f32 1.0, %v4770_v2 }
 0x7a7   :  { %v4772_v11 = vpop.eup %4771  ;;  %4781 = vpow2.f32 %v4117_v53  ;;  %3206 = vmatpush1.bf16.msra.mxu1 %v7014_v20  ;;  %3249 = vmatpush1.bf16.msra.mxu0 %v7020_v50  ;;  %v8984_v20 = vld [vmem:[#allocation8_spill] sm:$0xff]  ;;  %v8985_v50 = vld [vmem:[#allocation10_spill] sm:$0xff] }
 0x7a8   :  { %4783 = vrcp.f32 %v2995_v32  ;;  %v3007_v35 = vadd.f32 1.0, %v4772_v11  ;;  %3207 = vmatprep.subr.bf16.mxu1 %v7026_v28  ;;  %3250 = vmatprep.subr.bf16.mxu0 %v7032_v38  ;;  %v4774_v42 = vpop.eup %4773  ;;  %v9013_v32 = vld [vmem:[#allocation73_spill] sm:$0xff]  ;;  %v9014_v11 = vld [vmem:[#allocation74_spill] sm:$0xff] }
 0x7a9   :  { %4785 = vtanh.f32 %v2984_v57  ;;  %v9012_v57 = vld [vmem:[#allocation72_spill] sm:$0xff] }
 0x7aa   :  { %4787 = vrcp.f32 %v3007_v35  ;;  %v9015_v35 = vld [vmem:[#allocation75_spill] sm:$0xff] }
 0x7ab   :  { %3208 = vmatpush2.bf16.msra.mxu1 %v7038_v59  ;;  %3251 = vmatpush2.bf16.msra.mxu0 %v7044_v25  ;;  %v8987_v59 = vld [vmem:[#allocation5_spill] sm:$0xff] }
 0x7ac   :  { %3209 = vmatprep.subr.bf16.mxu1 %v7050_v49  ;;  %3252 = vmatprep.subr.bf16.mxu0 %v7056_v33 }
 0x7af   :  { %3210 = vmatpush2.bf16.msra.mxu1 %v8982_v37  ;;  %3253 = vmatpush2.bf16.msra.mxu0 %v8983_v40  ;;  %v9016_v37 = vmov 0   ;;  %v9017_v40 = vld [vmem:[#allocation76_spill] sm:$0xff] }
 0x7b0   :  { %3211 = vmatprep.subr.bf16.mxu1 %v8984_v20  ;;  %3254 = vmatprep.subr.bf16.mxu0 %v8985_v50  ;;  %v9019_v20 = vld [vmem:[#allocation78_spill] sm:$0xff]  ;;  %v9020_v50 = vld [vmem:[#allocation79_spill] sm:$0xff] }
 0x7b1   :  { %v4776_v28 = vpop.eup %4775 }
 0x7b2   :  { %v4778_v38 = vpop.eup %4777  ;;  %v3028_v49 = vmul.f32 %v4776_v28, %v4774_v42  ;;  %v9018_v42 = vld [vmem:[#allocation77_spill] sm:$0xff] }
 0x7b3   :  { %v4780_v19 = vpop.eup %4779  ;;  %3212 = vmatpush2.bf16.msra.mxu1 %v8986_v45  ;;  %3255 = vmatpush2.bf16.msra.mxu0 %v8987_v59  ;;  %v3020_v52 = vadd.f32 1.0, %v4778_v38  ;;  %v9022_v28 = vld [vmem:[#allocation81_spill] sm:$0xff]  ;;  %v9023_v38 = vld [vmem:[#allocation82_spill] sm:$0xff]  ;;  %v9025_v45 = vld [vmem:[#allocation84_spill] sm:$0xff] }
 0x7b4   :  { %v4782_v25 = vpop.eup %4781  ;;  %v3026_v33 = vmul.f32 %v4780_v19, %v8988_v13  ;;  %3213 = vmatprep.subr.bf16.mxu1 %v8989_v9  ;;  %3256 = vmatprep.subr.bf16.mxu0 %v8990_v3  ;;  %v9024_v19 = vld [vmem:[#allocation83_spill] sm:$0xff]  ;;  %v9026_v59 = vld [vmem:[#allocation85_spill] sm:$0xff]  ;;  %v9029_v13 = vld [vmem:[#allocation88_spill] sm:$0xff] }
 0x7b5   :  { %v4784_v61 = vpop.eup %4783  ;;  %v3021_v18 = vadd.f32 1.0, %v4782_v25  ;;  %4789 = vrcp.f32 %v3020_v52  ;;  %v9027_v25 = vld [vmem:[#allocation86_spill] sm:$0xff]  ;;  %v9032_v3 = vld [vmem:[#allocation91_spill] sm:$0xff]  ;;  %v9034_v52 = vld [vmem:[#allocation93_spill] sm:$0xff] }
 0x7b6   :  { %v4786_v63 = vpop.eup %4785  ;;  %v7640_v6 = vadd.f32 %v3028_v49, %v3026_v33  ;;  %v9028_v49 = vld [vmem:[#allocation87_spill] sm:$0xff]  ;;  %v9030_v33 = vld [vmem:[#allocation89_spill] sm:$0xff]  ;;  %v9031_v9 = vld [vmem:[#allocation90_spill] sm:$0xff] }
 0x7b7   :  { %v4788_v55 = vpop.eup %4787  ;;  %3214 = vmatpush2.bf16.msra.mxu1 %v8991_v51  ;;  %3257 = vmatpush2.bf16.msra.mxu0 %v8992_v56  ;;  %v3029_v39 = vmul.f32 %v4786_v63, %v4784_v61  ;;  %v9033_v61 = vld [vmem:[#allocation92_spill] sm:$0xff]  ;;  %v9035_v63 = vld [vmem:[#allocation94_spill] sm:$0xff]  ;;  %v9038_v51 = vld [vmem:[#allocation97_spill] sm:$0xff] }
 0x7b8   :  { %v3027_v31 = vmul.f32 %v4788_v55, %v8993_v14  ;;  %3215 = vmatprep.subr.bf16.mxu1 %v8994_v46  ;;  %3258 = vmatprep.subr.bf16.mxu0 %v8995_v26  ;;  %4791 = vtanh.f32 %v7640_v6  ;;  %v9036_v55 = vld [vmem:[#allocation95_spill] sm:$0xff]  ;;  %v9039_v56 = vld [vmem:[#allocation98_spill] sm:$0xff]  ;;  %v9041_v14 = vld [vmem:[#allocation100_spill] sm:$0xff] }
 0x7b9   :  { %4793 = vrcp.f32 %v3021_v18  ;;  %v9037_v18 = vld [vmem:[#allocation96_spill] sm:$0xff]  ;;  %v9044_v26 = vld [vmem:[#allocation105_spill] sm:$0xff] }
 0x7ba   :  { %v7647_v17 = vadd.f32 %v3029_v39, %v3027_v31  ;;  %v9040_v39 = vld [vmem:[#allocation99_spill] sm:$0xff]  ;;  %v9042_v31 = vld [vmem:[#allocation101_spill] sm:$0xff]  ;;  %v9043_v46 = vld [vmem:[#allocation104_spill] sm:$0xff] }
 0x7bb   :  { %3216 = vmatpush2.bf16.msra.mxu1 %v8996_v23  ;;  %3259 = vmatpush2.bf16.msra.mxu0 %v8997_v62  ;;  %v9045_v62 = vld [vmem:[#allocation36_spill] sm:$0xff] }
 0x7bc   :  { %3217 = vmatprep.subr.bf16.mxu1 %v8998_v12  ;;  %3260 = vmatprep.subr.bf16.mxu0 %v8999_v58  ;;  %4795 = vtanh.f32 %v7647_v17 }
 0x7bf   :  { %3218 = vmatpush2.bf16.msra.mxu1 %v9000_v29  ;;  %3261 = vmatpush2.bf16.msra.mxu0 %v9001_v48 }
 0x7c0   :  { %3219 = vmatprep.subr.bf16.mxu1 %v9002_v44  ;;  %3262 = vmatprep.subr.bf16.mxu0 %v9003_v47  ;;  %v9046_v44 = vld [vmem:[#allocation38_spill] sm:$0xff] }
 0x7c2   :  { %v4790_v4 = vpop.eup %4789 }
 0x7c3   :  { %3220 = vmatpush2.bf16.msra.mxu1 %v9004_v5  ;;  %3263 = vmatpush2.bf16.msra.mxu0 %v9005_v21 }
 0x7c4   :  { %3221 = vmatprep.subr.bf16.mxu1 %v9006_v43  ;;  %3264 = vmatprep.subr.bf16.mxu0 %v9007_v36  ;;  %v9047_v36 = vld [vmem:[#allocation40_spill] sm:$0xff] }
 0x7c5   :  { %v4792_v1 = vpop.eup %4791 }
 0x7c6   :  { %v4794_v16 = vpop.eup %4793  ;;  %v3034_v53 = vmul.f32 %v4792_v1, %v4790_v4 }
 0x7c7   :  { %3222 = vmatpush2.bf16.msra.mxu1 %v9008_v34  ;;  %3265 = vmatpush2.bf16.msra.mxu0 %v9009_v24  ;;  %v9048_v24 = vld [vmem:[#allocation42_spill] sm:$0xff] }
 0x7c8   :  { %3337 = vmatprep.subr.bf16.mxu1 %v9010_v8  ;;  %3380 = vmatprep.subr.bf16.mxu0 %v9011_v0 }
 0x7c9   :  { %v4796_v41 = vpop.eup %4795 }
 0x7ca   :  { %v3035_v15 = vmul.f32 %v4796_v41, %v4794_v16  ;;  %v9049_v41 = vld [vmem:[#allocation39_spill] sm:$0xff] }
 0x7cc   :  { %v3190_v2 = vpack.c.bf16 %v3035_v15, %v3034_v53 }
 0x7ce   :  { %3223 = vmatprep.mubr.bf16.mxu1 %v3190_v2  ;;  %3266 = vmatprep.mubr.bf16.mxu0 %v3190_v2  ;;  %v9050_v2 = vld [vmem:[#allocation37_spill] sm:$0xff] }
 0x7cf   :  { %3224 = vmatmul.mubr.bf16.vlgmr.msra.gmra.mxu1 %v7583_v60  ;;  %3267 = vmatmul.mubr.bf16.vlgmr.msra.gmra.mxu0 %v7583_v60  ;;  %v9021_v60 = vld [vmem:[#allocation80_spill] sm:$0xff] }
 0x7d0   :  { %3338 = vmatpush1.bf16.msra.mxu1 %v9012_v57  ;;  %3381 = vmatpush1.bf16.msra.mxu0 %v9013_v32 }
 0x7d1   :  { %3339 = vmatprep.subr.bf16.mxu1 %v9014_v11  ;;  %3382 = vmatprep.subr.bf16.mxu0 %v9015_v35  ;;  %v9051_v11 = vld [vmem:[#allocation43_spill] sm:$0xff] }
 0x7d2   :  { %3369 = vmatprep.mubr.bf16.mxu1 %v9016_v37  ;;  %3412 = vmatprep.mubr.bf16.mxu0 %v9016_v37 }
 0x7d4   :  { %3340 = vmatpush1.bf16.msra.mxu1 %v9017_v40  ;;  %3383 = vmatpush1.bf16.msra.mxu0 %v9018_v42  ;;  %v9052_v40 = vld [vmem:[#allocation41_spill] sm:$0xff] }
 0x7d5   :  { %3341 = vmatprep.subr.bf16.mxu1 %v9019_v20  ;;  %3384 = vmatprep.subr.bf16.mxu0 %v9020_v50 }
 0x7d8   :  { %3342 = vmatpush1.bf16.msra.mxu1 %v9021_v60  ;;  %3385 = vmatpush1.bf16.msra.mxu0 %v9022_v28 }
 0x7d9   :  { %3343 = vmatprep.subr.bf16.mxu1 %v9023_v38  ;;  %3386 = vmatprep.subr.bf16.mxu0 %v9024_v19 }
 0x7dc   :  { %3344 = vmatpush1.bf16.msra.mxu1 %v9025_v45  ;;  %3387 = vmatpush1.bf16.msra.mxu0 %v9026_v59 }
 0x7dd   :  { %3345 = vmatprep.subr.bf16.mxu1 %v9027_v25  ;;  %3388 = vmatprep.subr.bf16.mxu0 %v9028_v49 }
 0x7e0   :  { %3346 = vmatpush1.bf16.msra.mxu1 %v9029_v13  ;;  %3389 = vmatpush1.bf16.msra.mxu0 %v9030_v33 }
 0x7e1   :  { %3347 = vmatprep.subr.bf16.mxu1 %v9031_v9  ;;  %3390 = vmatprep.subr.bf16.mxu0 %v9032_v3 }
 0x7e4   :  { %3348 = vmatpush1.bf16.msra.mxu1 %v9033_v61  ;;  %3391 = vmatpush1.bf16.msra.mxu0 %v9034_v52 }
 0x7e5   :  { %3349 = vmatprep.subr.bf16.mxu1 %v9035_v63  ;;  %3392 = vmatprep.subr.bf16.mxu0 %v9036_v55 }
 0x7e8   :  { %3350 = vmatpush1.bf16.msra.mxu1 %v9037_v18  ;;  %3393 = vmatpush1.bf16.msra.mxu0 %v9038_v51 }
 0x7e9   :  { %3351 = vmatprep.subr.bf16.mxu1 %v9039_v56  ;;  %3394 = vmatprep.subr.bf16.mxu0 %v9040_v39 }
 0x7ec   :  { %3352 = vmatpush1.bf16.msra.mxu1 %v9041_v14  ;;  %3395 = vmatpush1.bf16.msra.mxu0 %v9042_v31 }
 0x7ed   :  { %3480 = vmatprep.subr.bf16.mxu1 %v9043_v46  ;;  %3523 = vmatprep.subr.bf16.mxu0 %v9044_v26 }
 0x84a   :  { %v3082_v23 = vpop.f32.mrf.mxu1  ;;  %v3125_v58 = vpop.f32.mrf.mxu0 }
 0x84b   :  { %v3134_v12 = vadd.f32 %v3082_v23, %v9045_v62  ;;  %v3136_v57 = vadd.f32 %v3125_v58, %v9050_v2  ;;  %v7788_v2 = vld [vmem:[%s8303_s5 + $0x84] ss:$16 sps:$4 sm:$0xff]  }
 0x84c   :  { %v3084_v29 = vpop.f32.mrf.mxu1  ;;  %v3127_v43 = vpop.f32.mrf.mxu0 }
 0x84d   :  { %v4118_v48 = vmul.f32 -1.442695, %v3134_v12  ;;  %v3135_v47 = vadd.f32 %v3084_v29, %v9046_v44  ;;  %v3137_v53 = vadd.f32 %v3127_v43, %v9049_v41  ;;  %v7732_v44 = vld [vmem:[%s8303_s5 + $0xe8] ss:$16 sps:$4 sm:$0xff]   ;;  %v7776_v41 = vld [vmem:[%s8303_s5 + $0xa0] ss:$16 sps:$4 sm:$0xff]  }
 0x84e   :  { %v3086_v5 = vpop.f32.mrf.mxu1  ;;  %v3129_v8 = vpop.f32.mrf.mxu0  ;;  %v7756_v43 = vld [vmem:[%s8303_s5 + $0xc8] ss:$16 sps:$4 sm:$0xff]  }
 0x84f   :  { %4797 = vpow2.f32 %v4118_v48  ;;  %v4120_v21 = vmul.f32 -1.442695, %v3135_v47  ;;  %v3138_v4 = vadd.f32 %v3086_v5, %v9047_v36  ;;  %v4122_v32 = vmul.f32 -1.442695, %v3137_v53  ;;  %v7738_v47 = vld [vmem:[%s8303_s5 + $0xc4] ss:$16 sps:$4 sm:$0xff]  }
 0x850   :  { %v3088_v1 = vpop.f32.mrf.mxu1  ;;  %v3131_v15 = vpop.f32.mrf.mxu0  ;;  %v3140_v42 = vadd.f32 %v3129_v8, %v9052_v40  ;;  %v7744_v5 = vld [vmem:[%s8303_s5 + $0xcc] ss:$16 sps:$4 sm:$0xff]   ;;  %v7782_v53 = vld [vmem:[%s8303_s5 + $0xa8] ss:$16 sps:$4 sm:$0xff]  }
 0x851   :  { %4799 = vpow2.f32 %v4120_v21  ;;  %v4119_v34 = vmul.f32 -1.442695, %v3138_v4  ;;  %v3139_v16 = vadd.f32 %v3088_v1, %v9048_v24  ;;  %v3141_v35 = vadd.f32 %v3131_v15, %v9051_v11  ;;  %v7750_v21 = vld [vmem:[%s8303_s5 + $0xc0] ss:$16 sps:$4 sm:$0xff]   ;;  %v7762_v4 = vld [vmem:[%s8303_s5 + $0xa4] ss:$16 sps:$4 sm:$0xff]  }
 0x852   :  { %v7768_v1 = vld [vmem:[%s8303_s5 + $0xac] ss:$16 sps:$4 sm:$0xff]  }
 0x853   :  { %4801 = vpow2.f32 %v4119_v34  ;;  %v4121_v0 = vmul.f32 -1.442695, %v3139_v16  ;;  %v4123_v60 = vmul.f32 -1.442695, %v3141_v35 }
 0x855   :  { %4803 = vpow2.f32 %v4121_v0 }
 0x856   :  { %4805 = vtanh.f32 %v3136_v57  ;;  %v7794_v57 = vld [vmem:[%s8303_s5 + $0x8c] ss:$16 sps:$4 sm:$0xff]  }
 0x857   :  { %4807 = vpow2.f32 %v4122_v32 }
 0x85c   :  { %v4798_v37 = vpop.eup %4797 }
 0x85d   :  { %v3148_v20 = vadd.f32 1.0, %v4798_v37 }
 0x85e   :  { %v4800_v50 = vpop.eup %4799 }
 0x85f   :  { %4809 = vrcp.f32 %v3148_v20  ;;  %v3160_v28 = vadd.f32 1.0, %v4800_v50  ;;  %v7802_v20 = vld [vmem:[%s8303_s5 + $0x80] ss:$16 sps:$4 sm:$0xff]   ;;  %v7808_v50 = vld [vmem:[%s8303_s5 + $0x88] ss:$16 sps:$4 sm:$0xff]  }
 0x860   :  { %v4802_v38 = vpop.eup %4801  ;;  %4811 = vtanh.f32 %v3140_v42 }
 0x861   :  { %4813 = vrcp.f32 %v3160_v28  ;;  %v3149_v19 = vadd.f32 1.0, %v4802_v38  ;;  %v7820_v28 = vld [vmem:[%s8303_s5 + $0x6c] ss:$16 sps:$4 sm:$0xff]  }
 0x862   :  { %v4804_v45 = vpop.eup %4803  ;;  %4815 = vpow2.f32 %v4123_v60  ;;  %v7814_v60 = vld [vmem:[%s8303_s5 + $0x64] ss:$16 sps:$4 sm:$0xff]  }
 0x863   :  { %4817 = vrcp.f32 %v3149_v19  ;;  %v3161_v59 = vadd.f32 1.0, %v4804_v45  ;;  %v4806_v25 = vpop.eup %4805  ;;  %v7826_v45 = vld [vmem:[%s8303_s5 + $0x60] ss:$16 sps:$4 sm:$0xff]  }
 0x864   :  { %v4808_v49 = vpop.eup %4807 }
 0x865   :  { %4819 = vrcp.f32 %v3161_v59  ;;  %v3174_v55 = vadd.f32 1.0, %v4808_v49  ;;  %v7832_v59 = vld [vmem:[%s8303_s5 + $0x68] ss:$16 sps:$4 sm:$0xff]   ;;  %v7844_v49 = vld [vmem:[%s8303_s5 + $0x4c] ss:$16 sps:$4 sm:$0xff]  }
 0x867   :  { %4821 = vrcp.f32 %v3174_v55  ;;  %v7871_v55 = vld [vmem:[%s8303_s5 + $0x2c] ss:$16 sps:$4 sm:$0xff]  }
 0x86c   :  { %v4810_v13 = vpop.eup %4809 }
 0x86d   :  { %v4812_v33 = vpop.eup %4811  ;;  %v3182_v9 = vmul.f32 %v4810_v13, %v4806_v25  ;;  %v7838_v25 = vld [vmem:[%s8303_s5 + $0x44] ss:$16 sps:$4 sm:$0xff]  }
 0x86e   :  { %v4814_v3 = vpop.eup %4813 }
 0x86f   :  { %v4816_v61 = vpop.eup %4815  ;;  %v3180_v52 = vmul.f32 %v4814_v3, %v7576_v27  ;;  %v7857_v3 = vld [vmem:[%s8303_s5 + $0x48] ss:$16 sps:$4 sm:$0xff]  }
 0x870   :  { %v4818_v63 = vpop.eup %4817  ;;  %v3175_v39 = vadd.f32 1.0, %v4816_v61 }
 0x871   :  { %v7712_v18 = vadd.f32 %v3182_v9, %v3180_v52  ;;  %v3183_v51 = vmul.f32 %v4818_v63, %v4812_v33  ;;  %v7851_v9 = vld [vmem:[%s8303_s5 + $0x40] ss:$16 sps:$4 sm:$0xff]   ;;  %v7865_v63 = vld [vmem:[%s8303_s5 + $0x24] ss:$16 sps:$4 sm:$0xff]  }
 0x872   :  { %v4820_v56 = vpop.eup %4819 }
 0x873   :  { %9053 = vst [vmem:[#allocation106_spill] sm:$0xff] %v7712_v18  ;;  %v3181_v14 = vmul.f32 %v4820_v56, %v7579_v7  ;;  %4823 = vtanh.f32 %v7712_v18  ;;  %v7726_v7 = vld [vmem:[%s8303_s5 + $0xe0] ss:$16 sps:$4 sm:$0xff]  }
 0x874   :  { %4825 = vrcp.f32 %v3175_v39  ;;  %v4822_v23 = vpop.eup %4821 }
 0x875   :  { %v7715_v31 = vadd.f32 %v3183_v51, %v3181_v14  ;;  %v7877_v14 = vld [vmem:[%s8303_s5 + $0x20] ss:$16 sps:$4 sm:$0xff]  }
 0x877   :  { %9054 = vst [vmem:[#allocation107_spill] sm:$0xff] %v7715_v31  ;;  %4827 = vtanh.f32 %v7715_v31  ;;  %v8034_v31 = vld [vmem:[%s8303_s5 + $0x168] ss:$16 sps:$4 sm:$0xff]  }
 0x880   :  { %v4824_v62 = vpop.eup %4823 }
 0x881   :  { %v4826_v27 = vpop.eup %4825  ;;  %v3188_v58 = vmul.f32 %v4824_v62, %v4822_v23  ;;  %v7883_v23 = vld [vmem:[%s8303_s5 + $0x28] ss:$16 sps:$4 sm:$0xff]  }
 0x884   :  { %v4828_v12 = vpop.eup %4827 }
 0x885   :  { %v3189_v29 = vmul.f32 %v4828_v12, %v4826_v27  ;;  %v7889_v12 = vld [vmem:[%s8303_s5 + $0x4] ss:$16 sps:$4 sm:$0xff]  }
 0x887   :  { %v7719_v48 = vpack.c.bf16 %v3189_v29, %v3188_v58  ;;  %v7895_v58 = vld [vmem:[%s8303_s5 + $0xc] ss:$16 sps:$4 sm:$0xff]  }
 0x889   :  { %3370 = vmatmul.mubr.bf16.vlgmr.msra.gmra.mxu1 %v7719_v48  ;;  %3413 = vmatmul.mubr.bf16.vlgmr.msra.gmra.mxu0 %v7719_v48 }
 0x88a   :  { %3481 = vmatpush1.bf16.msra.mxu1 %v7726_v7  ;;  %3524 = vmatpush1.bf16.msra.mxu0 %v7732_v44 }
 0x88b   :  { %3482 = vmatprep.subr.bf16.mxu1 %v7738_v47  ;;  %3525 = vmatprep.subr.bf16.mxu0 %v7744_v5 }
 0x88e   :  { %3483 = vmatpush1.bf16.msra.mxu1 %v7750_v21  ;;  %3526 = vmatpush1.bf16.msra.mxu0 %v7756_v43 }
 0x88f   :  { %v3225_v36 = vpop.f32.mrf.mxu1  ;;  %3484 = vmatprep.subr.bf16.mxu1 %v7762_v4  ;;  %3527 = vmatprep.subr.bf16.mxu0 %v7768_v1  ;;  %v3268_v24 = vpop.f32.mrf.mxu0 }
 0x890   :  { %v3226_v34 = vadd.f32 %v3225_v36, %v6531_v54  ;;  %v3269_v61 = vadd.f32 %v3268_v24, %v6563_v10 }
 0x891   :  { %v3227_v16 = vpop.f32.mrf.mxu1  ;;  %v3270_v11 = vpop.f32.mrf.mxu0 }
 0x892   :  { %v4124_v8 = vmul.f32 -1.442695, %v3226_v34  ;;  %v3228_v0 = vadd.f32 %v3227_v16, %v6539_v30  ;;  %3485 = vmatpush1.bf16.msra.mxu1 %v7776_v41  ;;  %3528 = vmatpush1.bf16.msra.mxu0 %v7782_v53  ;;  %v3271_v33 = vadd.f32 %v3270_v11, %v6559_v22  ;;  %v7902_v16 = vld [vmem:[%s8303_s5] ss:$16 sps:$4 sm:$0xff]  }
 0x893   :  { %v3229_v15 = vpop.f32.mrf.mxu1  ;;  %3486 = vmatprep.subr.bf16.mxu1 %v7788_v2  ;;  %3529 = vmatprep.subr.bf16.mxu0 %v7794_v57  ;;  %v3272_v38 = vpop.f32.mrf.mxu0 }
 0x894   :  { %4829 = vpow2.f32 %v4124_v8  ;;  %v4126_v32 = vmul.f32 -1.442695, %v3228_v0  ;;  %v3230_v35 = vadd.f32 %v3229_v15, %v6531_v54  ;;  %v4128_v56 = vmul.f32 -1.442695, %v3271_v33  ;;  %v7908_v8 = vld [vmem:[%s8303_s5 + $0x8] ss:$16 sps:$4 sm:$0xff]  }
 0x895   :  { %v3231_v37 = vpop.f32.mrf.mxu1  ;;  %v3274_v13 = vpop.f32.mrf.mxu0  ;;  %v3273_v34 = vadd.f32 %v3272_v38, %v6563_v10  ;;  %v7914_v15 = vld [vmem:[%s8303_s5 + $0x1e4] ss:$16 sps:$4 sm:$0xff]   ;;  %v7950_v38 = vld [vmem:[%s8303_s5 + $0x1c0] ss:$16 sps:$4 sm:$0xff]   ;;  %v7968_v33 = vld [vmem:[%s8303_s5 + $0x1ac] ss:$16 sps:$4 sm:$0xff]  }
 0x896   :  { %4831 = vpow2.f32 %v4126_v32  ;;  %v4125_v40 = vmul.f32 -1.442695, %v3230_v35  ;;  %v3232_v42 = vadd.f32 %v3231_v37, %v6539_v30  ;;  %3487 = vmatpush1.bf16.msra.mxu1 %v7802_v20  ;;  %3530 = vmatpush1.bf16.msra.mxu0 %v7808_v50  ;;  %v3275_v52 = vadd.f32 %v3274_v13, %v6559_v22  ;;  %v7920_v32 = vld [vmem:[%s8303_s5 + $0x1ec] ss:$16 sps:$4 sm:$0xff]   ;;  %v7926_v35 = vld [vmem:[%s8303_s5 + $0x1e0] ss:$16 sps:$4 sm:$0xff]  }
 0x897   :  { %3488 = vmatprep.subr.bf16.mxu1 %v7814_v60  ;;  %3531 = vmatprep.subr.bf16.mxu0 %v7820_v28  ;;  %v7932_v37 = vld [vmem:[%s8303_s5 + $0x1e8] ss:$16 sps:$4 sm:$0xff]   ;;  %v7962_v13 = vld [vmem:[%s8303_s5 + $0x1a4] ss:$16 sps:$4 sm:$0xff]   ;;  %v8001_v30 = vld [vmem:[%s8303_s5 + $0x180] ss:$16 sps:$4 sm:$0xff]  }
 0x898   :  { %4833 = vpow2.f32 %v4125_v40  ;;  %v4127_v19 = vmul.f32 -1.442695, %v3232_v42  ;;  %v4129_v27 = vmul.f32 -1.442695, %v3275_v52  ;;  %v7938_v40 = vld [vmem:[%s8303_s5 + $0x1c4] ss:$16 sps:$4 sm:$0xff]  }
 0x899   :  { %v7944_v42 = vld [vmem:[%s8303_s5 + $0x1cc] ss:$16 sps:$4 sm:$0xff]   ;;  %v8007_v54 = vld [vmem:[%s8303_s5 + $0x188] ss:$16 sps:$4 sm:$0xff]  }
 0x89a   :  { %4835 = vpow2.f32 %v4127_v19  ;;  %3489 = vmatpush1.bf16.msra.mxu1 %v7826_v45  ;;  %3532 = vmatpush1.bf16.msra.mxu0 %v7832_v59  ;;  %v7956_v19 = vld [vmem:[%s8303_s5 + $0x1c8] ss:$16 sps:$4 sm:$0xff]  }
 0x89b   :  { %3490 = vmatprep.subr.bf16.mxu1 %v7838_v25  ;;  %3533 = vmatprep.subr.bf16.mxu0 %v7844_v49  ;;  %4837 = vtanh.f32 %v3269_v61 }
 0x89e   :  { %3491 = vmatpush1.bf16.msra.mxu1 %v7851_v9  ;;  %3534 = vmatpush1.bf16.msra.mxu0 %v7857_v3 }
 0x89f   :  { %3492 = vmatprep.subr.bf16.mxu1 %v7865_v63  ;;  %3535 = vmatprep.subr.bf16.mxu0 %v7871_v55 }
 0x8a1   :  { %v4830_v51 = vpop.eup %4829 }
 0x8a2   :  { %v3283_v39 = vadd.f32 1.0, %v4830_v51  ;;  %3493 = vmatpush1.bf16.msra.mxu1 %v7877_v14  ;;  %3536 = vmatpush1.bf16.msra.mxu0 %v7883_v23 }
 0x8a3   :  { %v4832_v62 = vpop.eup %4831  ;;  %3494 = vmatprep.subr.bf16.mxu1 %v7889_v12  ;;  %3537 = vmatprep.subr.bf16.mxu0 %v7895_v58 }
 0x8a4   :  { %4839 = vrcp.f32 %v3283_v39  ;;  %v3295_v29 = vadd.f32 1.0, %v4832_v62  ;;  %v7980_v39 = vld [vmem:[%s8303_s5 + $0x1a8] ss:$16 sps:$4 sm:$0xff]  }
 0x8a5   :  { %v4834_v36 = vpop.eup %4833  ;;  %4841 = vpow2.f32 %v4128_v56  ;;  %v7974_v56 = vld [vmem:[%s8303_s5 + $0x1a0] ss:$16 sps:$4 sm:$0xff]  }
 0x8a6   :  { %4843 = vrcp.f32 %v3295_v29  ;;  %v3284_v24 = vadd.f32 1.0, %v4834_v36  ;;  %3495 = vmatpush1.bf16.msra.mxu1 %v7902_v16  ;;  %3538 = vmatpush1.bf16.msra.mxu0 %v7908_v8  ;;  %v7992_v29 = vld [vmem:[%s8303_s5 + $0x18c] ss:$16 sps:$4 sm:$0xff]  }
 0x8a7   :  { %v4836_v0 = vpop.eup %4835  ;;  %4845 = vpow2.f32 %v4129_v27  ;;  %3496 = vmatprep.subr.bf16.mxu1 %v7914_v15  ;;  %3539 = vmatprep.subr.bf16.mxu0 %v7920_v32  ;;  %v7986_v27 = vld [vmem:[%s8303_s5 + $0x184] ss:$16 sps:$4 sm:$0xff]  }
 0x8a8   :  { %4847 = vrcp.f32 %v3284_v24  ;;  %v3296_v11 = vadd.f32 1.0, %v4836_v0  ;;  %v4838_v61 = vpop.eup %4837 }
 0x8a9   :  { %4849 = vtanh.f32 %v3273_v34 }
 0x8aa   :  { %4851 = vrcp.f32 %v3296_v11  ;;  %3497 = vmatpush2.bf16.msra.mxu1 %v7926_v35  ;;  %3540 = vmatpush2.bf16.msra.mxu0 %v7932_v37 }
 0x8ab   :  { %3498 = vmatprep.subr.bf16.mxu1 %v7938_v40  ;;  %3541 = vmatprep.subr.bf16.mxu0 %v7944_v42 }
 0x8ae   :  { %3499 = vmatpush2.bf16.msra.mxu1 %v7950_v38  ;;  %3542 = vmatpush2.bf16.msra.mxu0 %v7956_v19 }
 0x8af   :  { %3500 = vmatprep.subr.bf16.mxu1 %v7962_v13  ;;  %3543 = vmatprep.subr.bf16.mxu0 %v7968_v33 }
 0x8b1   :  { %v4840_v52 = vpop.eup %4839 }
 0x8b2   :  { %v4842_v51 = vpop.eup %4841  ;;  %3501 = vmatpush2.bf16.msra.mxu1 %v7974_v56  ;;  %3544 = vmatpush2.bf16.msra.mxu0 %v7980_v39  ;;  %v3317_v34 = vmul.f32 %v4840_v52, %v4838_v61  ;;  %v8013_v52 = vld [vmem:[%s8303_s5 + $0x164] ss:$16 sps:$4 sm:$0xff]  }
 0x8b3   :  { %v4844_v62 = vpop.eup %4843  ;;  %3502 = vmatprep.subr.bf16.mxu1 %v7986_v27  ;;  %3545 = vmatprep.subr.bf16.mxu0 %v7992_v29  ;;  %v3309_v11 = vadd.f32 1.0, %v4842_v51  ;;  %v8019_v51 = vld [vmem:[%s8303_s5 + $0x16c] ss:$16 sps:$4 sm:$0xff]  }
 0x8b4   :  { %v4846_v36 = vpop.eup %4845  ;;  %v3315_v24 = vmul.f32 %v4844_v62, %v7640_v6 }
 0x8b5   :  { %v4848_v0 = vpop.eup %4847  ;;  %v3310_v61 = vadd.f32 1.0, %v4846_v36  ;;  %4853 = vrcp.f32 %v3309_v11  ;;  %v8028_v36 = vld [vmem:[%s8303_s5 + $0x160] ss:$16 sps:$4 sm:$0xff]   ;;  %v8060_v11 = vld [vmem:[%s8303_s5 + $0x148] ss:$16 sps:$4 sm:$0xff]  }
 0x8b6   :  { %v4850_v10 = vpop.eup %4849  ;;  %v7996_v22 = vadd.f32 %v3317_v34, %v3315_v24  ;;  %3503 = vmatpush2.bf16.msra.mxu1 %v8001_v30  ;;  %3546 = vmatpush2.bf16.msra.mxu0 %v8007_v54  ;;  %9058 = vst [vmem:[#allocation117_spill] sm:$0xff] %v8060_v11 }
 0x8b7   :  { %v4852_v6 = vpop.eup %4851  ;;  %3504 = vmatprep.subr.bf16.mxu1 %v8013_v52  ;;  %3547 = vmatprep.subr.bf16.mxu0 %v8019_v51  ;;  %v3318_v62 = vmul.f32 %v4850_v10, %v4848_v0  ;;  %v8041_v10 = vld [vmem:[%s8303_s5 + $0x144] ss:$16 sps:$4 sm:$0xff]   ;;  %v8054_v0 = vld [vmem:[%s8303_s5 + $0x140] ss:$16 sps:$4 sm:$0xff]  }
 0x8b8   :  { %9055 = vst [vmem:[#allocation108_spill] sm:$0xff] %v7996_v22  ;;  %v3316_v34 = vmul.f32 %v4852_v6, %v7647_v17  ;;  %4855 = vtanh.f32 %v7996_v22  ;;  %v8047_v17 = vld [vmem:[%s8303_s5 + $0x14c] ss:$16 sps:$4 sm:$0xff]   ;;  %9057 = vst [vmem:[#allocation116_spill] sm:$0xff] %v8054_v0  ;;  %v8066_v6 = vld [vmem:[%s8303_s5 + $0x124] ss:$16 sps:$4 sm:$0xff]  }
 0x8b9   :  { %4857 = vrcp.f32 %v3310_v61  ;;  %9059 = vst [vmem:[#allocation12_spill] sm:$0xff] %v8066_v6  ;;  %v8072_v61 = vld [vmem:[%s8303_s5 + $0x12c] ss:$16 sps:$4 sm:$0xff]  }
 0x8ba   :  { %v8023_v24 = vadd.f32 %v3318_v62, %v3316_v34  ;;  %3505 = vmatpush2.bf16.msra.mxu1 %v8028_v36  ;;  %3548 = vmatpush2.bf16.msra.mxu0 %v8034_v31  ;;  %9060 = vst [vmem:[#allocation14_spill] sm:$0xff] %v8072_v61  ;;  %v8078_v62 = vld [vmem:[%s8303_s5 + $0x120] ss:$16 sps:$4 sm:$0xff]   ;;  %v8084_v34 = vld [vmem:[%s8303_s5 + $0x128] ss:$16 sps:$4 sm:$0xff]  }
 0x8bb   :  { %3506 = vmatprep.subr.bf16.mxu1 %v8041_v10  ;;  %3549 = vmatprep.subr.bf16.mxu0 %v8047_v17  ;;  %9061 = vst [vmem:[#allocation16_spill] sm:$0xff] %v8078_v62  ;;  %9062 = vst [vmem:[#allocation18_spill] sm:$0xff] %v8084_v34  ;;  %v8096_v22 = vld [vmem:[%s8303_s5 + $0x10c] ss:$16 sps:$4 sm:$0xff]  }
 0x8bc   :  { %9056 = vst [vmem:[#allocation109_spill] sm:$0xff] %v8023_v24  ;;  %4859 = vtanh.f32 %v8023_v24  ;;  %v8090_v24 = vld [vmem:[%s8303_s5 + $0x104] ss:$16 sps:$4 sm:$0xff]   ;;  %9064 = vst [vmem:[#allocation13_spill] sm:$0xff] %v8096_v22 }
 0x8bd   :  { %9063 = vst [vmem:[#allocation15_spill] sm:$0xff] %v8090_v24 }
 0x8be   :  { %3507 = vmatpush2.bf16.msra.mxu1 %v8054_v0  ;;  %3550 = vmatpush2.bf16.msra.mxu0 %v8060_v11 }
 0x8bf   :  { %3508 = vmatprep.subr.bf16.mxu1 %v8066_v6  ;;  %3551 = vmatprep.subr.bf16.mxu0 %v8072_v61 }
 0x8c2   :  { %3509 = vmatpush2.bf16.msra.mxu1 %v8078_v62  ;;  %3552 = vmatpush2.bf16.msra.mxu0 %v8084_v34  ;;  %v4854_v18 = vpop.eup %4853  ;;  %v8102_v62 = vld [vmem:[%s8303_s5 + $0x100] ss:$16 sps:$4 sm:$0xff]   ;;  %v8108_v34 = vld [vmem:[%s8303_s5 + $0x108] ss:$16 sps:$4 sm:$0xff]  }
 0x8c3   :  { %3510 = vmatprep.subr.bf16.mxu1 %v8090_v24  ;;  %3553 = vmatprep.subr.bf16.mxu0 %v8096_v22 }
 0x8c5   :  { %v4856_v24 = vpop.eup %4855 }
 0x8c6   :  { %3511 = vmatpush2.bf16.msra.mxu1 %v8102_v62  ;;  %3554 = vmatpush2.bf16.msra.mxu0 %v8108_v34  ;;  %v4858_v22 = vpop.eup %4857  ;;  %v3323_v6 = vmul.f32 %v4856_v24, %v4854_v18  ;;  %v9070_v18 = vld [vmem:[#allocation18_spill] sm:$0xff] }
 0x8c7   :  { %3616 = vmatprep.subr.bf16.mxu1 %v9043_v46  ;;  %3659 = vmatprep.subr.bf16.mxu0 %v9044_v26  ;;  %v9066_v46 = vld [vmem:[#allocation117_spill] sm:$0xff]  ;;  %v9067_v26 = vld [vmem:[#allocation12_spill] sm:$0xff]  ;;  %v9081_v24 = vld [vmem:[#allocation106_spill] sm:$0xff] }
 0x8c9   :  { %v4860_v61 = vpop.eup %4859 }
 0x8ca   :  { %v3324_v11 = vmul.f32 %v4860_v61, %v4858_v22  ;;  %v9065_v22 = vld [vmem:[#allocation116_spill] sm:$0xff]  ;;  %v9082_v61 = vld [vmem:[#allocation107_spill] sm:$0xff] }
 0x8cc   :  { %v3479_v0 = vpack.c.bf16 %v3324_v11, %v3323_v6 }
 0x8ce   :  { %3512 = vmatprep.mubr.bf16.mxu1 %v3479_v0  ;;  %3555 = vmatprep.mubr.bf16.mxu0 %v3479_v0 }
 0x8cf   :  { %3513 = vmatmul.mubr.bf16.vlgmr.msra.gmra.mxu1 %v7719_v48  ;;  %3556 = vmatmul.mubr.bf16.vlgmr.msra.gmra.mxu0 %v7719_v48  ;;  %v9071_v48 = vld [vmem:[#allocation15_spill] sm:$0xff] }
 0x8d0   :  { %3617 = vmatpush1.bf16.msra.mxu1 %v7726_v7  ;;  %3660 = vmatpush1.bf16.msra.mxu0 %v7732_v44  ;;  %v9072_v7 = vld [vmem:[#allocation13_spill] sm:$0xff]  ;;  %v9073_v44 = vld [vmem:[#allocation44_spill] sm:$0xff] }
 0x8d1   :  { %3618 = vmatprep.subr.bf16.mxu1 %v7738_v47  ;;  %3661 = vmatprep.subr.bf16.mxu0 %v7744_v5 }
 0x8d4   :  { %3619 = vmatpush1.bf16.msra.mxu1 %v7750_v21  ;;  %3662 = vmatpush1.bf16.msra.mxu0 %v7756_v43 }
 0x8d5   :  { %3620 = vmatprep.subr.bf16.mxu1 %v7762_v4  ;;  %3663 = vmatprep.subr.bf16.mxu0 %v7768_v1  ;;  %v9074_v4 = vld [vmem:[#allocation46_spill] sm:$0xff] }
 0x8d8   :  { %3621 = vmatpush1.bf16.msra.mxu1 %v7776_v41  ;;  %3664 = vmatpush1.bf16.msra.mxu0 %v7782_v53 }
 0x8d9   :  { %3622 = vmatprep.subr.bf16.mxu1 %v7788_v2  ;;  %3665 = vmatprep.subr.bf16.mxu0 %v7794_v57  ;;  %v9075_v57 = vld [vmem:[#allocation48_spill] sm:$0xff] }
 0x8dc   :  { %3623 = vmatpush1.bf16.msra.mxu1 %v7802_v20  ;;  %3666 = vmatpush1.bf16.msra.mxu0 %v7808_v50 }
 0x8dd   :  { %3624 = vmatprep.subr.bf16.mxu1 %v7814_v60  ;;  %3667 = vmatprep.subr.bf16.mxu0 %v7820_v28  ;;  %v9076_v28 = vld [vmem:[#allocation50_spill] sm:$0xff] }
 0x8e0   :  { %3625 = vmatpush1.bf16.msra.mxu1 %v7826_v45  ;;  %3668 = vmatpush1.bf16.msra.mxu0 %v7832_v59 }
 0x8e1   :  { %3626 = vmatprep.subr.bf16.mxu1 %v7838_v25  ;;  %3669 = vmatprep.subr.bf16.mxu0 %v7844_v49  ;;  %v9077_v49 = vld [vmem:[#allocation47_spill] sm:$0xff] }
 0x8e4   :  { %3627 = vmatpush1.bf16.msra.mxu1 %v7851_v9  ;;  %3670 = vmatpush1.bf16.msra.mxu0 %v7857_v3 }
 0x8e5   :  { %3628 = vmatprep.subr.bf16.mxu1 %v7865_v63  ;;  %3671 = vmatprep.subr.bf16.mxu0 %v7871_v55  ;;  %v9078_v63 = vld [vmem:[#allocation45_spill] sm:$0xff] }
 0x8e8   :  { %3629 = vmatpush1.bf16.msra.mxu1 %v7877_v14  ;;  %3672 = vmatpush1.bf16.msra.mxu0 %v7883_v23  ;;  %v9079_v23 = vld [vmem:[#allocation51_spill] sm:$0xff] }
 0x8e9   :  { %3630 = vmatprep.subr.bf16.mxu1 %v7889_v12  ;;  %3673 = vmatprep.subr.bf16.mxu0 %v7895_v58 }
 0x8ec   :  { %3631 = vmatpush1.bf16.msra.mxu1 %v7902_v16  ;;  %3674 = vmatpush1.bf16.msra.mxu0 %v7908_v8  ;;  %v9080_v16 = vld [vmem:[#allocation49_spill] sm:$0xff] }
 0x8ed   :  { %3632 = vmatprep.subr.bf16.mxu1 %v7914_v15  ;;  %3675 = vmatprep.subr.bf16.mxu0 %v7920_v32 }
 0x8f0   :  { %3633 = vmatpush2.bf16.msra.mxu1 %v7926_v35  ;;  %3676 = vmatpush2.bf16.msra.mxu0 %v7932_v37 }
 0x8f1   :  { %3634 = vmatprep.subr.bf16.mxu1 %v7938_v40  ;;  %3677 = vmatprep.subr.bf16.mxu0 %v7944_v42 }
 0x8f4   :  { %3635 = vmatpush2.bf16.msra.mxu1 %v7950_v38  ;;  %3678 = vmatpush2.bf16.msra.mxu0 %v7956_v19 }
 0x8f5   :  { %3636 = vmatprep.subr.bf16.mxu1 %v7962_v13  ;;  %3679 = vmatprep.subr.bf16.mxu0 %v7968_v33 }
 0x8f8   :  { %3637 = vmatpush2.bf16.msra.mxu1 %v7974_v56  ;;  %3680 = vmatpush2.bf16.msra.mxu0 %v7980_v39 }
 0x8f9   :  { %3638 = vmatprep.subr.bf16.mxu1 %v7986_v27  ;;  %3681 = vmatprep.subr.bf16.mxu0 %v7992_v29 }
 0x8fc   :  { %3639 = vmatpush2.bf16.msra.mxu1 %v8001_v30  ;;  %3682 = vmatpush2.bf16.msra.mxu0 %v8007_v54  ;;  %v9068_v30 = vld [vmem:[#allocation14_spill] sm:$0xff]  ;;  %v9069_v54 = vld [vmem:[#allocation16_spill] sm:$0xff] }
 0x8fd   :  { %3640 = vmatprep.subr.bf16.mxu1 %v8013_v52  ;;  %3683 = vmatprep.subr.bf16.mxu0 %v8019_v51 }
 0x900   :  { %3641 = vmatpush2.bf16.msra.mxu1 %v8028_v36  ;;  %3684 = vmatpush2.bf16.msra.mxu0 %v8034_v31 }
 0x901   :  { %3642 = vmatprep.subr.bf16.mxu1 %v8041_v10  ;;  %3685 = vmatprep.subr.bf16.mxu0 %v8047_v17 }
 0x904   :  { %3643 = vmatpush2.bf16.msra.mxu1 %v9065_v22  ;;  %3686 = vmatpush2.bf16.msra.mxu0 %v9066_v46 }
 0x905   :  { %3644 = vmatprep.subr.bf16.mxu1 %v9067_v26  ;;  %3687 = vmatprep.subr.bf16.mxu0 %v9068_v30 }
 0x908   :  { %3645 = vmatpush2.bf16.msra.mxu1 %v9069_v54  ;;  %3688 = vmatpush2.bf16.msra.mxu0 %v9070_v18 }
 0x909   :  { %3646 = vmatprep.subr.bf16.mxu1 %v9071_v48  ;;  %3689 = vmatprep.subr.bf16.mxu0 %v9072_v7 }
 0x90c   :  { %3647 = vmatpush2.bf16.msra.mxu1 %v8102_v62  ;;  %3690 = vmatpush2.bf16.msra.mxu0 %v8108_v34 }
 0x949   :  { %v3371_v31 = vpop.f32.mrf.mxu1  ;;  %v3414_v5 = vpop.f32.mrf.mxu0 }
 0x94a   :  { %v3423_v47 = vadd.f32 %v3371_v31, %v9073_v44  ;;  %v3425_v55 = vadd.f32 %v3414_v5, %v9078_v63  ;;  %v9083_v31 = vld [vmem:[#allocation110_spill] sm:$0xff] }
 0x94b   :  { %v3373_v21 = vpop.f32.mrf.mxu1  ;;  %v3416_v2 = vpop.f32.mrf.mxu0 }
 0x94c   :  { %v4130_v43 = vmul.f32 -1.442695, %v3423_v47  ;;  %v3424_v1 = vadd.f32 %v3373_v21, %v9074_v4  ;;  %v3426_v9 = vadd.f32 %v3416_v2, %v9077_v49  ;;  %v9086_v49 = vld [vmem:[#allocation113_spill] sm:$0xff] }
 0x94d   :  { %v3375_v41 = vpop.f32.mrf.mxu1  ;;  %v3418_v59 = vpop.f32.mrf.mxu0 }
 0x94e   :  { %4861 = vpow2.f32 %v4130_v43  ;;  %v4132_v53 = vmul.f32 -1.442695, %v3424_v1  ;;  %v3427_v20 = vadd.f32 %v3375_v41, %v9075_v57  ;;  %v4134_v14 = vmul.f32 -1.442695, %v3426_v9  ;;  %v9084_v43 = vld [vmem:[#allocation111_spill] sm:$0xff] }
 0x94f   :  { %v3377_v50 = vpop.f32.mrf.mxu1  ;;  %v3420_v3 = vpop.f32.mrf.mxu0  ;;  %v3429_v8 = vadd.f32 %v3418_v59, %v9080_v16  ;;  %v9085_v59 = vld [vmem:[#allocation112_spill] sm:$0xff] }
 0x950   :  { %4863 = vpow2.f32 %v4132_v53  ;;  %v4131_v60 = vmul.f32 -1.442695, %v3427_v20  ;;  %v3428_v45 = vadd.f32 %v3377_v50, %v9076_v28  ;;  %v3430_v12 = vadd.f32 %v3420_v3, %v9079_v23 }
 0x952   :  { %4865 = vpow2.f32 %v4131_v60  ;;  %v4133_v25 = vmul.f32 -1.442695, %v3428_v45  ;;  %v4135_v35 = vmul.f32 -1.442695, %v3430_v12 }
 0x954   :  { %4867 = vpow2.f32 %v4133_v25 }
 0x955   :  { %4869 = vtanh.f32 %v3425_v55 }
 0x956   :  { %4871 = vpow2.f32 %v4134_v14 }
 0x95b   :  { %v4862_v58 = vpop.eup %4861 }
 0x95c   :  { %v3437_v15 = vadd.f32 1.0, %v4862_v58 }
 0x95d   :  { %v4864_v32 = vpop.eup %4863 }
 0x95e   :  { %4873 = vrcp.f32 %v3437_v15  ;;  %v3449_v37 = vadd.f32 1.0, %v4864_v32 }
 0x95f   :  { %v4866_v40 = vpop.eup %4865  ;;  %4875 = vtanh.f32 %v3429_v8 }
 0x960   :  { %4877 = vrcp.f32 %v3449_v37  ;;  %v3438_v42 = vadd.f32 1.0, %v4866_v40 }
 0x961   :  { %v4868_v38 = vpop.eup %4867  ;;  %4879 = vpow2.f32 %v4135_v35 }
 0x962   :  { %4881 = vrcp.f32 %v3438_v42  ;;  %v3450_v19 = vadd.f32 1.0, %v4868_v38  ;;  %v4870_v13 = vpop.eup %4869 }
 0x963   :  { %v4872_v33 = vpop.eup %4871 }
 0x964   :  { %4883 = vrcp.f32 %v3450_v19  ;;  %v3463_v52 = vadd.f32 1.0, %v4872_v33  ;;  %v9087_v33 = vld [vmem:[#allocation108_spill] sm:$0xff] }
 0x966   :  { %4885 = vrcp.f32 %v3463_v52 }
 0x96b   :  { %v4874_v56 = vpop.eup %4873 }
 0x96c   :  { %v4876_v39 = vpop.eup %4875  ;;  %v3471_v27 = vmul.f32 %v4874_v56, %v4870_v13 }
 0x96d   :  { %v4878_v29 = vpop.eup %4877 }
 0x96e   :  { %v4880_v51 = vpop.eup %4879  ;;  %v3469_v36 = vmul.f32 %v4878_v29, %v9081_v24 }
 0x96f   :  { %v4882_v10 = vpop.eup %4881  ;;  %v3464_v6 = vadd.f32 1.0, %v4880_v51 }
 0x970   :  { %v3473_v17 = vadd.f32 %v3471_v27, %v3469_v36  ;;  %v3472_v0 = vmul.f32 %v4882_v10, %v4876_v39  ;;  %v9088_v10 = vld [vmem:[#allocation109_spill] sm:$0xff] }
 0x971   :  { %v4884_v11 = vpop.eup %4883 }
 0x972   :  { %3752 = vst [vmem:[%s8307_s13] sm:$0xff] %v3473_v17  ;;  %v3470_v62 = vmul.f32 %v4884_v11, %v9082_v61  ;;  %4887 = vtanh.f32 %v3473_v17 }
 0x973   :  { %4889 = vrcp.f32 %v3464_v6  ;;  %v4886_v22 = vpop.eup %4885 }
 0x974   :  { %v3474_v34 = vadd.f32 %v3472_v0, %v3470_v62 }
 0x976   :  { %3753 = vst [vmem:[%s8307_s13 + $0x8] sm:$0xff] %v3474_v34  ;;  %4891 = vtanh.f32 %v3474_v34 }
 0x97f   :  { %v4888_v46 = vpop.eup %4887 }
 0x980   :  { %v3477_v26 = vmul.f32 %v4888_v46, %v4886_v22  ;;  %v4890_v30 = vpop.eup %4889 }
 0x982   :  { %3750 = vst [vmem:[%s8308_s12] sm:$0xff] %v3477_v26 }
 0x983   :  { %v4892_v54 = vpop.eup %4891 }
 0x984   :  { %v3478_v18 = vmul.f32 %v4892_v54, %v4890_v30  ;;  %v3774_v30 = vld [vmem:[%s8309_s7 + $0x70] sm:$0xff]  ;;  %v3773_v54 = vld [vmem:[%s8309_s7 + $0x68] sm:$0xff] }
 0x986   :  { %v8196_v48 = vpack.c.bf16 %v3478_v18, %v3477_v26  ;;  %3751 = vst [vmem:[%s8308_s12 + $0x8] sm:$0xff] %v3478_v18  ;;  %v3775_v26 = vld [vmem:[%s8309_s7 + $0x78] sm:$0xff]  ;;  %v3772_v18 = vld [vmem:[%s8309_s7 + $0x60] sm:$0xff] }
 0x987   :  { %4209 = vmatprep.subr.mxu1 %v3775_v26 }
 0x98f   :  { %v3514_v7 = vpop.f32.mrf.mxu1  ;;  %v3557_v47 = vpop.f32.mrf.mxu0 }
 0x990   :  { %v3515_v44 = vadd.f32 %v3514_v7, %v9083_v31  ;;  %v3558_v9 = vadd.f32 %v3557_v47, %v9086_v49  ;;  %v3770_v7 = vld [vmem:[%s8309_s7 + $0x50] sm:$0xff]  ;;  %v3768_v47 = vld [vmem:[%s8309_s7 + $0x40] sm:$0xff] }
 0x991   :  { %v3516_v5 = vpop.f32.mrf.mxu1  ;;  %v3559_v53 = vpop.f32.mrf.mxu0 }
 0x992   :  { %v4136_v21 = vmul.f32 -1.442695, %v3515_v44  ;;  %v3517_v4 = vadd.f32 %v3516_v5, %v9084_v43  ;;  %v3560_v25 = vadd.f32 %v3559_v53, %v9085_v59  ;;  %v3769_v44 = vld [vmem:[%s8309_s7 + $0x48] sm:$0xff]  ;;  %v3767_v5 = vld [vmem:[%s8309_s7 + $0x38] sm:$0xff]  ;;  %v3762_v53 = vld [vmem:[%s8309_s7 + $0x10] sm:$0xff] }
 0x993   :  { %v3518_v1 = vpop.f32.mrf.mxu1  ;;  %v3561_v60 = vpop.f32.mrf.mxu0 }
 0x994   :  { %4893 = vpow2.f32 %v4136_v21  ;;  %v4138_v41 = vmul.f32 -1.442695, %v3517_v4  ;;  %v3519_v2 = vadd.f32 %v3518_v1, %v9083_v31  ;;  %v4140_v55 = vmul.f32 -1.442695, %v3560_v25  ;;  %v3766_v21 = vld [vmem:[%s8309_s7 + $0x30] sm:$0xff]  ;;  %v3765_v4 = vld [vmem:[%s8309_s7 + $0x28] sm:$0xff] }
 0x995   :  { %v3520_v57 = vpop.f32.mrf.mxu1  ;;  %v3563_v45 = vpop.f32.mrf.mxu0  ;;  %v3562_v8 = vadd.f32 %v3561_v60, %v9086_v49  ;;  %v3764_v1 = vld [vmem:[%s8309_s7 + $0x20] sm:$0xff] }
 0x996   :  { %4895 = vpow2.f32 %v4138_v41  ;;  %v4137_v20 = vmul.f32 -1.442695, %v3519_v2  ;;  %v3521_v50 = vadd.f32 %v3520_v57, %v9084_v43  ;;  %v3564_v3 = vadd.f32 %v3563_v45, %v9085_v59  ;;  %v3763_v41 = vld [vmem:[%s8309_s7 + $0x18] sm:$0xff]  ;;  %v3761_v2 = vld [vmem:[%s8309_s7 + $0x8] sm:$0xff]  ;;  %v3760_v57 = vld [vmem:[%s8309_s7] sm:$0xff] }
 0x998   :  { %4897 = vpow2.f32 %v4137_v20  ;;  %v4139_v28 = vmul.f32 -1.442695, %v3521_v50  ;;  %v4141_v12 = vmul.f32 -1.442695, %v3564_v3  ;;  %v19_v20 = vstv %s8310_s8 }
 0x999   :  { %20 = vst [vmem:[#allocation3] sm:$0x1] %v19_v20 }
 0x99a   :  { %4899 = vpow2.f32 %v4139_v28 }
 0x99b   :  { %4901 = vtanh.f32 %v3558_v9 }
 0x9a1   :  { %v4894_v63 = vpop.eup %4893 }
 0x9a2   :  { %v3572_v14 = vadd.f32 1.0, %v4894_v63 }
 0x9a3   :  { %v4896_v23 = vpop.eup %4895 }
 0x9a4   :  { %4903 = vrcp.f32 %v3572_v14  ;;  %v3584_v58 = vadd.f32 1.0, %v4896_v23 }
 0x9a5   :  { %v4898_v16 = vpop.eup %4897  ;;  %4905 = vpow2.f32 %v4140_v55 }
 0x9a6   :  { %4907 = vrcp.f32 %v3584_v58  ;;  %v3573_v15 = vadd.f32 1.0, %v4898_v16 }
 0x9a7   :  { %v4900_v32 = vpop.eup %4899  ;;  %4909 = vpow2.f32 %v4141_v12 }
 0x9a8   :  { %4911 = vrcp.f32 %v3573_v15  ;;  %v3585_v35 = vadd.f32 1.0, %v4900_v32  ;;  %v4902_v37 = vpop.eup %4901 }
 0x9a9   :  { %4913 = vtanh.f32 %v3562_v8 }
 0x9aa   :  { %4915 = vrcp.f32 %v3585_v35 }
 0x9b1   :  { %v4904_v40 = vpop.eup %4903 }
 0x9b2   :  { %v4906_v42 = vpop.eup %4905  ;;  %v3606_v13 = vmul.f32 %v4904_v40, %v4902_v37 }
 0x9b3   :  { %v4908_v38 = vpop.eup %4907  ;;  %v3598_v27 = vadd.f32 1.0, %v4906_v42 }
 0x9b4   :  { %v4910_v19 = vpop.eup %4909  ;;  %v3604_v56 = vmul.f32 %v4908_v38, %v9087_v33 }
 0x9b5   :  { %v4912_v39 = vpop.eup %4911  ;;  %v3599_v24 = vadd.f32 1.0, %v4910_v19  ;;  %4917 = vrcp.f32 %v3598_v27 }
 0x9b6   :  { %v4914_v29 = vpop.eup %4913  ;;  %v8210_v52 = vadd.f32 %v3606_v13, %v3604_v56 }
 0x9b7   :  { %v4916_v51 = vpop.eup %4915  ;;  %v3607_v36 = vmul.f32 %v4914_v29, %v4912_v39 }
 0x9b8   :  { %v3605_v17 = vmul.f32 %v4916_v51, %v9088_v10  ;;  %4919 = vtanh.f32 %v8210_v52 }
 0x9b9   :  { %4921 = vrcp.f32 %v3599_v24 }
 0x9ba   :  { %v8213_v0 = vadd.f32 %v3607_v36, %v3605_v17 }
 0x9bc   :  { %4923 = vtanh.f32 %v8213_v0 }
 0x9c2   :  { %v4918_v11 = vpop.eup %4917 }
 0x9c5   :  { %v4920_v6 = vpop.eup %4919 }
 0x9c6   :  { %v4922_v61 = vpop.eup %4921  ;;  %v3612_v34 = vmul.f32 %v4920_v6, %v4918_v11 }
 0x9c9   :  { %v4924_v62 = vpop.eup %4923 }
 0x9ca   :  { %v3613_v22 = vmul.f32 %v4924_v62, %v4922_v61 }
 0x9cc   :  { %v3615_v46 = vpack.c.bf16 %v3613_v22, %v3612_v34 }
 0x9ce   :  { %3648 = vmatprep.mubr.bf16.mxu1 %v3615_v46  ;;  %3691 = vmatprep.mubr.bf16.mxu0 %v3615_v46 }
 0x9cf   :  { %3649 = vmatmul.mubr.bf16.vlgmr.msra.gmra.mxu1 %v8196_v48  ;;  %3692 = vmatmul.mubr.bf16.vlgmr.msra.gmra.mxu0 %v8196_v48  ;;  %v3771_v48 = vld [vmem:[%s8309_s7 + $0x58] sm:$0xff] }
 0x9d0   :  { %4210 = vmatpush3.msra.mxu1 %v3775_v26 }
 0x9d1   :  { %4211 = vmatprep.subr.mxu1 %v3774_v30 }
 0x9d2   :  { %4212 = vmatpush3.msra.mxu1 %v3774_v30 }
 0x9d3   :  { %4213 = vmatprep.subr.mxu1 %v3773_v54 }
 0x9d4   :  { %4214 = vmatpush3.msra.mxu1 %v3773_v54 }
 0x9d5   :  { %4215 = vmatprep.subr.mxu1 %v3772_v18 }
 0x9d6   :  { %4216 = vmatpush3.msra.mxu1 %v3772_v18 }
 0x9d7   :  { %4217 = vmatprep.subr.mxu1 %v3771_v48 }
 0x9d8   :  { %4218 = vmatpush3.msra.mxu1 %v3771_v48 }
 0x9d9   :  { %4219 = vmatprep.subr.mxu1 %v3770_v7 }
 0x9da   :  { %4220 = vmatpush3.msra.mxu1 %v3770_v7  ;;  %v4152_v7 = vld [vmem:[#allocation3] ss:$0 sm:$0xff] }
 0x9db   :  { %4221 = vmatprep.subr.mxu1 %v3769_v44 }
 0x9dc   :  { %4222 = vmatpush3.msra.mxu1 %v3769_v44 }
 0x9dd   :  { %4223 = vmatprep.subr.mxu1 %v3768_v47 }
 0x9de   :  { %4224 = vmatpush3.msra.mxu1 %v3768_v47 }
 0x9df   :  { %4225 = vmatprep.subr.mxu1 %v3767_v5 }
 0x9e0   :  { %4226 = vmatpush3.msra.mxu1 %v3767_v5 }
 0x9e1   :  { %4227 = vmatprep.subr.mxu1 %v3766_v21 }
 0x9e2   :  { %4228 = vmatpush3.msra.mxu1 %v3766_v21 }
 0x9e3   :  { %4229 = vmatprep.subr.mxu1 %v3765_v4 }
 0x9e4   :  { %4230 = vmatpush3.msra.mxu1 %v3765_v4 }
 0x9e5   :  { %4231 = vmatprep.subr.mxu1 %v3764_v1 }
 0x9e6   :  { %4232 = vmatpush3.msra.mxu1 %v3764_v1 }
 0x9e7   :  { %4233 = vmatprep.subr.mxu1 %v3763_v41 }
 0x9e8   :  { %4234 = vmatpush3.msra.mxu1 %v3763_v41 }
 0x9e9   :  { %4235 = vmatprep.subr.mxu1 %v3762_v53 }
 0x9ea   :  { %4236 = vmatpush3.msra.mxu1 %v3762_v53 }
 0x9eb   :  { %4237 = vmatprep.subr.mxu1 %v3761_v2 }
 0x9ec   :  { %4238 = vmatpush3.msra.mxu1 %v3761_v2 }
 0x9ed   :  { %4239 = vmatprep.subr.mxu1 %v3760_v57 }
 0x9ee   :  { %4240 = vmatpush3.msra.mxu1 %v3760_v57 }
 0xa8f   :  { %v3650_v50 = vpop.f32.mrf.mxu1  ;;  %v3693_v28 = vpop.f32.mrf.mxu0 }
 0xa90   :  { %v3651_v60 = vadd.f32 %v3650_v50, %v9083_v31  ;;  %v3694_v42 = vadd.f32 %v3693_v28, %v9086_v49 }
 0xa91   :  { %v3652_v45 = vpop.f32.mrf.mxu1  ;;  %v3695_v55 = vpop.f32.mrf.mxu0 }
 0xa92   :  { %v4142_v25 = vmul.f32 -1.442695, %v3651_v60  ;;  %v3653_v9 = vadd.f32 %v3652_v45, %v9084_v43  ;;  %v3696_v15 = vadd.f32 %v3695_v55, %v9085_v59 }
 0xa93   :  { %v3654_v3 = vpop.f32.mrf.mxu1  ;;  %v3697_v16 = vpop.f32.mrf.mxu0 }
 0xa94   :  { %4925 = vpow2.f32 %v4142_v25  ;;  %v4144_v63 = vmul.f32 -1.442695, %v3653_v9  ;;  %v3655_v14 = vadd.f32 %v3654_v3, %v9083_v31  ;;  %v4146_v35 = vmul.f32 -1.442695, %v3696_v15 }
 0xa95   :  { %v3656_v23 = vpop.f32.mrf.mxu1  ;;  %v3699_v32 = vpop.f32.mrf.mxu0  ;;  %v3698_v33 = vadd.f32 %v3697_v16, %v9086_v49 }
 0xa96   :  { %4927 = vpow2.f32 %v4144_v63  ;;  %v4143_v12 = vmul.f32 -1.442695, %v3655_v14  ;;  %v3657_v58 = vadd.f32 %v3656_v23, %v9084_v43  ;;  %v3700_v37 = vadd.f32 %v3699_v32, %v9085_v59 }
 0xa98   :  { %4929 = vpow2.f32 %v4143_v12  ;;  %v4145_v8 = vmul.f32 -1.442695, %v3657_v58  ;;  %v4147_v19 = vmul.f32 -1.442695, %v3700_v37 }
 0xa9a   :  { %4931 = vpow2.f32 %v4145_v8 }
 0xa9b   :  { %4933 = vpow2.f32 %v4146_v35 }
 0xaa1   :  { %v4926_v40 = vpop.eup %4925 }
 0xaa2   :  { %v3708_v38 = vadd.f32 1.0, %v4926_v40 }
 0xaa3   :  { %v4928_v31 = vpop.eup %4927 }
 0xaa4   :  { %4935 = vrcp.f32 %v3708_v38  ;;  %v3720_v13 = vadd.f32 1.0, %v4928_v31 }
 0xaa5   :  { %v4930_v43 = vpop.eup %4929  ;;  %4937 = vtanh.f32 %v3694_v42 }
 0xaa6   :  { %4939 = vrcp.f32 %v3720_v13  ;;  %v3709_v56 = vadd.f32 1.0, %v4930_v43 }
 0xaa7   :  { %v4932_v39 = vpop.eup %4931  ;;  %4941 = vpow2.f32 %v4147_v19 }
 0xaa8   :  { %4943 = vrcp.f32 %v3709_v56  ;;  %v3721_v27 = vadd.f32 1.0, %v4932_v39  ;;  %v4934_v59 = vpop.eup %4933 }
 0xaa9   :  { %4945 = vtanh.f32 %v3698_v33  ;;  %v3734_v36 = vadd.f32 1.0, %v4934_v59 }
 0xaaa   :  { %4947 = vrcp.f32 %v3721_v27 }
 0xaab   :  { %4949 = vrcp.f32 %v3734_v36 }
 0xab1   :  { %v4936_v29 = vpop.eup %4935 }
 0xab2   :  { %v4938_v51 = vpop.eup %4937 }
 0xab3   :  { %v4940_v24 = vpop.eup %4939  ;;  %v3742_v17 = vmul.f32 %v4938_v51, %v4936_v29 }
 0xab4   :  { %v4942_v10 = vpop.eup %4941  ;;  %v3740_v11 = vmul.f32 %v4940_v24, %v8210_v52 }
 0xab5   :  { %v4944_v6 = vpop.eup %4943  ;;  %v3735_v34 = vadd.f32 1.0, %v4942_v10 }
 0xab6   :  { %v4946_v61 = vpop.eup %4945  ;;  %v3744_v49 = vadd.f32 %v3742_v17, %v3740_v11 }
 0xab7   :  { %v4948_v62 = vpop.eup %4947  ;;  %v3743_v22 = vmul.f32 %v4946_v61, %v4944_v6 }
 0xab8   :  { %v3741_v46 = vmul.f32 %v4948_v62, %v8213_v0  ;;  %4951 = vtanh.f32 %v3744_v49  ;;  %4150 = vst [vmem:[%s8307_s13 + $0x10] sm:$0xff] %v3744_v49  ;;  %v4950_v52 = vpop.eup %4949 }
 0xab9   :  { %4953 = vrcp.f32 %v3735_v34 }
 0xaba   :  { %v3745_v26 = vadd.f32 %v3743_v22, %v3741_v46 }
 0xabc   :  { %4151 = vst [vmem:[%s8307_s13 + $0x18] sm:$0xff] %v3745_v26  ;;  %4955 = vtanh.f32 %v3745_v26 }
 0xac5   :  { %v4952_v30 = vpop.eup %4951 }
 0xac6   :  { %v3748_v54 = vmul.f32 %v4952_v30, %v4950_v52  ;;  %v4954_v18 = vpop.eup %4953 }
 0xac8   :  { %4148 = vst [vmem:[%s8308_s12 + $0x10] sm:$0xff] %v3748_v54  ;;  %4241 = vmatprep.mubr.f32.mxu1 %v3748_v54 }
 0xac9   :  { %v4956_v0 = vpop.eup %4955 }
 0xaca   :  { %v3749_v48 = vmul.f32 %v4956_v0, %v4954_v18 }
 0xacc   :  { %4149 = vst [vmem:[%s8308_s12 + $0x18] sm:$0xff] %v3749_v48  ;;  %4242 = vmatmul.mubr.f32.vlgmr.msra.gmra.mxu1 %v3749_v48 }
 0xb8c   :  { %v4243_v44 = vpop.f32.mrf.mxu1 }
 0xb8d   :  { %v3855_v47 = vadd.f32 %v4243_v44, %v4152_v7 }
 0xb8e   :  { %v3849_v5 = vpop.f32.mrf.mxu1 }
 0xb8f   :  { %v4154_v21 = vmul.f32 -1.442695, %v3855_v47  ;;  %v3850_v4 = vadd.f32 %v4152_v7, %v3849_v5 }
 0xb91   :  { %4957 = vpow2.f32 %v4154_v21  ;;  %v4153_v1 = vmul.f32 -1.442695, %v3850_v4 }
 0xb93   :  { %4959 = vpow2.f32 %v4153_v1 }
 0xb9e   :  { %v4958_v41 = vpop.eup %4957 }
 0xb9f   :  { %v3865_v53 = vadd.f32 1.0, %v4958_v41 }
 0xba0   :  { %v4960_v2 = vpop.eup %4959 }
 0xba1   :  { %4961 = vrcp.f32 %v3865_v53  ;;  %v3864_v57 = vadd.f32 1.0, %v4960_v2 }
 0xba3   :  { %4963 = vrcp.f32 %v3864_v57 }
 0xbae   :  { %v4962_v20 = vpop.eup %4961 }
 0xbaf   :  { %3872 = vst.msk [vmem:[%s8311_s11 + $0x8] sm:$0xff] %vm3870_vm2, %v4962_v20 }
 0xbb0   :  { %v4964_v50 = vpop.eup %4963 }
 0xbb1   :  { %3871 = vst.msk [vmem:[%s8311_s11] sm:$0xff] %vm3870_vm2, %v4964_v50 }

</bundles_post_ra>
